<compile_context>
chip_gen: v7x
topology: tpu7x:2x2x1
jax: 0.10.0
libtpu: 0.0.40
codegen_flags: <defaults>
</compile_context>

<pallas_src>
import jax
import jax.numpy as jnp
from jax.experimental import pallas as pl
from jax.experimental.pallas import tpu as pltpu


IN_DIM = 512 * 7 * 7  # 25088, hardcoded in the PyTorch forward()
HIDDEN = 512          # torchvision VGG-16 uses 4096; kept small & synthetic
# TODO(synk): at the real HIDDEN=4096 the VMEM-resident (H,H) W2 block (32 MiB
# bf16) no longer fits; the hidden axis of layer 1 would need a j grid axis and
# layer 2 its own pass.  The fusion below assumes the synthetic HIDDEN=512.


# ----------------------------------------------------------------------------
# Fused kernel:  out = relu(relu((x @ w1_q) * s1 + b1) @ w2 + b2)
#   grid = (M // tm, K // tk);  k is the layer-1 reduction axis ("arbitrary").
#   The (tm, H) output block is resident across k and doubles as the layer-1
#   f32 accumulator; dequant scale, biases and layer 2 run in the last-k
#   epilogue.
# ----------------------------------------------------------------------------
def _fused_mlp_kernel(x_ref, w1_ref, s1_ref, b1_ref, w2_ref, b2_ref, o_ref):
    k = pl.program_id(1)

    @pl.when(k == 0)
    def _():
        o_ref[...] = jnp.zeros_like(o_ref)

    # Layer-1 partial sum: bf16 MXU inputs (int8 W1 widened exactly to bf16),
    # f32 accumulation directly into the resident output block.
    o_ref[...] += jnp.dot(
        x_ref[...].astype(jnp.bfloat16),
        w1_ref[...].astype(jnp.bfloat16),
        preferred_element_type=jnp.float32,
    )

    @pl.when(k == pl.num_programs(1) - 1)
    def _():
        # Linear1 epilogue: per-output-column dequant scale + bias + ReLU.
        h = jnp.maximum(o_ref[...] * s1_ref[...] + b1_ref[...], 0.0)
        # Linear2 + bias + ReLU against the VMEM-resident W2.
        y = jnp.dot(h.astype(jnp.bfloat16), w2_ref[...],
                    preferred_element_type=jnp.float32) + b2_ref[...]
        o_ref[...] = jnp.maximum(y, 0.0)


def _choose_tiling(m, sublane):
    """Return (m_padded, tm) with (8,128)-aligned tiles and tm capped at 512.

    Small M -> one block (the kernel is W1-stream bound there anyway).
    Large M -> pad to a multiple of 256, grow tm, and always keep >= 2 i-blocks
    so the "parallel" axis actually shards across the two v7x TensorCores.
    Bigger tm also minimizes W1 restreams: total W1 traffic = (M/tm) * |W1|.
    """
    round_up = lambda v, mult: -(-v // mult) * mult
    if m < 256:
        m_pad = round_up(m, sublane)
        return m_pad, m_pad
    m_pad = round_up(m, 256)
    if m_pad >= 1024 and m_pad % 512 == 0:
        return m_pad, 512
    if m_pad >= 512:
        return m_pad, 256
    return m_pad, 128  # m_pad == 256 -> two 128-row blocks (megacore)


def fused_mlp(x, w1_q, s1, b1, w2, b2, *, tk=3584):
    """relu(relu((x @ w1_q) * s1 + b1) @ w2 + b2) as one Pallas TPU kernel.

    x: (M, K) f32 or bf16; w1_q: (K, H) int8; s1/b1/b2: (H,) f32;
    w2: (H, H) bf16.  Requires K % tk == 0 (here K = 25088 = 7 * 3584, fixed by
    the module's hardcoded 512*7*7 reshape).
    """
    m, k_dim = x.shape
    k1, h = w1_q.shape
    assert k_dim == k1 and w2.shape == (h, h)
    assert s1.shape == (h,) and b1.shape == (h,) and b2.shape == (h,)
    assert k_dim % tk == 0, (k_dim, tk)

    sublane = 16 if x.dtype == jnp.bfloat16 else 8
    m_pad, tm = _choose_tiling(m, sublane)
    if m_pad != m:
        x = jnp.pad(x, ((0, m_pad - m), (0, 0)))

    s1_2d = s1.reshape(1, h)
    b1_2d = b1.reshape(1, h)
    b2_2d = b2.reshape(1, h)

    # Constant-index blocks: single-buffered (no benefit from double buffering).
    def _const_spec(shape):
        return pl.BlockSpec(shape, lambda i, k: (0, 0),
                            pipeline_mode=pl.Buffered(buffer_count=1))

    out = pl.pallas_call(
        _fused_mlp_kernel,
        out_shape=jax.ShapeDtypeStruct((m_pad, h), jnp.float32),
        grid=(m_pad // tm, k_dim // tk),
        in_specs=[
            pl.BlockSpec((tm, tk), lambda i, k: (i, k)),   # x  (streamed over k)
            pl.BlockSpec((tk, h), lambda i, k: (k, 0)),    # W1 (int8 stream)
            _const_spec((1, h)),                           # s1 (dequant scale)
            _const_spec((1, h)),                           # b1
            _const_spec((h, h)),                           # W2 (VMEM resident)
            _const_spec((1, h)),                           # b2
        ],
        out_specs=pl.BlockSpec((tm, h), lambda i, k: (i, 0)),
        compiler_params=pltpu.CompilerParams(
            dimension_semantics=("parallel", "arbitrary"),
            # Worst case ~28 MiB at tm=512 (f32 x double-buffered + int8 W1 +
            # bf16 dequant temps + resident out/W2); keep <= 48 MiB so the same
            # tiling stays safe on v7x's 64 MiB physical VMEM.
            vmem_limit_bytes=48 * 1024 * 1024,
        ),
    )(x, w1_q, s1_2d, b1_2d, w2, b2_2d)

    return out[:m] if m_pad != m else out


# ----------------------------------------------------------------------------
# Module wrapper
# ----------------------------------------------------------------------------
def _quantize_per_column_int8(w):
    """Symmetric per-output-column int8 quantization of a (K, H) weight."""
    amax = jnp.max(jnp.abs(w), axis=0)                     # (H,)
    scale = jnp.maximum(amax, 1e-12) / 127.0
    q = jnp.clip(jnp.round(w / scale), -127, 127).astype(jnp.int8)
    return q, scale.astype(jnp.float32)


def init_params(key, hidden=HIDDEN, in_dim=IN_DIM):
    k1, k2, k3, k4 = jax.random.split(key, 4)
    # Weights stored transposed vs. nn.Linear.  W1 (dominant HBM stream) is
    # int8 + per-column scale; W2 (tiny, VMEM resident) stays bf16.
    w1_f32 = jax.random.normal(k1, (in_dim, hidden), jnp.float32) * 0.01
    w1_q, s1 = _quantize_per_column_int8(w1_f32)
    return {
        "w1_q": w1_q,                                       # (K, H) int8
        "s1": s1,                                           # (H,)  f32
        "b1": jax.random.normal(k2, (hidden,), jnp.float32) * 0.01,
        "w2": (jax.random.normal(k3, (hidden, hidden), jnp.float32) * 0.01
               ).astype(jnp.bfloat16),
        "b2": jax.random.normal(k4, (hidden,), jnp.float32) * 0.01,
    }


def pool_to_feature_vector(rois, params):
    """rois: (N, 512, 7, 7) float32 (or bfloat16) -> (N, HIDDEN) float32."""
    n = rois.shape[0]
    x = rois.reshape(n, IN_DIM)
    # Linear + ReLU + Dropout(identity) + Linear + ReLU + Dropout(identity),
    # fused into a single kernel.  If the upstream RoI-pool producer can emit
    # bf16 rois, pass them through unchanged (halves the x HBM stream) -- do
    # not insert a standalone astype here.
    # TODO(synk): training-mode Dropout (stochastic masking) not implemented;
    # eval-mode semantics (identity) are used.
    return fused_mlp(x, params["w1_q"], params["s1"], params["b1"],
                     params["w2"], params["b2"])


def _reference(rois, params):
    # Mirrors kernel numerics: int8 W1 dequantized via per-column scale, bf16
    # MXU inputs, f32 accumulation, f32 bias/ReLU.
    x = rois.reshape(rois.shape[0], IN_DIM).astype(jnp.bfloat16)
    acc = jnp.dot(x, params["w1_q"].astype(jnp.bfloat16),
                  preferred_element_type=jnp.float32)
    h = jnp.maximum(acc * params["s1"] + params["b1"], 0.0)
    y = jnp.dot(h.astype(jnp.bfloat16), params["w2"],
                preferred_element_type=jnp.float32) + params["b2"]
    return jnp.maximum(y, 0.0)


if __name__ == "__main__":
    key = jax.random.PRNGKey(0)
    k_params, k_rois = jax.random.split(key)

    params = init_params(k_params)
    rois = jax.random.normal(k_rois, (2, 512, 7, 7), jnp.float32)

    out = pool_to_feature_vector(rois, params)
    out = jax.block_until_ready(out)

    ref = _reference(rois, params)
    assert out.shape == (2, HIDDEN)
    assert jnp.allclose(out, ref, atol=1e-2, rtol=1e-2), float(
        jnp.max(jnp.abs(out - ref)))

    print("KERNEL_OK")
</pallas_src>

<mosaic_0001>
module attributes {stable_mosaic.version = 11 : i64} {
  func.func @_fused_mlp_kernel(%arg0: i32, %arg1: i32, %arg2: memref<8x3584xf32, #tpu.memory_space<vmem>>, %arg3: memref<3584x512xi8, #tpu.memory_space<vmem>>, %arg4: memref<1x512xf32, #tpu.memory_space<vmem>>, %arg5: memref<1x512xf32, #tpu.memory_space<vmem>>, %arg6: memref<512x512xbf16, #tpu.memory_space<vmem>>, %arg7: memref<1x512xf32, #tpu.memory_space<vmem>>, %arg8: memref<8x512xf32, #tpu.memory_space<vmem>>) attributes {dimension_semantics = [#tpu.dimension_semantics<parallel>, #tpu.dimension_semantics<arbitrary>], iteration_bounds = array<i64: 1, 7>, scalar_prefetch = 0 : i64, scratch_operands = 0 : i64, tpu.core_type = #tpu.core_type<tc>, window_params = [{transform_indices = @transform_0, window_bounds = array<i64: 8, 3584>}, {transform_indices = @transform_1, window_bounds = array<i64: 3584, 512>}, {pipeline_mode = #tpu.pipeline_mode<synchronous>, transform_indices = @transform_2, window_bounds = array<i64: 1, 512>}, {pipeline_mode = #tpu.pipeline_mode<synchronous>, transform_indices = @transform_3, window_bounds = array<i64: 1, 512>}, {pipeline_mode = #tpu.pipeline_mode<synchronous>, transform_indices = @transform_4, window_bounds = array<i64: 512, 512>}, {pipeline_mode = #tpu.pipeline_mode<synchronous>, transform_indices = @transform_5, window_bounds = array<i64: 1, 512>}, {transform_indices = @transform_6, window_bounds = array<i64: 8, 512>}]} {
    %c0_i32 = arith.constant 0 : i32
    %0 = arith.cmpi eq, %arg1, %c0_i32 : i32
    %1 = arith.extui %0 : i1 to i32
    %c0_i32_0 = arith.constant 0 : i32
    %2 = arith.cmpi ne, %1, %c0_i32_0 : i32
    scf.if %2 {
      %cst_9 = arith.constant 0.000000e+00 : f32
      %14 = vector.broadcast %cst_9 : f32 to vector<8x512xf32>
      %c0_10 = arith.constant 0 : index
      %c0_11 = arith.constant 0 : index
      %15 = vector.load %arg8[%c0_10, %c0_11] : memref<8x512xf32, #tpu.memory_space<vmem>>, vector<8x512xf32>
      tpu.vector_store %arg8[%c0_10, %c0_11], %14 {strides = array<i32>} : memref<8x512xf32, #tpu.memory_space<vmem>>, vector<8x512xf32>,
    } else {
    }
    %c0 = arith.constant 0 : index
    %c0_1 = arith.constant 0 : index
    %3 = vector.load %arg8[%c0, %c0_1] : memref<8x512xf32, #tpu.memory_space<vmem>>, vector<8x512xf32>
    %c0_2 = arith.constant 0 : index
    %c0_3 = arith.constant 0 : index
    %4 = vector.load %arg2[%c0_2, %c0_3] : memref<8x3584xf32, #tpu.memory_space<vmem>>, vector<8x3584xf32>
    %5 = arith.truncf %4 : vector<8x3584xf32> to vector<8x3584xbf16>
    %c0_4 = arith.constant 0 : index
    %c0_5 = arith.constant 0 : index
    %6 = vector.load %arg3[%c0_4, %c0_5] : memref<3584x512xi8, #tpu.memory_space<vmem>>, vector<3584x512xi8>
    %7 = arith.sitofp %6 : vector<3584x512xi8> to vector<3584x512xbf16>
    %cst = arith.constant dense<0.000000e+00> : vector<8x512xf32>
    %8 = tpu.matmul %5, %7, %cst {dimension_numbers = #tpu.dot_dimension_numbers<[1], [0], [0], [1], [0, 0, 1, 1], [], []>} : vector<8x3584xbf16>, vector<3584x512xbf16>, vector<8x512xf32> -> vector<8x512xf32>
    %9 = arith.addf %3, %8 : vector<8x512xf32>
    %c0_6 = arith.constant 0 : index
    %c0_7 = arith.constant 0 : index
    %10 = vector.load %arg8[%c0_6, %c0_7] : memref<8x512xf32, #tpu.memory_space<vmem>>, vector<8x512xf32>
    tpu.vector_store %arg8[%c0_6, %c0_7], %9 {strides = array<i32>} : memref<8x512xf32, #tpu.memory_space<vmem>>, vector<8x512xf32>,
    %c6_i32 = arith.constant 6 : i32
    %11 = arith.cmpi eq, %arg1, %c6_i32 : i32
    %12 = arith.extui %11 : i1 to i32
    %c0_i32_8 = arith.constant 0 : i32
    %13 = arith.cmpi ne, %12, %c0_i32_8 : i32
    scf.if %13 {
      %c0_9 = arith.constant 0 : index
      %c0_10 = arith.constant 0 : index
      %14 = vector.load %arg8[%c0_9, %c0_10] : memref<8x512xf32, #tpu.memory_space<vmem>>, vector<8x512xf32>
      %c0_11 = arith.constant 0 : index
      %c0_12 = arith.constant 0 : index
      %15 = vector.load %arg4[%c0_11, %c0_12] : memref<1x512xf32, #tpu.memory_space<vmem>>, vector<1x512xf32>
      %16 = vector.broadcast %15 : vector<1x512xf32> to vector<8x512xf32>
      %17 = arith.mulf %14, %16 : vector<8x512xf32>
      %c0_13 = arith.constant 0 : index
      %c0_14 = arith.constant 0 : index
      %18 = vector.load %arg5[%c0_13, %c0_14] : memref<1x512xf32, #tpu.memory_space<vmem>>, vector<1x512xf32>
      %19 = vector.broadcast %18 : vector<1x512xf32> to vector<8x512xf32>
      %20 = arith.addf %17, %19 : vector<8x512xf32>
      %cst_15 = arith.constant 0.000000e+00 : f32
      %21 = vector.broadcast %cst_15 : f32 to vector<8x512xf32>
      %22 = arith.maximumf %20, %21 : vector<8x512xf32>
      %23 = arith.truncf %22 : vector<8x512xf32> to vector<8x512xbf16>
      %c0_16 = arith.constant 0 : index
      %c0_17 = arith.constant 0 : index
      %24 = vector.load %arg6[%c0_16, %c0_17] : memref<512x512xbf16, #tpu.memory_space<vmem>>, vector<512x512xbf16>
      %cst_18 = arith.constant dense<0.000000e+00> : vector<8x512xf32>
      %25 = tpu.matmul %23, %24, %cst_18 {dimension_numbers = #tpu.dot_dimension_numbers<[1], [0], [0], [1], [0, 0, 1, 1], [], []>} : vector<8x512xbf16>, vector<512x512xbf16>, vector<8x512xf32> -> vector<8x512xf32>
      %c0_19 = arith.constant 0 : index
      %c0_20 = arith.constant 0 : index
      %26 = vector.load %arg7[%c0_19, %c0_20] : memref<1x512xf32, #tpu.memory_space<vmem>>, vector<1x512xf32>
      %27 = vector.broadcast %26 : vector<1x512xf32> to vector<8x512xf32>
      %28 = arith.addf %25, %27 : vector<8x512xf32>
      %cst_21 = arith.constant 0.000000e+00 : f32
      %29 = vector.broadcast %cst_21 : f32 to vector<8x512xf32>
      %30 = arith.maximumf %28, %29 : vector<8x512xf32>
      %c0_22 = arith.constant 0 : index
      %c0_23 = arith.constant 0 : index
      %31 = vector.load %arg8[%c0_22, %c0_23] : memref<8x512xf32, #tpu.memory_space<vmem>>, vector<8x512xf32>
      tpu.vector_store %arg8[%c0_22, %c0_23], %30 {strides = array<i32>} : memref<8x512xf32, #tpu.memory_space<vmem>>, vector<8x512xf32>,
    } else {
    }
    return
  }
  func.func @transform_0(%arg0: i32, %arg1: i32) -> (i32, i32) {
    %c0_i32 = arith.constant 0 : i32
    return %arg0, %arg1 : i32, i32
  }
  func.func @transform_1(%arg0: i32, %arg1: i32) -> (i32, i32) {
    %c0_i32 = arith.constant 0 : i32
    %c0_i32_0 = arith.constant 0 : i32
    return %arg1, %c0_i32 : i32, i32
  }
  func.func @transform_2(%arg0: i32, %arg1: i32) -> (i32, i32) {
    %c0_i32 = arith.constant 0 : i32
    %c0_i32_0 = arith.constant 0 : i32
    %c0_i32_1 = arith.constant 0 : i32
    return %c0_i32, %c0_i32_0 : i32, i32
  }
  func.func @transform_3(%arg0: i32, %arg1: i32) -> (i32, i32) {
    %c0_i32 = arith.constant 0 : i32
    %c0_i32_0 = arith.constant 0 : i32
    %c0_i32_1 = arith.constant 0 : i32
    return %c0_i32, %c0_i32_0 : i32, i32
  }
  func.func @transform_4(%arg0: i32, %arg1: i32) -> (i32, i32) {
    %c0_i32 = arith.constant 0 : i32
    %c0_i32_0 = arith.constant 0 : i32
    %c0_i32_1 = arith.constant 0 : i32
    return %c0_i32, %c0_i32_0 : i32, i32
  }
  func.func @transform_5(%arg0: i32, %arg1: i32) -> (i32, i32) {
    %c0_i32 = arith.constant 0 : i32
    %c0_i32_0 = arith.constant 0 : i32
    %c0_i32_1 = arith.constant 0 : i32
    return %c0_i32, %c0_i32_0 : i32, i32
  }
  func.func @transform_6(%arg0: i32, %arg1: i32) -> (i32, i32) {
    %c0_i32 = arith.constant 0 : i32
    %c0_i32_0 = arith.constant 0 : i32
    return %arg0, %c0_i32 : i32, i32
  }
}

</mosaic_0001>

<bundles_post_ra>
// kernel: tpu_custom_call.1
= control target key start
LH: loop header
LB: loop body
LE: loop exit
PB: predicated region body
PF: predicated region fallthrough
CT: control target
= control target key end

     0   :  { %s5891_s0 = inlined_call_operand.hbm [shape: f32[8,25088], index: 0, kind: input, shape index: {}]   ;;  %s5892_s1 = inlined_call_operand.hbm [shape: s8[25088,512], index: 1, kind: input, shape index: {}]   ;;  %s5893_s2 = inlined_call_operand.hbm [shape: f32[1,512], index: 2, kind: input, shape index: {}]   ;;  %s5894_s3 = inlined_call_operand.hbm [shape: f32[1,512], index: 3, kind: input, shape index: {}]   ;;  %s5895_s4 = inlined_call_operand.hbm [shape: bf16[512,512], index: 4, kind: input, shape index: {}]   ;;  %s5896_s5 = inlined_call_operand.hbm [shape: f32[1,512], index: 5, kind: input, shape index: {}]   ;;  %s5897_s6 = inlined_call_operand.hbm [shape: f32[8,512], index: 6, kind: output, shape index: {}]  }
   0x1   :  { %5900 = sst [smem:[#allocation20_spill]] %s5891_s0 }
   0x2   :  { %11 = vsyncpa [#allocation3], 0 }
   0x3   :  { %13 = vsyncpa [#allocation3 + $0x1], 0 }
   0x4   :  { %14 = vsyncpa [#allocation6], 0 }
   0x5   :  { %16 = vsyncpa [#allocation6 + $0x1], 0 }
   0x6   :  { %17 = vsyncpa [#allocation9], 0 }
   0x7   :  { %18 = vsyncpa [#allocation12], 0 }
   0x8   :  { %19 = vsyncpa [#allocation4], 0  ;;  %s4896_s21 = smov 0   ;;  %s4898_s22 = smov 0  }
   0x9   :  { %s4900_s23 = smov 0   ;;  %s4902_s24 = smov 0  }
   0xa   :  { %s4904_s25 = smov 0   ;;  %s4906_s26 = smov 0  }
   0xb LB: > { %s4927_s27 = sadd.s32 4294967295, %s4847_s26   ;;  %p4106_p0 = scmp.ge.s32.totalorder %s4847_s26, 1  ;;  %s4847_s26 = sphi %s4906_s26, %s25_s26   ;;  %s4843_s25 = sphi %s4904_s25, %s5919_s25   ;;  %s4839_s24 = sphi %s4902_s24, %s5918_s24   ;;  %s4835_s23 = sphi %s4900_s23, %s5917_s23   ;;  %s4831_s22 = sphi %s4898_s22, %s5916_s22   ;;  %s4827_s21 = sphi %s4896_s21, %s5915_s21  }
   0xc   : > { %p5898_p1 = scmp.eq.s32.totalorder %s4927_s27, 0  ;;  %p206_p2 = scmp.lt.s32.totalorder %s4847_s26, 8 }
   0xd   : > { %s4849_s29 = smov [#allocation7]   ;;  %s4850_s7 = smov [#allocation8]  }
   0xe   : > { %p4932_p3 = pnand %p4106_p0, %p206_p2  ;;  %s219_s30 = sshll.u32 %s4849_s29, 4  ;;  %s220_s30 = int_to_ptr.vmem [resolvable:$true] %s219_s30 }
   0xf   : > { %s230_s8 = sshll.u32 %s4850_s7, 4  ;;  %s4851_s10 = smov [#allocation10]   ;;  %s4944_s8 = int_to_ptr.vmem [resolvable:$true] %s230_s8 }
  0x10   : > { %s5901_s28 = scalar_select %p4932_p3, 1, 0 }
  0x11   : > { %p4298_p4 = pneg %p4932_p3  ;;  %s240_s11 = sshll.u32 %s4851_s10, 4  ;;  %s4946_s11 = int_to_ptr.vmem [resolvable:$true] %s240_s11 }
  0x12   : > { %s4579_s14 = scalar_lea.hbm %s5893_s2, 64 }
  0x13   : > { %p4940_p5 = pnand %p4298_p4, %p5898_p1  ;;  %p4580_p6 = scmp.ne.s32.totalorder %s5893_s2, %s4579_s14 }
  0x14   : > { %p4586_p10 = scmp.lt.u32.totalorder %s4579_s14, %s5893_s2 }
  0x15   : > { %p4956_p7 = pneg %p4940_p5 }
  0x17   : > { %p4582_p8 = pnand %p4956_p7, %p4580_p6 }
  0x19   : > { %p4583_p9 = pneg %p4582_p8 }
  0x1b   : > { %p4588_p11 = pnand %p4586_p10, %p4583_p9 }
  0x1d   : > { %4591 = shalt.err (!%p4588_p11)
}
  0x1e   : > { %s4592_s20 = scalar_lea.vmem %s220_s30, 64  ;;  %p4600_p2 = scmp.lt.s32.totalorder %s220_s30, %s220_s30 }
  0x1f   : > { %p4593_p12 = scmp.ne.s32.totalorder %s220_s30, %s4592_s20  ;;  %p4601_p4 = scmp.lt.s32.totalorder %s4592_s20, %s4592_s20 }
  0x21   : > { %p4595_p13 = pnand %p4593_p12, %p4956_p7  ;;  %p4602_p1 = por %p4601_p4, %p4600_p2 }
  0x23   : > { %p4596_p0 = pneg %p4595_p13 }
  0x25   : > { %p4603_p3 = pnand %p4602_p1, %p4596_p0 }
  0x27   : > { %4606 = shalt.err (!%p4603_p3)
}
  0x28   : > { %4301 = dma.hbm_to_vmem [thread:$0]  (!%p4940_p5), %s5893_s2, 64, %s220_s30, [#allocation6]  }
  0x29   : > { %s4607_s13 = scalar_lea.hbm %s5894_s3, 64 }
  0x2a   : > { %p4608_p6 = scmp.ne.s32.totalorder %s5894_s3, %s4607_s13  ;;  %p4614_p1 = scmp.lt.u32.totalorder %s4607_s13, %s5894_s3 }
  0x2c   : > { %p4610_p8 = pnand %p4608_p6, %p4956_p7 }
  0x2e   : > { %p4611_p9 = pneg %p4610_p8 }
  0x30   : > { %p4616_p3 = pnand %p4614_p1, %p4611_p9 }
  0x32   : > { %4619 = shalt.err (!%p4616_p3)
}
  0x33   : > { %s4620_s30 = scalar_lea.vmem %s4944_s8, 64  ;;  %p4628_p13 = scmp.lt.s32.totalorder %s4944_s8, %s4944_s8 }
  0x34   : > { %p4621_p10 = scmp.ne.s32.totalorder %s4944_s8, %s4620_s30  ;;  %p4629_p0 = scmp.lt.s32.totalorder %s4620_s30, %s4620_s30 }
  0x36   : > { %p4623_p11 = pnand %p4621_p10, %p4956_p7  ;;  %p4630_p2 = por %p4629_p0, %p4628_p13 }
  0x38   : > { %p4624_p12 = pneg %p4623_p11 }
  0x3a   : > { %p4631_p4 = pnand %p4630_p2, %p4624_p12 }
  0x3c   : > { %4634 = shalt.err (!%p4631_p4)
}
  0x3d   : > { %4304 = dma.hbm_to_vmem [thread:$0]  (!%p4940_p5), %s5894_s3, 64, %s4944_s8, [#allocation9]  }
  0x3e   : > { %s4635_s10 = scalar_lea.hbm %s5895_s4, 16384 }
  0x3f   : > { %p4636_p6 = scmp.ne.s32.totalorder %s5895_s4, %s4635_s10  ;;  %p4642_p1 = scmp.lt.u32.totalorder %s4635_s10, %s5895_s4 }
  0x41   : > { %p4638_p8 = pnand %p4636_p6, %p4956_p7 }
  0x43   : > { %p4639_p9 = pneg %p4638_p8 }
  0x45   : > { %p4644_p3 = pnand %p4642_p1, %p4639_p9 }
  0x47   : > { %4647 = shalt.err (!%p4644_p3)
}
  0x48   : > { %s4648_s8 = scalar_lea.vmem %s4946_s11, 16384  ;;  %p4656_p13 = scmp.lt.s32.totalorder %s4946_s11, %s4946_s11 }
  0x49   : > { %p4649_p10 = scmp.ne.s32.totalorder %s4946_s11, %s4648_s8  ;;  %p4657_p0 = scmp.lt.s32.totalorder %s4648_s8, %s4648_s8 }
  0x4b   : > { %p4651_p11 = pnand %p4649_p10, %p4956_p7  ;;  %p4658_p2 = por %p4657_p0, %p4656_p13 }
  0x4d   : > { %p4652_p12 = pneg %p4651_p11 }
  0x4f   : > { %p4659_p4 = pnand %p4658_p2, %p4652_p12 }
  0x51   : > { %4662 = shalt.err (!%p4659_p4)
}
  0x52   : > { %s4852_s16 = smov 256   ;;  %s4853_s18 = smov 16  }
  0x53   : > { %4307 = dma.hbm_to_vmem [thread:$0]  (!%p4940_p5), %s5895_s4, 16384, %s4946_s11, [#allocation9], %s4852_s16, %s4852_s16, %s4853_s18  }
  0x54   : > { %s4854_s20 = smov [#allocation11]   ;;  %s4663_s12 = scalar_lea.hbm %s5896_s5, 64 }
  0x55   : > { %s254_s29 = sshll.u32 %s4854_s20, 4  ;;  %p4664_p6 = scmp.ne.s32.totalorder %s5896_s5, %s4663_s12  ;;  %s255_s29 = int_to_ptr.vmem [resolvable:$true] %s254_s29 }
  0x56   : > { %p4670_p1 = scmp.lt.u32.totalorder %s4663_s12, %s5896_s5 }
  0x57   : > { %p4666_p8 = pnand %p4664_p6, %p4956_p7 }
  0x59   : > { %p4667_p9 = pneg %p4666_p8 }
  0x5b   : > { %p4672_p3 = pnand %p4670_p1, %p4667_p9 }
  0x5d   : > { %4675 = shalt.err (!%p4672_p3)
}
  0x5e   : > { %s4676_s11 = scalar_lea.vmem %s255_s29, 64  ;;  %p4684_p13 = scmp.lt.s32.totalorder %s255_s29, %s255_s29 }
  0x5f   : > { %p4677_p10 = scmp.ne.s32.totalorder %s255_s29, %s4676_s11  ;;  %p4685_p0 = scmp.lt.s32.totalorder %s4676_s11, %s4676_s11 }
  0x61   : > { %p4679_p11 = pnand %p4677_p10, %p4956_p7  ;;  %p4686_p2 = por %p4685_p0, %p4684_p13 }
  0x63   : > { %p4680_p12 = pneg %p4679_p11 }
  0x65   : > { %p4687_p4 = pnand %p4686_p2, %p4680_p12 }
  0x67   : > { %4690 = shalt.err (!%p4687_p4)
}
  0x68   : > { %4310 = dma.hbm_to_vmem [thread:$0]  (!%p4940_p5), %s5896_s5, 64, %s255_s29, [#allocation12]  }
  0x69   : > { %s34_s17 = sadd.s32 1, %s4843_s25  ;;  %s46_s30 = sadd.s32 1, %s4835_s23 }
  0x6a   : > { %p35_p7 = scmp.ge.s32.totalorder %s34_s17, 7  ;;  %p53_p6 = scmp.ne.s32.totalorder %s4835_s23, %s4831_s22 }
  0x6b   : > { %p54_p8 = scmp.eq.s32.totalorder %s4847_s26, 0  ;;  %p59_p9 = scmp.ne.s32.totalorder %s4831_s22, %s4827_s21 }
  0x6c   : > { %s5921_s17 = smov (%p35_p7, %s34_s17), 0  ;;  %p5904_p3 = scmp.eq.s32.totalorder %s4927_s27, 0 }
  0x6d   : > { %p55_p1 = por %p54_p8, %p53_p6  ;;  %s42_s19 = ssub.s32 %s4843_s25, %s5921_s17 }
  0x6e   : > { %p5047_p10 = por %p5904_p3, %p59_p9  ;;  %p4322_p11 = scmp.lt.s32.totalorder %s4847_s26, 7 }
  0x6f   : > { %p44_p12 = scmp.eq.s32.totalorder %s42_s19, 0  ;;  %s5055_s20 = sand.u32 1, %s4835_s23  }
  0x70   : > { %s4270_s29 = smul.u32 224, %s5055_s20  ;;  %p5062_p5 = pnand %p4322_p11, %p55_p1 }
  0x71   : > { %s5059_s7 = scalar_select %p44_p12, %s4835_s23, %s46_s30  }
  0x72   : > { %s4254_s21 = smul.u32 3584, %s4843_s25  ;;  %s269_s10 = scalar_lea.vmem [#allocation2], %s4270_s29 }
  0x73   : > { %s279_s12 = sshll.u32 %s269_s10, 4  ;;  %s5907_s0 = sld [smem:[#allocation20_spill]]  ;;  %s5071_s12 = int_to_ptr.vmem [resolvable:$true] %s279_s12 }
  0x74   : > { %s4271_s11 = smul.u32 3584, %s5055_s20  ;;  %s266_s16 = scalar_lea.sflag [#allocation3], %s5055_s20 }
  0x75   : > { %p4693_p0 = pneg %p5062_p5 }
  0x79   : > { %s5069_s8 = scalar_lea.hbm %s5907_s0, %s4254_s21  ;;  %s4696_s29 = scalar_lea.hbm %s5907_s0, 25088 }
  0x7a   : > { %s4691_s18 = scalar_lea.hbm %s5069_s8, 3584  ;;  %p4697_p7 = scmp.lt.u32.totalorder %s5069_s8, %s5907_s0 }
  0x7b   : > { %p4692_p13 = scmp.ne.s32.totalorder %s5069_s8, %s4691_s18  ;;  %p4698_p6 = scmp.lt.u32.totalorder %s4696_s29, %s4691_s18 }
  0x7c   : > { %p4700_p9 = scmp.lt.u32.totalorder %s4691_s18, %s5069_s8 }
  0x7d   : > { %p4694_p2 = pnand %p4693_p0, %p4692_p13  ;;  %p4699_p8 = por %p4698_p6, %p4697_p7 }
  0x7f   : > { %p4695_p4 = pneg %p4694_p2  ;;  %p4701_p1 = por %p4700_p9, %p4699_p8 }
  0x81   : > { %p4702_p3 = pnand %p4701_p1, %p4695_p4 }
  0x83   : > { %4705 = shalt.err (!%p4702_p3)
}
  0x84   : > { %s4706_s14 = scalar_lea.vmem %s5071_s12, 3584  ;;  %s4855_s15 = smov [#allocation2]  }
  0x85   : > { %p4707_p11 = scmp.ne.s32.totalorder %s5071_s12, %s4706_s14  ;;  %s4711_s30 = sshll.u32 %s4855_s15, 4  ;;  %s4712_s30 = int_to_ptr.vmem [resolvable:$false] %s4711_s30 }
  0x86   : > { %s4713_s19 = scalar_lea.vmem %s4712_s30, 7168  ;;  %p4714_p2 = scmp.lt.s32.totalorder %s5071_s12, %s4712_s30 }
  0x87   : > { %p4709_p12 = pnand %p4707_p11, %p4693_p0  ;;  %p4715_p7 = scmp.lt.s32.totalorder %s4713_s19, %s4706_s14 }
  0x89   : > { %p4710_p13 = pneg %p4709_p12  ;;  %p4716_p6 = por %p4715_p7, %p4714_p2 }
  0x8b   : > { %p4717_p8 = pnand %p4716_p6, %p4710_p13 }
  0x8d   : > { %4720 = shalt.err (!%p4717_p8)
}
  0x8e   : > { %4314 = dma.hbm_to_vmem [thread:$0]  (!%p5062_p5), %s5069_s8, 3584, %s5071_s12, %s266_s16  }
  0x8f   : > { %s4257_s18 = smul.u32 57344, %s4843_s25  ;;  %s290_s29 = scalar_lea.vmem [#allocation5], %s4271_s11 }
  0x90   : > { %s298_s21 = sshll.u32 %s290_s29, 4  ;;  %s286_s10 = sand.u32 1, %s4847_s26   ;;  %s5104_s21 = int_to_ptr.vmem [resolvable:$true] %s298_s21 }
  0x91   : > { %s5109_s30 = scalar_lea.hbm %s5892_s1, %s4257_s18  ;;  %s5111_s19 = scalar_lea.sflag [#allocation6], %s286_s10 }
  0x92   : > { %s4721_s0 = scalar_lea.hbm %s5109_s30, 57344  ;;  %s4726_s8 = scalar_lea.hbm %s5892_s1, 401408 }
  0x93   : > { %p4722_p4 = scmp.ne.s32.totalorder %s5109_s30, %s4721_s0  ;;  %p4727_p3 = scmp.lt.u32.totalorder %s5109_s30, %s5892_s1 }
  0x94   : > { %p4728_p11 = scmp.lt.u32.totalorder %s4726_s8, %s4721_s0  ;;  %p4730_p13 = scmp.lt.u32.totalorder %s4721_s0, %s5109_s30 }
  0x95   : > { %p4724_p9 = pnand %p4722_p4, %p4693_p0 }
  0x96   : > { %p4729_p12 = por %p4728_p11, %p4727_p3 }
  0x97   : > { %p4725_p1 = pneg %p4724_p9 }
  0x98   : > { %p4731_p2 = por %p4730_p13, %p4729_p12 }
  0x9a   : > { %p4732_p7 = pnand %p4731_p2, %p4725_p1 }
  0x9c   : > { %4735 = shalt.err (!%p4732_p7)
}
  0x9d   : > { %s4736_s18 = scalar_lea.vmem %s5104_s21, 57344  ;;  %s4856_s29 = smov [#allocation5]  }
  0x9e   : > { %p4737_p6 = scmp.ne.s32.totalorder %s5104_s21, %s4736_s18  ;;  %s4741_s10 = sshll.u32 %s4856_s29, 4  ;;  %s4742_s10 = int_to_ptr.vmem [resolvable:$false] %s4741_s10 }
  0x9f   : > { %s4743_s14 = scalar_lea.vmem %s4742_s10, 114688  ;;  %p4744_p9 = scmp.lt.s32.totalorder %s5104_s21, %s4742_s10 }
  0xa0   : > { %p4739_p8 = pnand %p4737_p6, %p4693_p0  ;;  %p4745_p3 = scmp.lt.s32.totalorder %s4743_s14, %s4736_s18 }
  0xa2   : > { %p4740_p4 = pneg %p4739_p8  ;;  %p4746_p11 = por %p4745_p3, %p4744_p9 }
  0xa4   : > { %p4747_p12 = pnand %p4746_p11, %p4740_p4 }
  0xa6   : > { %4750 = shalt.err (!%p4747_p12)
}
  0xa7   : > { %s4857_s0 = smov 512   ;;  %s4858_s15 = smov 32  }
  0xa8   : > { %4317 = dma.hbm_to_vmem [thread:$0]  (!%p5062_p5), %s5109_s30, 57344, %s5104_s21, %s5111_s19, %s4857_s0, %s4857_s0, %s4858_s15  }
  0xa9   : > { %p5908_p0 = scmp.ne.s32.totalorder %s5901_s28, 0 }
  0xaa   : > { %s312_s20 = sand.u32 (!%p5908_p0), 1, %s4831_s22  }
  0xab   : > { %310 = sbr.rel (%p5908_p0) target bundleno = 1645 (0x66d), region = 44  ;;  %s313_s8 = scalar_lea.sflag (!%p5908_p0), [#allocation3], %s312_s20 }
  0xac   : > { %s4272_s12 = smul.u32 (!%p5908_p0), 224, %s312_s20 }
  0xae   : > { %s5140_s11 = scalar_lea.vmem (!%p5908_p0), [#allocation2], %s4272_s12 }
  0xb2   : > { %4802 = dma.done.wait (%p5047_p10), %s313_s8, 3584  }
  0xb3   : > { %4804 = vsyncadd (%p5047_p10), %s313_s8, 4294963712  ;;  %s321_s16 = sand.u32 1, %s4927_s27   ;;  %s4273_s13 = smul.u32 3584, %s312_s20 }
  0xb4   : > { %s322_s21 = scalar_lea.sflag [#allocation6], %s321_s16 }
  0xb5   : > { %s5147_s30 = scalar_lea.vmem [#allocation5], %s4273_s13 }
  0xb6   : > { %4806 = dma.done.wait (%p5047_p10), %s322_s21, 57344  }
  0xb7   : > { %4808 = vsyncadd (%p5047_p10), %s322_s21, 4294909952  ;;  %p5909_p5 = scmp.eq.s32.totalorder %s4927_s27, 0 }
  0xb9   : > { %4810 = dma.done.wait (%p5909_p5), [#allocation6], 64   ;;  %p5910_p1 = pmov %p5909_p5 }
  0xbb   : > { %4812 = vsyncadd (%p5910_p1), [#allocation6], 4294967232  ;;  %p5911_p13 = pmov %p5910_p1 }
  0xbc   : > { %p5912_p2 = pmov %p5910_p1 }
  0xbd   : > { %4814 = dma.done.wait (%p5911_p13), [#allocation9], 16448  }
  0xbe   : > { %4816 = vsyncadd (%p5912_p2), [#allocation9], 4294950848  ;;  %p5913_p7 = pmov %p5910_p1 }
  0xbf   : > { %p5914_p6 = pmov %p5910_p1 }
  0xc0   : > { %4818 = dma.done.wait (%p5913_p7), [#allocation12], 64  }
  0xc1   : > { %4820 = vsyncadd (%p5914_p6), [#allocation12], 4294967232  ;;  %p4120_p10 = scmp.ne.s32.totalorder %s4839_s24, 0 }
  0xc2   : > { %v4859_v0 = vmov (!%p4120_p10), 0.0  }
  0xc3   : > { %375 = sbr.rel (%p4120_p10) target bundleno = 202 (0xca), region = 72  ;;  %376 = vst [vmem:[#allocation13] sm:$0xff] (!%p4120_p10), %v4859_v0  ;;  %377 = vst [vmem:[#allocation13 + $0x8] sm:$0xff] (!%p4120_p10), %v4859_v0 }
  0xc4   : > { %378 = vst [vmem:[#allocation13 + $0x10] sm:$0xff] (!%p4120_p10), %v4859_v0  ;;  %379 = vst [vmem:[#allocation13 + $0x18] sm:$0xff] (!%p4120_p10), %v4859_v0 }
  0xca PF: > { %v441_v1 = vld [vmem:[%s5147_s30 + $0x8] sm:$0xff]  ;;  %v440_v3 = vld [vmem:[%s5147_s30] sm:$0xff]  ;;  %v387_v32 = vld [vmem:[%s5140_s11 + $0x18] sm:$0xff]  ;;  %p4121_p8 = scmp.ne.s32.totalorder %s4839_s24, 6 }
  0xcb   : > { %v473_v2 = vld [vmem:[%s5147_s30 + $0x108] sm:$0xff]  ;;  %v889_v4 = vunpack.c.l.s8.bf16 %v441_v1  ;;  %v893_v5 = vunpack.c.h.s8.bf16 %v441_v1  ;;  %v472_v8 = vld [vmem:[%s5147_s30 + $0x100] sm:$0xff]  ;;  %v888_v9 = vunpack.c.l.s8.bf16 %v440_v3  ;;  %v892_v13 = vunpack.c.h.s8.bf16 %v440_v3 }
  0xcc   : > { %v953_v6 = vunpack.c.l.s8.bf16 %v473_v2  ;;  %v957_v7 = vunpack.c.h.s8.bf16 %v473_v2  ;;  %v952_v10 = vunpack.c.l.s8.bf16 %v472_v8  ;;  %v445_v11 = vld [vmem:[%s5147_s30 + $0x28] sm:$0xff]  ;;  %v956_v14 = vunpack.c.h.s8.bf16 %v472_v8  ;;  %v444_v17 = vld [vmem:[%s5147_s30 + $0x20] sm:$0xff] }
  0xcd   : > { %v477_v12 = vld [vmem:[%s5147_s30 + $0x128] sm:$0xff]  ;;  %1784 = vmatprep.subr.bf16.mxu0 %v889_v4  ;;  %v897_v15 = vunpack.c.l.s8.bf16 %v445_v11  ;;  %v476_v18 = vld [vmem:[%s5147_s30 + $0x120] sm:$0xff]  ;;  %v896_v19 = vunpack.c.l.s8.bf16 %v444_v17  ;;  %v901_v21 = vunpack.c.h.s8.bf16 %v445_v11  ;;  %v900_v25 = vunpack.c.h.s8.bf16 %v444_v17 }
  0xce   : > { %1825 = vmatprep.subr.bf16.mxu1 %v953_v6  ;;  %1785 = vmatpush1.bf16.msra.mxu0 %v888_v9  ;;  %v961_v16 = vunpack.c.l.s8.bf16 %v477_v12  ;;  %v960_v20 = vunpack.c.l.s8.bf16 %v476_v18  ;;  %v965_v22 = vunpack.c.h.s8.bf16 %v477_v12  ;;  %v449_v23 = vld [vmem:[%s5147_s30 + $0x48] sm:$0xff]  ;;  %v964_v26 = vunpack.c.h.s8.bf16 %v476_v18  ;;  %v448_v29 = vld [vmem:[%s5147_s30 + $0x40] sm:$0xff] }
  0xcf   : > { %1826 = vmatpush1.bf16.msra.mxu1 %v952_v10  ;;  %1786 = vmatprep.subr.bf16.mxu0 %v893_v5  ;;  %v481_v24 = vld [vmem:[%s5147_s30 + $0x148] sm:$0xff]  ;;  %v905_v27 = vunpack.c.l.s8.bf16 %v449_v23  ;;  %v480_v30 = vld [vmem:[%s5147_s30 + $0x140] sm:$0xff]  ;;  %v904_v33 = vunpack.c.l.s8.bf16 %v448_v29  ;;  %v909_v35 = vunpack.c.h.s8.bf16 %v449_v23  ;;  %v5182_v38 = vpack.c.bf16 %v387_v32, %v387_v32 }
  0xd0   : > { %1827 = vmatprep.subr.bf16.mxu1 %v957_v7  ;;  %v969_v28 = vunpack.c.l.s8.bf16 %v481_v24  ;;  %v385_v31 = vld [vmem:[%s5140_s11 + $0x8] sm:$0xff]  ;;  %v968_v34 = vunpack.c.l.s8.bf16 %v480_v30  ;;  %v973_v36 = vunpack.c.h.s8.bf16 %v481_v24  ;;  %v908_v41 = vunpack.c.h.s8.bf16 %v448_v29  ;;  %v452_v45 = vld [vmem:[%s5147_s30 + $0x60] sm:$0xff] }
  0xd1   : > { %v5180_v37 = vpack.c.bf16 %v385_v31, %v385_v31  ;;  %v453_v39 = vld [vmem:[%s5147_s30 + $0x68] sm:$0xff]  ;;  %1857 = vmatprep.mubr.bf16.mxu1 %v5182_v38  ;;  %v972_v42 = vunpack.c.h.s8.bf16 %v480_v30  ;;  %v484_v46 = vld [vmem:[%s5147_s30 + $0x160] sm:$0xff]  ;;  %v912_v47 = vunpack.c.l.s8.bf16 %v452_v45  ;;  %v916_v53 = vunpack.c.h.s8.bf16 %v452_v45 }
  0xd2   : > { %1787 = vmatpush1.bf16.msra.mxu0 %v892_v13  ;;  %v485_v40 = vld [vmem:[%s5147_s30 + $0x168] sm:$0xff]  ;;  %v913_v43 = vunpack.c.l.s8.bf16 %v453_v39  ;;  %v976_v48 = vunpack.c.l.s8.bf16 %v484_v46  ;;  %v917_v49 = vunpack.c.h.s8.bf16 %v453_v39  ;;  %v980_v54 = vunpack.c.h.s8.bf16 %v484_v46  ;;  %v456_v57 = vld [vmem:[%s5147_s30 + $0x80] sm:$0xff] }
  0xd3   : > { %1828 = vmatpush1.bf16.msra.mxu1 %v956_v14  ;;  %1788 = vmatprep.subr.bf16.mxu0 %v897_v15  ;;  %v977_v44 = vunpack.c.l.s8.bf16 %v485_v40  ;;  %v981_v50 = vunpack.c.h.s8.bf16 %v485_v40  ;;  %v457_v51 = vld [vmem:[%s5147_s30 + $0x88] sm:$0xff]  ;;  %v488_v58 = vld [vmem:[%s5147_s30 + $0x180] sm:$0xff]  ;;  %v920_v59 = vunpack.c.l.s8.bf16 %v456_v57  ;;  %v924_v1 = vunpack.c.h.s8.bf16 %v456_v57 }
  0xd4   : > { %1829 = vmatprep.subr.bf16.mxu1 %v961_v16  ;;  %1816 = vmatprep.mubr.bf16.mxu0 %v5180_v37  ;;  %v489_v52 = vld [vmem:[%s5147_s30 + $0x188] sm:$0xff]  ;;  %v921_v55 = vunpack.c.l.s8.bf16 %v457_v51  ;;  %v984_v60 = vunpack.c.l.s8.bf16 %v488_v58  ;;  %v925_v61 = vunpack.c.h.s8.bf16 %v457_v51  ;;  %v988_v2 = vunpack.c.h.s8.bf16 %v488_v58  ;;  %v460_v5 = vld [vmem:[%s5147_s30 + $0xa0] sm:$0xff] }
  0xd5   : > { %v985_v56 = vunpack.c.l.s8.bf16 %v489_v52  ;;  %v989_v62 = vunpack.c.h.s8.bf16 %v489_v52  ;;  %v461_v63 = vld [vmem:[%s5147_s30 + $0xa8] sm:$0xff]  ;;  %v492_v6 = vld [vmem:[%s5147_s30 + $0x1a0] sm:$0xff]  ;;  %v928_v7 = vunpack.c.l.s8.bf16 %v460_v5  ;;  %v932_v13 = vunpack.c.h.s8.bf16 %v460_v5 }
  0xd6   : > { %1789 = vmatpush1.bf16.msra.mxu0 %v896_v19  ;;  %v493_v0 = vld [vmem:[%s5147_s30 + $0x1a8] sm:$0xff]  ;;  %v929_v3 = vunpack.c.l.s8.bf16 %v461_v63  ;;  %v992_v8 = vunpack.c.l.s8.bf16 %v492_v6  ;;  %v933_v9 = vunpack.c.h.s8.bf16 %v461_v63  ;;  %v996_v14 = vunpack.c.h.s8.bf16 %v492_v6  ;;  %v464_v17 = vld [vmem:[%s5147_s30 + $0xc0] sm:$0xff] }
  0xd7   : > { %1830 = vmatpush1.bf16.msra.mxu1 %v960_v20  ;;  %1790 = vmatprep.subr.bf16.mxu0 %v901_v21  ;;  %v993_v4 = vunpack.c.l.s8.bf16 %v493_v0  ;;  %v997_v10 = vunpack.c.h.s8.bf16 %v493_v0  ;;  %v465_v11 = vld [vmem:[%s5147_s30 + $0xc8] sm:$0xff]  ;;  %v496_v18 = vld [vmem:[%s5147_s30 + $0x1c0] sm:$0xff]  ;;  %v936_v19 = vunpack.c.l.s8.bf16 %v464_v17 }
  0xd8   : > { %1831 = vmatprep.subr.bf16.mxu1 %v965_v22  ;;  %v497_v12 = vld [vmem:[%s5147_s30 + $0x1c8] sm:$0xff]  ;;  %v937_v15 = vunpack.c.l.s8.bf16 %v465_v11  ;;  %v1000_v20 = vunpack.c.l.s8.bf16 %v496_v18  ;;  %v941_v21 = vunpack.c.h.s8.bf16 %v465_v11  ;;  %v468_v29 = vld [vmem:[%s5147_s30 + $0xe0] sm:$0xff] }
  0xd9   : > { %v1001_v16 = vunpack.c.l.s8.bf16 %v497_v12  ;;  %v1005_v22 = vunpack.c.h.s8.bf16 %v497_v12  ;;  %v469_v23 = vld [vmem:[%s5147_s30 + $0xe8] sm:$0xff]  ;;  %v500_v30 = vld [vmem:[%s5147_s30 + $0x1e0] sm:$0xff]  ;;  %v944_v31 = vunpack.c.l.s8.bf16 %v468_v29  ;;  %v948_v39 = vunpack.c.h.s8.bf16 %v468_v29 }
  0xda   : > { %1791 = vmatpush1.bf16.msra.mxu0 %v900_v25  ;;  %v501_v24 = vld [vmem:[%s5147_s30 + $0x1e8] sm:$0xff]  ;;  %v940_v25 = vunpack.c.h.s8.bf16 %v464_v17  ;;  %v1008_v32 = vunpack.c.l.s8.bf16 %v500_v30  ;;  %v1012_v40 = vunpack.c.h.s8.bf16 %v500_v30  ;;  %v504_v45 = vld [vmem:[%s5147_s30 + $0x200] sm:$0xff] }
  0xdb   : > { %1832 = vmatpush1.bf16.msra.mxu1 %v964_v26  ;;  %1792 = vmatprep.subr.bf16.mxu0 %v905_v27  ;;  %v1004_v26 = vunpack.c.h.s8.bf16 %v496_v18  ;;  %v945_v27 = vunpack.c.l.s8.bf16 %v469_v23  ;;  %v536_v46 = vld [vmem:[%s5147_s30 + $0x300] sm:$0xff]  ;;  %v1016_v51 = vunpack.c.l.s8.bf16 %v504_v45  ;;  %v513_v5 = vld [vmem:[%s5147_s30 + $0x248] sm:$0xff] }
  0xdc   : > { %1833 = vmatprep.subr.bf16.mxu1 %v969_v28  ;;  %v1009_v28 = vunpack.c.l.s8.bf16 %v501_v24  ;;  %v1080_v52 = vunpack.c.l.s8.bf16 %v536_v46  ;;  %v508_v63 = vld [vmem:[%s5147_s30 + $0x220] sm:$0xff]  ;;  %v545_v6 = vld [vmem:[%s5147_s30 + $0x348] sm:$0xff] }
  0xdd   : > { %v540_v0 = vld [vmem:[%s5147_s30 + $0x320] sm:$0xff]  ;;  %v517_v17 = vld [vmem:[%s5147_s30 + $0x268] sm:$0xff] }
  0xde   : > { %1793 = vmatpush1.bf16.msra.mxu0 %v904_v33  ;;  %v949_v33 = vunpack.c.h.s8.bf16 %v469_v23  ;;  %v512_v11 = vld [vmem:[%s5147_s30 + $0x240] sm:$0xff]  ;;  %v549_v18 = vld [vmem:[%s5147_s30 + $0x368] sm:$0xff] }
  0xdf   : > { %1834 = vmatpush1.bf16.msra.mxu1 %v968_v34  ;;  %1794 = vmatprep.subr.bf16.mxu0 %v909_v35  ;;  %v1013_v34 = vunpack.c.h.s8.bf16 %v501_v24  ;;  %v505_v35 = vld [vmem:[%s5147_s30 + $0x208] sm:$0xff]  ;;  %v544_v12 = vld [vmem:[%s5147_s30 + $0x340] sm:$0xff] }
  0xe0   : > { %1835 = vmatprep.subr.bf16.mxu1 %v973_v36  ;;  %v537_v36 = vld [vmem:[%s5147_s30 + $0x308] sm:$0xff]  ;;  %v516_v23 = vld [vmem:[%s5147_s30 + $0x260] sm:$0xff] }
  0xe1   : > { %v548_v24 = vld [vmem:[%s5147_s30 + $0x360] sm:$0xff]  ;;  %v521_v29 = vld [vmem:[%s5147_s30 + $0x288] sm:$0xff] }
  0xe2   : > { %1795 = vmatpush1.bf16.msra.mxu0 %v908_v41  ;;  %v384_v41 = vld [vmem:[%s5140_s11] sm:$0xff]  ;;  %v553_v30 = vld [vmem:[%s5147_s30 + $0x388] sm:$0xff] }
  0xe3   : > { %1836 = vmatpush1.bf16.msra.mxu1 %v972_v42  ;;  %1796 = vmatprep.subr.bf16.mxu0 %v913_v43  ;;  %v386_v42 = vld [vmem:[%s5140_s11 + $0x10] sm:$0xff]  ;;  %v1017_v43 = vunpack.c.l.s8.bf16 %v505_v35 }
  0xe4   : > { %1837 = vmatprep.subr.bf16.mxu1 %v977_v44  ;;  %v1081_v44 = vunpack.c.l.s8.bf16 %v537_v36 }
  0xe6   : > { %1797 = vmatpush1.bf16.msra.mxu0 %v912_v47  ;;  %v5212_v47 = vpack.c.bf16 %v384_v41, %v384_v41  ;;  %v1053_v41 = vunpack.c.h.s8.bf16 %v521_v29 }
  0xe7   : > { %1838 = vmatpush1.bf16.msra.mxu1 %v976_v48  ;;  %1798 = vmatprep.subr.bf16.mxu0 %v917_v49  ;;  %v5214_v48 = vpack.c.bf16 %v386_v42, %v386_v42  ;;  %v389_v49 = vld [vmem:[%s5140_s11 + $0x28] sm:$0xff]  ;;  %v1117_v42 = vunpack.c.h.s8.bf16 %v553_v30 }
  0xe8   : > { %1839 = vmatprep.subr.bf16.mxu1 %v981_v50  ;;  %v391_v50 = vld [vmem:[%s5140_s11 + $0x38] sm:$0xff]  ;;  %v5220_v57 = vpack.c.bf16 %v389_v49, %v389_v49 }
  0xe9   : > { %v5222_v58 = vpack.c.bf16 %v391_v50, %v391_v50 }
  0xea   : > { %1799 = vmatpush1.bf16.msra.mxu0 %v916_v53  ;;  %v1021_v53 = vunpack.c.h.s8.bf16 %v505_v35  ;;  %v520_v35 = vld [vmem:[%s5147_s30 + $0x280] sm:$0xff] }
  0xeb   : > { %1840 = vmatpush1.bf16.msra.mxu1 %v980_v54  ;;  %1800 = vmatprep.subr.bf16.mxu0 %v921_v55  ;;  %v1085_v54 = vunpack.c.h.s8.bf16 %v537_v36  ;;  %v509_v55 = vld [vmem:[%s5147_s30 + $0x228] sm:$0xff]  ;;  %v552_v36 = vld [vmem:[%s5147_s30 + $0x380] sm:$0xff] }
  0xec   : > { %1841 = vmatprep.subr.bf16.mxu1 %v985_v56  ;;  %v541_v56 = vld [vmem:[%s5147_s30 + $0x328] sm:$0xff] }
  0xee   : > { %1801 = vmatpush1.bf16.msra.mxu0 %v920_v59  ;;  %v1020_v59 = vunpack.c.h.s8.bf16 %v504_v45  ;;  %v1052_v45 = vunpack.c.h.s8.bf16 %v520_v35 }
  0xef   : > { %1842 = vmatpush1.bf16.msra.mxu1 %v984_v60  ;;  %1802 = vmatprep.subr.bf16.mxu0 %v925_v61  ;;  %v1084_v60 = vunpack.c.h.s8.bf16 %v536_v46  ;;  %v1025_v61 = vunpack.c.l.s8.bf16 %v509_v55  ;;  %v1116_v46 = vunpack.c.h.s8.bf16 %v552_v36 }
  0xf0   : > { %1843 = vmatprep.subr.bf16.mxu1 %v989_v62  ;;  %v1089_v62 = vunpack.c.l.s8.bf16 %v541_v56 }
  0xf2   : > { %1803 = vmatpush1.bf16.msra.mxu0 %v924_v1  ;;  %v1024_v1 = vunpack.c.l.s8.bf16 %v508_v63 }
  0xf3   : > { %1844 = vmatpush1.bf16.msra.mxu1 %v988_v2  ;;  %1804 = vmatprep.subr.bf16.mxu0 %v929_v3  ;;  %v1088_v2 = vunpack.c.l.s8.bf16 %v540_v0  ;;  %v1029_v3 = vunpack.c.h.s8.bf16 %v509_v55 }
  0xf4   : > { %1845 = vmatprep.subr.bf16.mxu1 %v993_v4  ;;  %v1093_v4 = vunpack.c.h.s8.bf16 %v541_v56 }
  0xf6   : > { %1805 = vmatpush1.bf16.msra.mxu0 %v928_v7  ;;  %v1028_v7 = vunpack.c.h.s8.bf16 %v508_v63 }
  0xf7   : > { %1846 = vmatpush1.bf16.msra.mxu1 %v992_v8  ;;  %1806 = vmatprep.subr.bf16.mxu0 %v933_v9  ;;  %v1092_v8 = vunpack.c.h.s8.bf16 %v540_v0  ;;  %v1033_v9 = vunpack.c.l.s8.bf16 %v513_v5 }
  0xf8   : > { %1847 = vmatprep.subr.bf16.mxu1 %v997_v10  ;;  %v1097_v10 = vunpack.c.l.s8.bf16 %v545_v6 }
  0xfa   : > { %1807 = vmatpush1.bf16.msra.mxu0 %v932_v13  ;;  %v1032_v13 = vunpack.c.l.s8.bf16 %v512_v11 }
  0xfb   : > { %1848 = vmatpush1.bf16.msra.mxu1 %v996_v14  ;;  %1808 = vmatprep.subr.bf16.mxu0 %v937_v15  ;;  %v1096_v14 = vunpack.c.l.s8.bf16 %v544_v12  ;;  %v1037_v15 = vunpack.c.h.s8.bf16 %v513_v5 }
  0xfc   : > { %1849 = vmatprep.subr.bf16.mxu1 %v1001_v16  ;;  %v1101_v16 = vunpack.c.h.s8.bf16 %v545_v6 }
  0xfe   : > { %1809 = vmatpush1.bf16.msra.mxu0 %v936_v19  ;;  %v1036_v19 = vunpack.c.h.s8.bf16 %v512_v11 }
  0xff   : > { %1850 = vmatpush1.bf16.msra.mxu1 %v1000_v20  ;;  %1810 = vmatprep.subr.bf16.mxu0 %v941_v21  ;;  %v1100_v20 = vunpack.c.h.s8.bf16 %v544_v12  ;;  %v1041_v21 = vunpack.c.l.s8.bf16 %v517_v17 }
 0x100   : > { %1851 = vmatprep.subr.bf16.mxu1 %v1005_v22  ;;  %v1105_v22 = vunpack.c.l.s8.bf16 %v549_v18 }
 0x102   : > { %1811 = vmatpush1.bf16.msra.mxu0 %v940_v25  ;;  %v1040_v25 = vunpack.c.l.s8.bf16 %v516_v23 }
 0x103   : > { %1852 = vmatpush1.bf16.msra.mxu1 %v1004_v26  ;;  %1812 = vmatprep.subr.bf16.mxu0 %v945_v27  ;;  %v1104_v26 = vunpack.c.l.s8.bf16 %v548_v24  ;;  %v1045_v27 = vunpack.c.h.s8.bf16 %v517_v17 }
 0x104   : > { %1853 = vmatprep.subr.bf16.mxu1 %v1009_v28  ;;  %v1109_v28 = vunpack.c.h.s8.bf16 %v549_v18 }
 0x106   : > { %1813 = vmatpush1.bf16.msra.mxu0 %v944_v31  ;;  %v1044_v31 = vunpack.c.h.s8.bf16 %v516_v23  ;;  %v388_v23 = vld [vmem:[%s5140_s11 + $0x20] sm:$0xff] }
 0x107   : > { %1854 = vmatpush1.bf16.msra.mxu1 %v1008_v32  ;;  %1814 = vmatprep.subr.bf16.mxu0 %v949_v33  ;;  %v1108_v32 = vunpack.c.h.s8.bf16 %v548_v24  ;;  %v1049_v33 = vunpack.c.l.s8.bf16 %v521_v29  ;;  %v390_v24 = vld [vmem:[%s5140_s11 + $0x30] sm:$0xff]  ;;  %v5260_v29 = vpack.c.bf16 %v388_v23, %v388_v23  ;;  %v584_v23 = vld [vmem:[%s5147_s30 + $0x480] sm:$0xff] }
 0x108   : > { %1855 = vmatprep.subr.bf16.mxu1 %v1013_v34  ;;  %v1113_v34 = vunpack.c.l.s8.bf16 %v553_v30  ;;  %v5262_v30 = vpack.c.bf16 %v390_v24, %v390_v24  ;;  %v616_v24 = vld [vmem:[%s5147_s30 + $0x580] sm:$0xff] }
 0x10a   : > { %1815 = vmatpush1.bf16.msra.mxu0 %v948_v39  ;;  %v1048_v39 = vunpack.c.l.s8.bf16 %v520_v35 }
 0x10b   : > { %1856 = vmatpush1.bf16.msra.mxu1 %v1012_v40  ;;  %1866 = vmatprep.subr.bf16.mxu0 %v1017_v43  ;;  %v1112_v40 = vunpack.c.l.s8.bf16 %v552_v36  ;;  %v525_v43 = vld [vmem:[%s5147_s30 + $0x2a8] sm:$0xff] }
 0x10c   : > { %1907 = vmatprep.subr.bf16.mxu1 %v1081_v44  ;;  %v557_v44 = vld [vmem:[%s5147_s30 + $0x3a8] sm:$0xff]  ;;  %v1057_v49 = vunpack.c.l.s8.bf16 %v525_v43  ;;  %v1061_v55 = vunpack.c.h.s8.bf16 %v525_v43 }
 0x10d   : > { %1817 = vmatmul.mubr.bf16.vlgmr.msra.gmra.mrb[0].mxu0 %v5212_v47  ;;  %v1121_v50 = vunpack.c.l.s8.bf16 %v557_v44  ;;  %v1125_v56 = vunpack.c.h.s8.bf16 %v557_v44 }
 0x10e   : > { %1858 = vmatmul.mubr.bf16.vlgmr.msra.gmra.mrb[0].mxu1 %v5214_v48  ;;  %1867 = vmatpush1.bf16.msra.mxu0 %v1016_v51  ;;  %v524_v51 = vld [vmem:[%s5147_s30 + $0x2a0] sm:$0xff] }
 0x10f   : > { %1908 = vmatpush1.bf16.msra.mxu1 %v1080_v52  ;;  %1868 = vmatprep.subr.bf16.mxu0 %v1021_v53  ;;  %v556_v52 = vld [vmem:[%s5147_s30 + $0x3a0] sm:$0xff]  ;;  %v1056_v53 = vunpack.c.l.s8.bf16 %v524_v51 }
 0x110   : > { %1909 = vmatprep.subr.bf16.mxu1 %v1085_v54  ;;  %1898 = vmatprep.mubr.bf16.mxu0 %v5220_v57  ;;  %v1120_v54 = vunpack.c.l.s8.bf16 %v556_v52 }
 0x111   : > { %1939 = vmatprep.mubr.bf16.mxu1 %v5222_v58 }
 0x112   : > { %1869 = vmatpush1.bf16.msra.mxu0 %v1020_v59  ;;  %v529_v59 = vld [vmem:[%s5147_s30 + $0x2c8] sm:$0xff] }
 0x113   : > { %1910 = vmatpush1.bf16.msra.mxu1 %v1084_v60  ;;  %1870 = vmatprep.subr.bf16.mxu0 %v1025_v61  ;;  %v561_v60 = vld [vmem:[%s5147_s30 + $0x3c8] sm:$0xff]  ;;  %v1060_v61 = vunpack.c.h.s8.bf16 %v524_v51  ;;  %v1065_v63 = vunpack.c.l.s8.bf16 %v529_v59  ;;  %v1069_v5 = vunpack.c.h.s8.bf16 %v529_v59 }
 0x114   : > { %1911 = vmatprep.subr.bf16.mxu1 %v1089_v62  ;;  %v1124_v62 = vunpack.c.h.s8.bf16 %v556_v52  ;;  %v1129_v0 = vunpack.c.l.s8.bf16 %v561_v60  ;;  %v1133_v6 = vunpack.c.h.s8.bf16 %v561_v60 }
 0x116   : > { %1871 = vmatpush1.bf16.msra.mxu0 %v1024_v1  ;;  %v528_v1 = vld [vmem:[%s5147_s30 + $0x2c0] sm:$0xff] }
 0x117   : > { %1912 = vmatpush1.bf16.msra.mxu1 %v1088_v2  ;;  %1872 = vmatprep.subr.bf16.mxu0 %v1029_v3  ;;  %v560_v2 = vld [vmem:[%s5147_s30 + $0x3c0] sm:$0xff]  ;;  %v1064_v3 = vunpack.c.l.s8.bf16 %v528_v1 }
 0x118   : > { %1913 = vmatprep.subr.bf16.mxu1 %v1093_v4  ;;  %v1128_v4 = vunpack.c.l.s8.bf16 %v560_v2 }
 0x11a   : > { %1873 = vmatpush1.bf16.msra.mxu0 %v1028_v7  ;;  %v533_v7 = vld [vmem:[%s5147_s30 + $0x2e8] sm:$0xff] }
 0x11b   : > { %1914 = vmatpush1.bf16.msra.mxu1 %v1092_v8  ;;  %1874 = vmatprep.subr.bf16.mxu0 %v1033_v9  ;;  %v565_v8 = vld [vmem:[%s5147_s30 + $0x3e8] sm:$0xff]  ;;  %v1068_v9 = vunpack.c.h.s8.bf16 %v528_v1  ;;  %v1073_v11 = vunpack.c.l.s8.bf16 %v533_v7  ;;  %v1077_v17 = vunpack.c.h.s8.bf16 %v533_v7 }
 0x11c   : > { %1915 = vmatprep.subr.bf16.mxu1 %v1097_v10  ;;  %v1132_v10 = vunpack.c.h.s8.bf16 %v560_v2  ;;  %v1137_v12 = vunpack.c.l.s8.bf16 %v565_v8  ;;  %v1141_v18 = vunpack.c.h.s8.bf16 %v565_v8 }
 0x11e   : > { %1875 = vmatpush1.bf16.msra.mxu0 %v1032_v13  ;;  %v532_v13 = vld [vmem:[%s5147_s30 + $0x2e0] sm:$0xff] }
 0x11f   : > { %1916 = vmatpush1.bf16.msra.mxu1 %v1096_v14  ;;  %1876 = vmatprep.subr.bf16.mxu0 %v1037_v15  ;;  %v564_v14 = vld [vmem:[%s5147_s30 + $0x3e0] sm:$0xff]  ;;  %v1072_v15 = vunpack.c.l.s8.bf16 %v532_v13 }
 0x120   : > { %1917 = vmatprep.subr.bf16.mxu1 %v1101_v16  ;;  %v1136_v16 = vunpack.c.l.s8.bf16 %v564_v14 }
 0x122   : > { %1877 = vmatpush1.bf16.msra.mxu0 %v1036_v19  ;;  %v569_v19 = vld [vmem:[%s5147_s30 + $0x408] sm:$0xff] }
 0x123   : > { %1918 = vmatpush1.bf16.msra.mxu1 %v1100_v20  ;;  %1878 = vmatprep.subr.bf16.mxu0 %v1041_v21  ;;  %v601_v20 = vld [vmem:[%s5147_s30 + $0x508] sm:$0xff]  ;;  %v1076_v21 = vunpack.c.h.s8.bf16 %v532_v13  ;;  %v1149_v35 = vunpack.c.h.s8.bf16 %v569_v19 }
 0x124   : > { %1919 = vmatprep.subr.bf16.mxu1 %v1105_v22  ;;  %v1140_v22 = vunpack.c.h.s8.bf16 %v564_v14  ;;  %v1213_v36 = vunpack.c.h.s8.bf16 %v601_v20 }
 0x126   : > { %1879 = vmatpush1.bf16.msra.mxu0 %v1040_v25  ;;  %v1145_v25 = vunpack.c.l.s8.bf16 %v569_v19 }
 0x127   : > { %1920 = vmatpush1.bf16.msra.mxu1 %v1104_v26  ;;  %1880 = vmatprep.subr.bf16.mxu0 %v1045_v27  ;;  %v1209_v26 = vunpack.c.l.s8.bf16 %v601_v20  ;;  %v568_v27 = vld [vmem:[%s5147_s30 + $0x400] sm:$0xff] }
 0x128   : > { %1921 = vmatprep.subr.bf16.mxu1 %v1109_v28  ;;  %v600_v28 = vld [vmem:[%s5147_s30 + $0x500] sm:$0xff]  ;;  %v1148_v43 = vunpack.c.h.s8.bf16 %v568_v27 }
 0x129   : > { %v1212_v44 = vunpack.c.h.s8.bf16 %v600_v28 }
 0x12a   : > { %1881 = vmatpush1.bf16.msra.mxu0 %v1044_v31  ;;  %v393_v31 = vld [vmem:[%s5140_s11 + $0x48] sm:$0xff] }
 0x12b   : > { %1922 = vmatpush1.bf16.msra.mxu1 %v1108_v32  ;;  %1882 = vmatprep.subr.bf16.mxu0 %v1049_v33  ;;  %v395_v32 = vld [vmem:[%s5140_s11 + $0x58] sm:$0xff]  ;;  %v1144_v33 = vunpack.c.l.s8.bf16 %v568_v27 }
 0x12c   : > { %1923 = vmatprep.subr.bf16.mxu1 %v1113_v34  ;;  %v1208_v34 = vunpack.c.l.s8.bf16 %v600_v28 }
 0x12e   : > { %1883 = vmatpush1.bf16.msra.mxu0 %v1048_v39  ;;  %v573_v39 = vld [vmem:[%s5147_s30 + $0x428] sm:$0xff] }
 0x12f   : > { %1924 = vmatpush1.bf16.msra.mxu1 %v1112_v40  ;;  %1884 = vmatprep.subr.bf16.mxu0 %v1053_v41  ;;  %v605_v40 = vld [vmem:[%s5147_s30 + $0x528] sm:$0xff]  ;;  %v5268_v41 = vpack.c.bf16 %v393_v31, %v393_v31 }
 0x130   : > { %1925 = vmatprep.subr.bf16.mxu1 %v1117_v42  ;;  %v5270_v42 = vpack.c.bf16 %v395_v32, %v395_v32  ;;  %v589_v31 = vld [vmem:[%s5147_s30 + $0x4a8] sm:$0xff] }
 0x131   : > { %v621_v32 = vld [vmem:[%s5147_s30 + $0x5a8] sm:$0xff] }
 0x132   : > { %1885 = vmatpush1.bf16.msra.mxu0 %v1052_v45  ;;  %v1153_v45 = vunpack.c.l.s8.bf16 %v573_v39 }
 0x133   : > { %1926 = vmatpush1.bf16.msra.mxu1 %v1116_v46  ;;  %1886 = vmatprep.subr.bf16.mxu0 %v1057_v49  ;;  %v1217_v46 = vunpack.c.l.s8.bf16 %v605_v40  ;;  %v572_v49 = vld [vmem:[%s5147_s30 + $0x420] sm:$0xff] }
 0x134   : > { %1927 = vmatprep.subr.bf16.mxu1 %v1121_v50  ;;  %v604_v50 = vld [vmem:[%s5147_s30 + $0x520] sm:$0xff]  ;;  %v1152_v51 = vunpack.c.l.s8.bf16 %v572_v49  ;;  %v1156_v59 = vunpack.c.h.s8.bf16 %v572_v49  ;;  %v593_v49 = vld [vmem:[%s5147_s30 + $0x4c8] sm:$0xff] }
 0x135   : > { %v1216_v52 = vunpack.c.l.s8.bf16 %v604_v50  ;;  %v1220_v60 = vunpack.c.h.s8.bf16 %v604_v50  ;;  %v625_v50 = vld [vmem:[%s5147_s30 + $0x5c8] sm:$0xff] }
 0x136   : > { %1887 = vmatpush1.bf16.msra.mxu0 %v1056_v53  ;;  %v1157_v53 = vunpack.c.h.s8.bf16 %v573_v39  ;;  %v588_v39 = vld [vmem:[%s5147_s30 + $0x4a0] sm:$0xff] }
 0x137   : > { %1928 = vmatpush1.bf16.msra.mxu1 %v1120_v54  ;;  %1888 = vmatprep.subr.bf16.mxu0 %v1061_v55  ;;  %v1221_v54 = vunpack.c.h.s8.bf16 %v605_v40  ;;  %v577_v55 = vld [vmem:[%s5147_s30 + $0x448] sm:$0xff]  ;;  %v620_v40 = vld [vmem:[%s5147_s30 + $0x5a0] sm:$0xff] }
 0x138   : > { %1929 = vmatprep.subr.bf16.mxu1 %v1125_v56  ;;  %v609_v56 = vld [vmem:[%s5147_s30 + $0x548] sm:$0xff] }
 0x13a   : > { %1889 = vmatpush1.bf16.msra.mxu0 %v1060_v61  ;;  %v1161_v61 = vunpack.c.l.s8.bf16 %v577_v55 }
 0x13b   : > { %1930 = vmatpush1.bf16.msra.mxu1 %v1124_v62  ;;  %1890 = vmatprep.subr.bf16.mxu0 %v1065_v63  ;;  %v1225_v62 = vunpack.c.l.s8.bf16 %v609_v56  ;;  %v576_v63 = vld [vmem:[%s5147_s30 + $0x440] sm:$0xff] }
 0x13c   : > { %1931 = vmatprep.subr.bf16.mxu1 %v1129_v0  ;;  %v608_v0 = vld [vmem:[%s5147_s30 + $0x540] sm:$0xff]  ;;  %v1160_v1 = vunpack.c.l.s8.bf16 %v576_v63  ;;  %v1164_v7 = vunpack.c.h.s8.bf16 %v576_v63  ;;  %v597_v63 = vld [vmem:[%s5147_s30 + $0x4e8] sm:$0xff] }
 0x13d   : > { %v1224_v2 = vunpack.c.l.s8.bf16 %v608_v0  ;;  %v1228_v8 = vunpack.c.h.s8.bf16 %v608_v0  ;;  %v629_v0 = vld [vmem:[%s5147_s30 + $0x5e8] sm:$0xff] }
 0x13e   : > { %1891 = vmatpush1.bf16.msra.mxu0 %v1064_v3  ;;  %v1165_v3 = vunpack.c.h.s8.bf16 %v577_v55  ;;  %v592_v55 = vld [vmem:[%s5147_s30 + $0x4c0] sm:$0xff] }
 0x13f   : > { %1932 = vmatpush1.bf16.msra.mxu1 %v1128_v4  ;;  %1892 = vmatprep.subr.bf16.mxu0 %v1069_v5  ;;  %v1229_v4 = vunpack.c.h.s8.bf16 %v609_v56  ;;  %v581_v5 = vld [vmem:[%s5147_s30 + $0x468] sm:$0xff]  ;;  %v624_v56 = vld [vmem:[%s5147_s30 + $0x5c0] sm:$0xff] }
 0x140   : > { %1933 = vmatprep.subr.bf16.mxu1 %v1133_v6  ;;  %v613_v6 = vld [vmem:[%s5147_s30 + $0x568] sm:$0xff] }
 0x142   : > { %1893 = vmatpush1.bf16.msra.mxu0 %v1068_v9  ;;  %v1169_v9 = vunpack.c.l.s8.bf16 %v581_v5 }
 0x143   : > { %1934 = vmatpush1.bf16.msra.mxu1 %v1132_v10  ;;  %1894 = vmatprep.subr.bf16.mxu0 %v1073_v11  ;;  %v1233_v10 = vunpack.c.l.s8.bf16 %v613_v6  ;;  %v580_v11 = vld [vmem:[%s5147_s30 + $0x460] sm:$0xff] }
 0x144   : > { %1935 = vmatprep.subr.bf16.mxu1 %v1137_v12  ;;  %v612_v12 = vld [vmem:[%s5147_s30 + $0x560] sm:$0xff]  ;;  %v1168_v13 = vunpack.c.l.s8.bf16 %v580_v11  ;;  %v1172_v19 = vunpack.c.h.s8.bf16 %v580_v11  ;;  %v633_v11 = vld [vmem:[%s5147_s30 + $0x608] sm:$0xff] }
 0x145   : > { %v1232_v14 = vunpack.c.l.s8.bf16 %v612_v12  ;;  %v1236_v20 = vunpack.c.h.s8.bf16 %v612_v12  ;;  %v665_v12 = vld [vmem:[%s5147_s30 + $0x708] sm:$0xff] }
 0x146   : > { %1895 = vmatpush1.bf16.msra.mxu0 %v1072_v15  ;;  %v1173_v15 = vunpack.c.h.s8.bf16 %v581_v5  ;;  %v596_v5 = vld [vmem:[%s5147_s30 + $0x4e0] sm:$0xff] }
 0x147   : > { %1936 = vmatpush1.bf16.msra.mxu1 %v1136_v16  ;;  %1896 = vmatprep.subr.bf16.mxu0 %v1077_v17  ;;  %v1237_v16 = vunpack.c.h.s8.bf16 %v613_v6  ;;  %v585_v17 = vld [vmem:[%s5147_s30 + $0x488] sm:$0xff]  ;;  %v628_v6 = vld [vmem:[%s5147_s30 + $0x5e0] sm:$0xff] }
 0x148   : > { %1937 = vmatprep.subr.bf16.mxu1 %v1141_v18  ;;  %v617_v18 = vld [vmem:[%s5147_s30 + $0x588] sm:$0xff]  ;;  %v1181_v27 = vunpack.c.h.s8.bf16 %v585_v17 }
 0x149   : > { %v1245_v28 = vunpack.c.h.s8.bf16 %v617_v18 }
 0x14a   : > { %1897 = vmatpush1.bf16.msra.mxu0 %v1076_v21  ;;  %v1177_v21 = vunpack.c.l.s8.bf16 %v585_v17  ;;  %v1273_v17 = vunpack.c.l.s8.bf16 %v633_v11 }
 0x14b   : > { %1938 = vmatpush1.bf16.msra.mxu1 %v1140_v22  ;;  %1948 = vmatprep.subr.bf16.mxu0 %v1145_v25  ;;  %v1241_v22 = vunpack.c.l.s8.bf16 %v617_v18  ;;  %v1176_v25 = vunpack.c.l.s8.bf16 %v584_v23  ;;  %v1337_v18 = vunpack.c.l.s8.bf16 %v665_v12 }
 0x14c   : > { %1989 = vmatprep.subr.bf16.mxu1 %v1209_v26  ;;  %v1240_v26 = vunpack.c.l.s8.bf16 %v616_v24 }
 0x14d   : > { %1899 = vmatmul.mubr.bf16.vlgmr.msra.gmra.mrb[4].mxu0 %v5260_v29 }
 0x14e   : > { %1940 = vmatmul.mubr.bf16.vlgmr.msra.gmra.mrb[4].mxu1 %v5262_v30  ;;  %1949 = vmatpush1.bf16.msra.mxu0 %v1144_v33  ;;  %v1180_v33 = vunpack.c.h.s8.bf16 %v584_v23  ;;  %v397_v23 = vld [vmem:[%s5140_s11 + $0x68] sm:$0xff] }
 0x14f   : > { %1990 = vmatpush1.bf16.msra.mxu1 %v1208_v34  ;;  %1950 = vmatprep.subr.bf16.mxu0 %v1149_v35  ;;  %v1244_v34 = vunpack.c.h.s8.bf16 %v616_v24  ;;  %v1185_v35 = vunpack.c.l.s8.bf16 %v589_v31  ;;  %v399_v24 = vld [vmem:[%s5140_s11 + $0x78] sm:$0xff] }
 0x150   : > { %1991 = vmatprep.subr.bf16.mxu1 %v1213_v36  ;;  %1980 = vmatprep.mubr.bf16.mxu0 %v5268_v41  ;;  %v1249_v36 = vunpack.c.l.s8.bf16 %v621_v32 }
 0x151   : > { %2021 = vmatprep.mubr.bf16.mxu1 %v5270_v42 }
 0x152   : > { %1951 = vmatpush1.bf16.msra.mxu0 %v1148_v43  ;;  %v1184_v43 = vunpack.c.l.s8.bf16 %v588_v39 }
 0x153   : > { %1992 = vmatpush1.bf16.msra.mxu1 %v1212_v44  ;;  %1952 = vmatprep.subr.bf16.mxu0 %v1153_v45  ;;  %v1248_v44 = vunpack.c.l.s8.bf16 %v620_v40  ;;  %v1189_v45 = vunpack.c.h.s8.bf16 %v589_v31  ;;  %v637_v31 = vld [vmem:[%s5147_s30 + $0x628] sm:$0xff] }
 0x154   : > { %1993 = vmatprep.subr.bf16.mxu1 %v1217_v46  ;;  %v1253_v46 = vunpack.c.h.s8.bf16 %v621_v32  ;;  %v669_v32 = vld [vmem:[%s5147_s30 + $0x728] sm:$0xff] }
 0x156   : > { %1953 = vmatpush1.bf16.msra.mxu0 %v1152_v51  ;;  %v1188_v51 = vunpack.c.h.s8.bf16 %v588_v39  ;;  %v1281_v39 = vunpack.c.l.s8.bf16 %v637_v31 }
 0x157   : > { %1994 = vmatpush1.bf16.msra.mxu1 %v1216_v52  ;;  %1954 = vmatprep.subr.bf16.mxu0 %v1157_v53  ;;  %v1252_v52 = vunpack.c.h.s8.bf16 %v620_v40  ;;  %v1193_v53 = vunpack.c.l.s8.bf16 %v593_v49  ;;  %v1345_v40 = vunpack.c.l.s8.bf16 %v669_v32 }
 0x158   : > { %1995 = vmatprep.subr.bf16.mxu1 %v1221_v54  ;;  %v1257_v54 = vunpack.c.l.s8.bf16 %v625_v50 }
 0x15a   : > { %1955 = vmatpush1.bf16.msra.mxu0 %v1156_v59  ;;  %v1192_v59 = vunpack.c.l.s8.bf16 %v592_v55 }
 0x15b   : > { %1996 = vmatpush1.bf16.msra.mxu1 %v1220_v60  ;;  %1956 = vmatprep.subr.bf16.mxu0 %v1161_v61  ;;  %v1256_v60 = vunpack.c.l.s8.bf16 %v624_v56  ;;  %v1197_v61 = vunpack.c.h.s8.bf16 %v593_v49  ;;  %v1285_v49 = vunpack.c.h.s8.bf16 %v637_v31 }
 0x15c   : > { %1997 = vmatprep.subr.bf16.mxu1 %v1225_v62  ;;  %v1261_v62 = vunpack.c.h.s8.bf16 %v625_v50  ;;  %v1349_v50 = vunpack.c.h.s8.bf16 %v669_v32 }
 0x15e   : > { %1957 = vmatpush1.bf16.msra.mxu0 %v1160_v1  ;;  %v1196_v1 = vunpack.c.h.s8.bf16 %v592_v55 }
 0x15f   : > { %1998 = vmatpush1.bf16.msra.mxu1 %v1224_v2  ;;  %1958 = vmatprep.subr.bf16.mxu0 %v1165_v3  ;;  %v1260_v2 = vunpack.c.h.s8.bf16 %v624_v56  ;;  %v1201_v3 = vunpack.c.l.s8.bf16 %v597_v63 }
 0x160   : > { %1999 = vmatprep.subr.bf16.mxu1 %v1229_v4  ;;  %v1265_v4 = vunpack.c.l.s8.bf16 %v629_v0 }
 0x162   : > { %1959 = vmatpush1.bf16.msra.mxu0 %v1164_v7  ;;  %v1200_v7 = vunpack.c.l.s8.bf16 %v596_v5 }
 0x163   : > { %2000 = vmatpush1.bf16.msra.mxu1 %v1228_v8  ;;  %1960 = vmatprep.subr.bf16.mxu0 %v1169_v9  ;;  %v1264_v8 = vunpack.c.l.s8.bf16 %v628_v6  ;;  %v1205_v9 = vunpack.c.h.s8.bf16 %v597_v63 }
 0x164   : > { %2001 = vmatprep.subr.bf16.mxu1 %v1233_v10  ;;  %v1269_v10 = vunpack.c.h.s8.bf16 %v629_v0 }
 0x166   : > { %1961 = vmatpush1.bf16.msra.mxu0 %v1168_v13  ;;  %v1204_v13 = vunpack.c.h.s8.bf16 %v596_v5 }
 0x167   : > { %2002 = vmatpush1.bf16.msra.mxu1 %v1232_v14  ;;  %1962 = vmatprep.subr.bf16.mxu0 %v1173_v15  ;;  %v1268_v14 = vunpack.c.h.s8.bf16 %v628_v6  ;;  %v392_v15 = vld [vmem:[%s5140_s11 + $0x40] sm:$0xff] }
 0x168   : > { %2003 = vmatprep.subr.bf16.mxu1 %v1237_v16  ;;  %v394_v16 = vld [vmem:[%s5140_s11 + $0x50] sm:$0xff] }
 0x16a   : > { %1963 = vmatpush1.bf16.msra.mxu0 %v1172_v19  ;;  %v632_v19 = vld [vmem:[%s5147_s30 + $0x600] sm:$0xff] }
 0x16b   : > { %2004 = vmatpush1.bf16.msra.mxu1 %v1236_v20  ;;  %1964 = vmatprep.subr.bf16.mxu0 %v1177_v21  ;;  %v664_v20 = vld [vmem:[%s5147_s30 + $0x700] sm:$0xff]  ;;  %v5308_v21 = vpack.c.bf16 %v392_v15, %v392_v15 }
 0x16c   : > { %2005 = vmatprep.subr.bf16.mxu1 %v1241_v22  ;;  %v5310_v22 = vpack.c.bf16 %v394_v16, %v394_v16 }
 0x16e   : > { %1965 = vmatpush1.bf16.msra.mxu0 %v1176_v25  ;;  %v1272_v25 = vunpack.c.l.s8.bf16 %v632_v19 }
 0x16f   : > { %2006 = vmatpush1.bf16.msra.mxu1 %v1240_v26  ;;  %1966 = vmatprep.subr.bf16.mxu0 %v1181_v27  ;;  %v1336_v26 = vunpack.c.l.s8.bf16 %v664_v20  ;;  %v1277_v27 = vunpack.c.h.s8.bf16 %v633_v11 }
 0x170   : > { %2007 = vmatprep.subr.bf16.mxu1 %v1245_v28  ;;  %v1341_v28 = vunpack.c.h.s8.bf16 %v665_v12 }
 0x172   : > { %1967 = vmatpush1.bf16.msra.mxu0 %v1180_v33  ;;  %v5316_v33 = vpack.c.bf16 %v397_v23, %v397_v23 }
 0x173   : > { %2008 = vmatpush1.bf16.msra.mxu1 %v1244_v34  ;;  %1968 = vmatprep.subr.bf16.mxu0 %v1185_v35  ;;  %v5318_v34 = vpack.c.bf16 %v399_v24, %v399_v24  ;;  %v1276_v35 = vunpack.c.h.s8.bf16 %v632_v19  ;;  %v648_v19 = vld [vmem:[%s5147_s30 + $0x680] sm:$0xff] }
 0x174   : > { %2009 = vmatprep.subr.bf16.mxu1 %v1249_v36  ;;  %v1340_v36 = vunpack.c.h.s8.bf16 %v664_v20  ;;  %v680_v20 = vld [vmem:[%s5147_s30 + $0x780] sm:$0xff]  ;;  %v1304_v23 = vunpack.c.l.s8.bf16 %v648_v19  ;;  %v1308_v31 = vunpack.c.h.s8.bf16 %v648_v19 }
 0x175   : > { %v1368_v24 = vunpack.c.l.s8.bf16 %v680_v20  ;;  %v1372_v32 = vunpack.c.h.s8.bf16 %v680_v20  ;;  %v696_v19 = vld [vmem:[%s5147_s30 + $0x800] sm:$0xff] }
 0x176   : > { %1969 = vmatpush1.bf16.msra.mxu0 %v1184_v43  ;;  %v636_v43 = vld [vmem:[%s5147_s30 + $0x620] sm:$0xff] }
 0x177   : > { %2010 = vmatpush1.bf16.msra.mxu1 %v1248_v44  ;;  %1970 = vmatprep.subr.bf16.mxu0 %v1189_v45  ;;  %v668_v44 = vld [vmem:[%s5147_s30 + $0x720] sm:$0xff]  ;;  %v1280_v45 = vunpack.c.l.s8.bf16 %v636_v43 }
 0x178   : > { %2011 = vmatprep.subr.bf16.mxu1 %v1253_v46  ;;  %v1344_v46 = vunpack.c.l.s8.bf16 %v668_v44  ;;  %v728_v20 = vld [vmem:[%s5147_s30 + $0x900] sm:$0xff] }
 0x17a   : > { %1971 = vmatpush1.bf16.msra.mxu0 %v1188_v51  ;;  %v641_v51 = vld [vmem:[%s5147_s30 + $0x648] sm:$0xff] }
 0x17b   : > { %2012 = vmatpush1.bf16.msra.mxu1 %v1252_v52  ;;  %1972 = vmatprep.subr.bf16.mxu0 %v1193_v53  ;;  %v673_v52 = vld [vmem:[%s5147_s30 + $0x748] sm:$0xff]  ;;  %v1284_v53 = vunpack.c.h.s8.bf16 %v636_v43  ;;  %v1289_v55 = vunpack.c.l.s8.bf16 %v641_v51  ;;  %v1293_v63 = vunpack.c.h.s8.bf16 %v641_v51 }
 0x17c   : > { %2013 = vmatprep.subr.bf16.mxu1 %v1257_v54  ;;  %v1348_v54 = vunpack.c.h.s8.bf16 %v668_v44  ;;  %v1353_v56 = vunpack.c.l.s8.bf16 %v673_v52  ;;  %v1357_v0 = vunpack.c.h.s8.bf16 %v673_v52 }
 0x17e   : > { %1973 = vmatpush1.bf16.msra.mxu0 %v1192_v59  ;;  %v640_v59 = vld [vmem:[%s5147_s30 + $0x640] sm:$0xff] }
 0x17f   : > { %2014 = vmatpush1.bf16.msra.mxu1 %v1256_v60  ;;  %1974 = vmatprep.subr.bf16.mxu0 %v1197_v61  ;;  %v672_v60 = vld [vmem:[%s5147_s30 + $0x740] sm:$0xff]  ;;  %v1288_v61 = vunpack.c.l.s8.bf16 %v640_v59 }
 0x180   : > { %2015 = vmatprep.subr.bf16.mxu1 %v1261_v62  ;;  %v1352_v62 = vunpack.c.l.s8.bf16 %v672_v60 }
 0x182   : > { %1975 = vmatpush1.bf16.msra.mxu0 %v1196_v1  ;;  %v645_v1 = vld [vmem:[%s5147_s30 + $0x668] sm:$0xff] }
 0x183   : > { %2016 = vmatpush1.bf16.msra.mxu1 %v1260_v2  ;;  %1976 = vmatprep.subr.bf16.mxu0 %v1201_v3  ;;  %v677_v2 = vld [vmem:[%s5147_s30 + $0x768] sm:$0xff]  ;;  %v1292_v3 = vunpack.c.h.s8.bf16 %v640_v59  ;;  %v1297_v5 = vunpack.c.l.s8.bf16 %v645_v1  ;;  %v1301_v11 = vunpack.c.h.s8.bf16 %v645_v1 }
 0x184   : > { %2017 = vmatprep.subr.bf16.mxu1 %v1265_v4  ;;  %v1356_v4 = vunpack.c.h.s8.bf16 %v672_v60  ;;  %v1361_v6 = vunpack.c.l.s8.bf16 %v677_v2  ;;  %v1365_v12 = vunpack.c.h.s8.bf16 %v677_v2 }
 0x186   : > { %1977 = vmatpush1.bf16.msra.mxu0 %v1200_v7  ;;  %v644_v7 = vld [vmem:[%s5147_s30 + $0x660] sm:$0xff] }
 0x187   : > { %2018 = vmatpush1.bf16.msra.mxu1 %v1264_v8  ;;  %1978 = vmatprep.subr.bf16.mxu0 %v1205_v9  ;;  %v676_v8 = vld [vmem:[%s5147_s30 + $0x760] sm:$0xff]  ;;  %v1296_v9 = vunpack.c.l.s8.bf16 %v644_v7  ;;  %v1300_v15 = vunpack.c.h.s8.bf16 %v644_v7 }
 0x188   : > { %2019 = vmatprep.subr.bf16.mxu1 %v1269_v10  ;;  %v1360_v10 = vunpack.c.l.s8.bf16 %v676_v8  ;;  %v1364_v16 = vunpack.c.h.s8.bf16 %v676_v8 }
 0x18a   : > { %1979 = vmatpush1.bf16.msra.mxu0 %v1204_v13  ;;  %v649_v13 = vld [vmem:[%s5147_s30 + $0x688] sm:$0xff] }
 0x18b   : > { %2020 = vmatpush1.bf16.msra.mxu1 %v1268_v14  ;;  %2030 = vmatprep.subr.bf16.mxu0 %v1273_v17  ;;  %v681_v14 = vld [vmem:[%s5147_s30 + $0x788] sm:$0xff]  ;;  %v1305_v17 = vunpack.c.l.s8.bf16 %v649_v13 }
 0x18c   : > { %2071 = vmatprep.subr.bf16.mxu1 %v1337_v18  ;;  %v1369_v18 = vunpack.c.l.s8.bf16 %v681_v14 }
 0x18d   : > { %1981 = vmatmul.mubr.bf16.vlgmr.msra.gmra.mrb[8].mxu0 %v5308_v21 }
 0x18e   : > { %2022 = vmatmul.mubr.bf16.vlgmr.msra.gmra.mrb[8].mxu1 %v5310_v22  ;;  %2031 = vmatpush1.bf16.msra.mxu0 %v1272_v25  ;;  %v1309_v25 = vunpack.c.h.s8.bf16 %v649_v13 }
 0x18f   : > { %2072 = vmatpush1.bf16.msra.mxu1 %v1336_v26  ;;  %2032 = vmatprep.subr.bf16.mxu0 %v1277_v27  ;;  %v1373_v26 = vunpack.c.h.s8.bf16 %v681_v14  ;;  %v653_v27 = vld [vmem:[%s5147_s30 + $0x6a8] sm:$0xff] }
 0x190   : > { %2073 = vmatprep.subr.bf16.mxu1 %v1341_v28  ;;  %2062 = vmatprep.mubr.bf16.mxu0 %v5316_v33  ;;  %v685_v28 = vld [vmem:[%s5147_s30 + $0x7a8] sm:$0xff] }
 0x191   : > { %2103 = vmatprep.mubr.bf16.mxu1 %v5318_v34 }
 0x192   : > { %2033 = vmatpush1.bf16.msra.mxu0 %v1276_v35  ;;  %v1313_v35 = vunpack.c.l.s8.bf16 %v653_v27 }
 0x193   : > { %2074 = vmatpush1.bf16.msra.mxu1 %v1340_v36  ;;  %2034 = vmatprep.subr.bf16.mxu0 %v1281_v39  ;;  %v1377_v36 = vunpack.c.l.s8.bf16 %v685_v28  ;;  %v652_v39 = vld [vmem:[%s5147_s30 + $0x6a0] sm:$0xff] }
 0x194   : > { %2075 = vmatprep.subr.bf16.mxu1 %v1345_v40  ;;  %v684_v40 = vld [vmem:[%s5147_s30 + $0x7a0] sm:$0xff]  ;;  %v1312_v43 = vunpack.c.l.s8.bf16 %v652_v39  ;;  %v1316_v51 = vunpack.c.h.s8.bf16 %v652_v39 }
 0x195   : > { %v1376_v44 = vunpack.c.l.s8.bf16 %v684_v40  ;;  %v1380_v52 = vunpack.c.h.s8.bf16 %v684_v40 }
 0x196   : > { %2035 = vmatpush1.bf16.msra.mxu0 %v1280_v45  ;;  %v1317_v45 = vunpack.c.h.s8.bf16 %v653_v27  ;;  %v1400_v27 = vunpack.c.l.s8.bf16 %v696_v19 }
 0x197   : > { %2076 = vmatpush1.bf16.msra.mxu1 %v1344_v46  ;;  %2036 = vmatprep.subr.bf16.mxu0 %v1285_v49  ;;  %v1381_v46 = vunpack.c.h.s8.bf16 %v685_v28  ;;  %v657_v49 = vld [vmem:[%s5147_s30 + $0x6c8] sm:$0xff]  ;;  %v1464_v28 = vunpack.c.l.s8.bf16 %v728_v20 }
 0x198   : > { %2077 = vmatprep.subr.bf16.mxu1 %v1349_v50  ;;  %v689_v50 = vld [vmem:[%s5147_s30 + $0x7c8] sm:$0xff] }
 0x19a   : > { %2037 = vmatpush1.bf16.msra.mxu0 %v1284_v53  ;;  %v1321_v53 = vunpack.c.l.s8.bf16 %v657_v49 }
 0x19b   : > { %2078 = vmatpush1.bf16.msra.mxu1 %v1348_v54  ;;  %2038 = vmatprep.subr.bf16.mxu0 %v1289_v55  ;;  %v1385_v54 = vunpack.c.l.s8.bf16 %v689_v50  ;;  %v656_v55 = vld [vmem:[%s5147_s30 + $0x6c0] sm:$0xff] }
 0x19c   : > { %2079 = vmatprep.subr.bf16.mxu1 %v1353_v56  ;;  %v688_v56 = vld [vmem:[%s5147_s30 + $0x7c0] sm:$0xff]  ;;  %v1320_v59 = vunpack.c.l.s8.bf16 %v656_v55  ;;  %v1324_v1 = vunpack.c.h.s8.bf16 %v656_v55  ;;  %v705_v55 = vld [vmem:[%s5147_s30 + $0x848] sm:$0xff] }
 0x19d   : > { %v1384_v60 = vunpack.c.l.s8.bf16 %v688_v56  ;;  %v1388_v2 = vunpack.c.h.s8.bf16 %v688_v56  ;;  %v737_v56 = vld [vmem:[%s5147_s30 + $0x948] sm:$0xff] }
 0x19e   : > { %2039 = vmatpush1.bf16.msra.mxu0 %v1288_v61  ;;  %v1325_v61 = vunpack.c.h.s8.bf16 %v657_v49  ;;  %v700_v49 = vld [vmem:[%s5147_s30 + $0x820] sm:$0xff] }
 0x19f   : > { %2080 = vmatpush1.bf16.msra.mxu1 %v1352_v62  ;;  %2040 = vmatprep.subr.bf16.mxu0 %v1293_v63  ;;  %v1389_v62 = vunpack.c.h.s8.bf16 %v689_v50  ;;  %v661_v63 = vld [vmem:[%s5147_s30 + $0x6e8] sm:$0xff]  ;;  %v732_v50 = vld [vmem:[%s5147_s30 + $0x920] sm:$0xff] }
 0x1a0   : > { %2081 = vmatprep.subr.bf16.mxu1 %v1357_v0  ;;  %v693_v0 = vld [vmem:[%s5147_s30 + $0x7e8] sm:$0xff] }
 0x1a2   : > { %2041 = vmatpush1.bf16.msra.mxu0 %v1292_v3  ;;  %v1329_v3 = vunpack.c.l.s8.bf16 %v661_v63 }
 0x1a3   : > { %2082 = vmatpush1.bf16.msra.mxu1 %v1356_v4  ;;  %2042 = vmatprep.subr.bf16.mxu0 %v1297_v5  ;;  %v1393_v4 = vunpack.c.l.s8.bf16 %v693_v0  ;;  %v660_v5 = vld [vmem:[%s5147_s30 + $0x6e0] sm:$0xff] }
 0x1a4   : > { %2083 = vmatprep.subr.bf16.mxu1 %v1361_v6  ;;  %v692_v6 = vld [vmem:[%s5147_s30 + $0x7e0] sm:$0xff]  ;;  %v1328_v7 = vunpack.c.l.s8.bf16 %v660_v5  ;;  %v1332_v13 = vunpack.c.h.s8.bf16 %v660_v5  ;;  %v709_v5 = vld [vmem:[%s5147_s30 + $0x868] sm:$0xff] }
 0x1a5   : > { %v1392_v8 = vunpack.c.l.s8.bf16 %v692_v6  ;;  %v1396_v14 = vunpack.c.h.s8.bf16 %v692_v6  ;;  %v741_v6 = vld [vmem:[%s5147_s30 + $0x968] sm:$0xff] }
 0x1a6   : > { %2043 = vmatpush1.bf16.msra.mxu0 %v1296_v9  ;;  %v1333_v9 = vunpack.c.h.s8.bf16 %v661_v63  ;;  %v704_v63 = vld [vmem:[%s5147_s30 + $0x840] sm:$0xff] }
 0x1a7   : > { %2084 = vmatpush1.bf16.msra.mxu1 %v1360_v10  ;;  %2044 = vmatprep.subr.bf16.mxu0 %v1301_v11  ;;  %v1397_v10 = vunpack.c.h.s8.bf16 %v693_v0  ;;  %v697_v11 = vld [vmem:[%s5147_s30 + $0x808] sm:$0xff]  ;;  %v736_v0 = vld [vmem:[%s5147_s30 + $0x940] sm:$0xff] }
 0x1a8   : > { %2085 = vmatprep.subr.bf16.mxu1 %v1365_v12  ;;  %v729_v12 = vld [vmem:[%s5147_s30 + $0x908] sm:$0xff] }
 0x1aa   : > { %2045 = vmatpush1.bf16.msra.mxu0 %v1300_v15  ;;  %v396_v15 = vld [vmem:[%s5140_s11 + $0x60] sm:$0xff] }
 0x1ab   : > { %2086 = vmatpush1.bf16.msra.mxu1 %v1364_v16  ;;  %2046 = vmatprep.subr.bf16.mxu0 %v1305_v17  ;;  %v398_v16 = vld [vmem:[%s5140_s11 + $0x70] sm:$0xff]  ;;  %v1401_v17 = vunpack.c.l.s8.bf16 %v697_v11 }
 0x1ac   : > { %2087 = vmatprep.subr.bf16.mxu1 %v1369_v18  ;;  %v1465_v18 = vunpack.c.l.s8.bf16 %v729_v12 }
 0x1ae   : > { %2047 = vmatpush1.bf16.msra.mxu0 %v1304_v23  ;;  %v5356_v23 = vpack.c.bf16 %v396_v15, %v396_v15 }
 0x1af   : > { %2088 = vmatpush1.bf16.msra.mxu1 %v1368_v24  ;;  %2048 = vmatprep.subr.bf16.mxu0 %v1309_v25  ;;  %v5358_v24 = vpack.c.bf16 %v398_v16, %v398_v16  ;;  %v401_v25 = vld [vmem:[%s5140_s11 + $0x88] sm:$0xff] }
 0x1b0   : > { %2089 = vmatprep.subr.bf16.mxu1 %v1373_v26  ;;  %v403_v26 = vld [vmem:[%s5140_s11 + $0x98] sm:$0xff]  ;;  %v5364_v39 = vpack.c.bf16 %v401_v25, %v401_v25 }
 0x1b1   : > { %v5366_v40 = vpack.c.bf16 %v403_v26, %v403_v26 }
 0x1b2   : > { %2049 = vmatpush1.bf16.msra.mxu0 %v1308_v31  ;;  %v1405_v31 = vunpack.c.h.s8.bf16 %v697_v11  ;;  %v708_v11 = vld [vmem:[%s5147_s30 + $0x860] sm:$0xff] }
 0x1b3   : > { %2090 = vmatpush1.bf16.msra.mxu1 %v1372_v32  ;;  %2050 = vmatprep.subr.bf16.mxu0 %v1313_v35  ;;  %v1469_v32 = vunpack.c.h.s8.bf16 %v729_v12  ;;  %v701_v35 = vld [vmem:[%s5147_s30 + $0x828] sm:$0xff]  ;;  %v740_v12 = vld [vmem:[%s5147_s30 + $0x960] sm:$0xff]  ;;  %v1424_v25 = vunpack.c.l.s8.bf16 %v708_v11 }
 0x1b4   : > { %2091 = vmatprep.subr.bf16.mxu1 %v1377_v36  ;;  %v733_v36 = vld [vmem:[%s5147_s30 + $0x928] sm:$0xff]  ;;  %v1488_v26 = vunpack.c.l.s8.bf16 %v740_v12 }
 0x1b6   : > { %2051 = vmatpush1.bf16.msra.mxu0 %v1312_v43  ;;  %v1404_v43 = vunpack.c.h.s8.bf16 %v696_v19 }
 0x1b7   : > { %2092 = vmatpush1.bf16.msra.mxu1 %v1376_v44  ;;  %2052 = vmatprep.subr.bf16.mxu0 %v1317_v45  ;;  %v1468_v44 = vunpack.c.h.s8.bf16 %v728_v20  ;;  %v1409_v45 = vunpack.c.l.s8.bf16 %v701_v35 }
 0x1b8   : > { %2093 = vmatprep.subr.bf16.mxu1 %v1381_v46  ;;  %v1473_v46 = vunpack.c.l.s8.bf16 %v733_v36 }
 0x1ba   : > { %2053 = vmatpush1.bf16.msra.mxu0 %v1316_v51  ;;  %v1408_v51 = vunpack.c.l.s8.bf16 %v700_v49 }
 0x1bb   : > { %2094 = vmatpush1.bf16.msra.mxu1 %v1380_v52  ;;  %2054 = vmatprep.subr.bf16.mxu0 %v1321_v53  ;;  %v1472_v52 = vunpack.c.l.s8.bf16 %v732_v50  ;;  %v1413_v53 = vunpack.c.h.s8.bf16 %v701_v35  ;;  %v713_v35 = vld [vmem:[%s5147_s30 + $0x888] sm:$0xff] }
 0x1bc   : > { %2095 = vmatprep.subr.bf16.mxu1 %v1385_v54  ;;  %v1477_v54 = vunpack.c.h.s8.bf16 %v733_v36  ;;  %v745_v36 = vld [vmem:[%s5147_s30 + $0x988] sm:$0xff] }
 0x1be   : > { %2055 = vmatpush1.bf16.msra.mxu0 %v1320_v59  ;;  %v1412_v59 = vunpack.c.h.s8.bf16 %v700_v49  ;;  %v712_v49 = vld [vmem:[%s5147_s30 + $0x880] sm:$0xff] }
 0x1bf   : > { %2096 = vmatpush1.bf16.msra.mxu1 %v1384_v60  ;;  %2056 = vmatprep.subr.bf16.mxu0 %v1325_v61  ;;  %v1476_v60 = vunpack.c.h.s8.bf16 %v732_v50  ;;  %v1417_v61 = vunpack.c.l.s8.bf16 %v705_v55  ;;  %v744_v50 = vld [vmem:[%s5147_s30 + $0x980] sm:$0xff] }
 0x1c0   : > { %2097 = vmatprep.subr.bf16.mxu1 %v1389_v62  ;;  %v1481_v62 = vunpack.c.l.s8.bf16 %v737_v56 }
 0x1c2   : > { %2057 = vmatpush1.bf16.msra.mxu0 %v1324_v1  ;;  %v1416_v1 = vunpack.c.l.s8.bf16 %v704_v63 }
 0x1c3   : > { %2098 = vmatpush1.bf16.msra.mxu1 %v1388_v2  ;;  %2058 = vmatprep.subr.bf16.mxu0 %v1329_v3  ;;  %v1480_v2 = vunpack.c.l.s8.bf16 %v736_v0  ;;  %v1421_v3 = vunpack.c.h.s8.bf16 %v705_v55  ;;  %v717_v55 = vld [vmem:[%s5147_s30 + $0x8a8] sm:$0xff] }
 0x1c4   : > { %2099 = vmatprep.subr.bf16.mxu1 %v1393_v4  ;;  %v1485_v4 = vunpack.c.h.s8.bf16 %v737_v56  ;;  %v749_v56 = vld [vmem:[%s5147_s30 + $0x9a8] sm:$0xff] }
 0x1c6   : > { %2059 = vmatpush1.bf16.msra.mxu0 %v1328_v7  ;;  %v1420_v7 = vunpack.c.h.s8.bf16 %v704_v63  ;;  %v716_v63 = vld [vmem:[%s5147_s30 + $0x8a0] sm:$0xff] }
 0x1c7   : > { %2100 = vmatpush1.bf16.msra.mxu1 %v1392_v8  ;;  %2060 = vmatprep.subr.bf16.mxu0 %v1333_v9  ;;  %v1484_v8 = vunpack.c.h.s8.bf16 %v736_v0  ;;  %v1425_v9 = vunpack.c.l.s8.bf16 %v709_v5  ;;  %v748_v0 = vld [vmem:[%s5147_s30 + $0x9a0] sm:$0xff] }
 0x1c8   : > { %2101 = vmatprep.subr.bf16.mxu1 %v1397_v10  ;;  %v1489_v10 = vunpack.c.l.s8.bf16 %v741_v6 }
 0x1ca   : > { %2061 = vmatpush1.bf16.msra.mxu0 %v1332_v13 }
 0x1cb   : > { %2102 = vmatpush1.bf16.msra.mxu1 %v1396_v14  ;;  %2112 = vmatprep.subr.bf16.mxu0 %v1401_v17 }
 0x1cc   : > { %2153 = vmatprep.subr.bf16.mxu1 %v1465_v18 }
 0x1cd   : > { %2063 = vmatmul.mubr.bf16.vlgmr.msra.gmra.mrb[12].mxu0 %v5356_v23 }
 0x1ce   : > { %2104 = vmatmul.mubr.bf16.vlgmr.msra.gmra.mrb[12].mxu1 %v5358_v24  ;;  %2113 = vmatpush1.bf16.msra.mxu0 %v1400_v27 }
 0x1cf   : > { %2154 = vmatpush1.bf16.msra.mxu1 %v1464_v28  ;;  %2114 = vmatprep.subr.bf16.mxu0 %v1405_v31  ;;  %v1429_v31 = vunpack.c.h.s8.bf16 %v709_v5  ;;  %v721_v5 = vld [vmem:[%s5147_s30 + $0x8c8] sm:$0xff] }
 0x1d0   : > { %2155 = vmatprep.subr.bf16.mxu1 %v1469_v32  ;;  %2144 = vmatprep.mubr.bf16.mxu0 %v5364_v39  ;;  %v1493_v32 = vunpack.c.h.s8.bf16 %v741_v6  ;;  %v753_v6 = vld [vmem:[%s5147_s30 + $0x9c8] sm:$0xff] }
 0x1d1   : > { %2185 = vmatprep.mubr.bf16.mxu1 %v5366_v40 }
 0x1d2   : > { %2115 = vmatpush1.bf16.msra.mxu0 %v1404_v43  ;;  %v1428_v43 = vunpack.c.h.s8.bf16 %v708_v11  ;;  %v720_v11 = vld [vmem:[%s5147_s30 + $0x8c0] sm:$0xff] }
 0x1d3   : > { %2156 = vmatpush1.bf16.msra.mxu1 %v1468_v44  ;;  %2116 = vmatprep.subr.bf16.mxu0 %v1409_v45  ;;  %v1492_v44 = vunpack.c.h.s8.bf16 %v740_v12  ;;  %v1433_v45 = vunpack.c.l.s8.bf16 %v713_v35  ;;  %v752_v12 = vld [vmem:[%s5147_s30 + $0x9c0] sm:$0xff] }
 0x1d4   : > { %2157 = vmatprep.subr.bf16.mxu1 %v1473_v46  ;;  %v1497_v46 = vunpack.c.l.s8.bf16 %v745_v36 }
 0x1d6   : > { %2117 = vmatpush1.bf16.msra.mxu0 %v1408_v51  ;;  %v1432_v51 = vunpack.c.l.s8.bf16 %v712_v49 }
 0x1d7   : > { %2158 = vmatpush1.bf16.msra.mxu1 %v1472_v52  ;;  %2118 = vmatprep.subr.bf16.mxu0 %v1413_v53  ;;  %v1496_v52 = vunpack.c.l.s8.bf16 %v744_v50  ;;  %v1437_v53 = vunpack.c.h.s8.bf16 %v713_v35 }
 0x1d8   : > { %2159 = vmatprep.subr.bf16.mxu1 %v1477_v54  ;;  %v1501_v54 = vunpack.c.h.s8.bf16 %v745_v36 }
 0x1da   : > { %2119 = vmatpush1.bf16.msra.mxu0 %v1412_v59  ;;  %v1436_v59 = vunpack.c.h.s8.bf16 %v712_v49 }
 0x1db   : > { %2160 = vmatpush1.bf16.msra.mxu1 %v1476_v60  ;;  %2120 = vmatprep.subr.bf16.mxu0 %v1417_v61  ;;  %v1500_v60 = vunpack.c.h.s8.bf16 %v744_v50  ;;  %v1441_v61 = vunpack.c.l.s8.bf16 %v717_v55 }
 0x1dc   : > { %2161 = vmatprep.subr.bf16.mxu1 %v1481_v62  ;;  %v1505_v62 = vunpack.c.l.s8.bf16 %v749_v56 }
 0x1de   : > { %2121 = vmatpush1.bf16.msra.mxu0 %v1416_v1  ;;  %v1440_v1 = vunpack.c.l.s8.bf16 %v716_v63 }
 0x1df   : > { %2162 = vmatpush1.bf16.msra.mxu1 %v1480_v2  ;;  %2122 = vmatprep.subr.bf16.mxu0 %v1421_v3  ;;  %v1504_v2 = vunpack.c.l.s8.bf16 %v748_v0  ;;  %v1445_v3 = vunpack.c.h.s8.bf16 %v717_v55  ;;  %v760_v55 = vld [vmem:[%s5147_s30 + $0xa00] sm:$0xff] }
 0x1e0   : > { %2163 = vmatprep.subr.bf16.mxu1 %v1485_v4  ;;  %v1818_v13 = vpop.f32.mrb[0].mxu0  ;;  %v1509_v4 = vunpack.c.h.s8.bf16 %v749_v56  ;;  %v792_v56 = vld [vmem:[%s5147_s30 + $0xb00] sm:$0xff] }
 0x1e1   : > { %v1859_v14 = vpop.f32.mrb[0].mxu1  ;;  %v1820_v16 = vpop.f32.mrb[1].mxu0 }
 0x1e2   : > { %v5382_v15 = vadd.f32 %v1859_v14, %v1818_v13  ;;  %v1861_v17 = vpop.f32.mrb[1].mxu1  ;;  %v1822_v19 = vpop.f32.mrb[2].mxu0  ;;  %2123 = vmatpush1.bf16.msra.mxu0 %v1420_v7  ;;  %v1444_v7 = vunpack.c.h.s8.bf16 %v716_v63  ;;  %v1448_v13 = vunpack.c.l.s8.bf16 %v720_v11  ;;  %v1512_v14 = vunpack.c.l.s8.bf16 %v752_v12 }
 0x1e3   : > { %v5384_v18 = vadd.f32 %v1861_v17, %v1820_v16  ;;  %v1863_v20 = vpop.f32.mrb[2].mxu1  ;;  %2164 = vmatpush1.bf16.msra.mxu1 %v1484_v8  ;;  %v1823_v27 = vpop.f32.mrb[3].mxu0  ;;  %2124 = vmatprep.subr.bf16.mxu0 %v1425_v9  ;;  %v1508_v8 = vunpack.c.h.s8.bf16 %v748_v0  ;;  %v1449_v9 = vunpack.c.l.s8.bf16 %v721_v5  ;;  %v1453_v16 = vunpack.c.h.s8.bf16 %v721_v5  ;;  %v725_v19 = vld [vmem:[%s5147_s30 + $0x8e8] sm:$0xff] }
 0x1e4   : > { %v1864_v28 = vpop.f32.mrb[3].mxu1  ;;  %2165 = vmatprep.subr.bf16.mxu1 %v1489_v10  ;;  %v1513_v10 = vunpack.c.l.s8.bf16 %v753_v6  ;;  %v1517_v17 = vunpack.c.h.s8.bf16 %v753_v6  ;;  %v757_v20 = vld [vmem:[%s5147_s30 + $0x9e8] sm:$0xff]  ;;  %v1457_v27 = vunpack.c.l.s8.bf16 %v725_v19  ;;  %v1528_v63 = vunpack.c.l.s8.bf16 %v760_v55 }
 0x1e5   : > { %v1521_v28 = vunpack.c.l.s8.bf16 %v757_v20  ;;  %v1592_v0 = vunpack.c.l.s8.bf16 %v792_v56 }
 0x1e6   : > { %2125 = vmatpush1.bf16.msra.mxu0 %v1424_v25  ;;  %v1452_v25 = vunpack.c.h.s8.bf16 %v720_v11  ;;  %v764_v11 = vld [vmem:[%s5147_s30 + $0xa20] sm:$0xff] }
 0x1e7   : > { %2166 = vmatpush1.bf16.msra.mxu1 %v1488_v26  ;;  %2126 = vmatprep.subr.bf16.mxu0 %v1429_v31  ;;  %v1516_v26 = vunpack.c.h.s8.bf16 %v752_v12  ;;  %v724_v31 = vld [vmem:[%s5147_s30 + $0x8e0] sm:$0xff] }
 0x1e8   : > { %2167 = vmatprep.subr.bf16.mxu1 %v1493_v32  ;;  %v756_v32 = vld [vmem:[%s5147_s30 + $0x9e0] sm:$0xff]  ;;  %v1456_v35 = vunpack.c.l.s8.bf16 %v724_v31  ;;  %v1460_v49 = vunpack.c.h.s8.bf16 %v724_v31 }
 0x1e9   : > { %v1520_v36 = vunpack.c.l.s8.bf16 %v756_v32  ;;  %v1524_v50 = vunpack.c.h.s8.bf16 %v756_v32  ;;  %v796_v12 = vld [vmem:[%s5147_s30 + $0xb20] sm:$0xff] }
 0x1ea   : > { %2127 = vmatpush1.bf16.msra.mxu0 %v1428_v43  ;;  %v1461_v43 = vunpack.c.h.s8.bf16 %v725_v19  ;;  %v769_v19 = vld [vmem:[%s5147_s30 + $0xa48] sm:$0xff]  ;;  %v768_v31 = vld [vmem:[%s5147_s30 + $0xa40] sm:$0xff] }
 0x1eb   : > { %2168 = vmatpush1.bf16.msra.mxu1 %v1492_v44  ;;  %2128 = vmatprep.subr.bf16.mxu0 %v1433_v45  ;;  %v1525_v44 = vunpack.c.h.s8.bf16 %v757_v20  ;;  %v761_v45 = vld [vmem:[%s5147_s30 + $0xa08] sm:$0xff]  ;;  %v800_v32 = vld [vmem:[%s5147_s30 + $0xb40] sm:$0xff] }
 0x1ec   : > { %2169 = vmatprep.subr.bf16.mxu1 %v1497_v46  ;;  %v793_v46 = vld [vmem:[%s5147_s30 + $0xb08] sm:$0xff] }
 0x1ed   : > { %v801_v20 = vld [vmem:[%s5147_s30 + $0xb48] sm:$0xff] }
 0x1ee   : > { %2129 = vmatpush1.bf16.msra.mxu0 %v1432_v51  ;;  %v400_v51 = vld [vmem:[%s5140_s11 + $0x80] sm:$0xff] }
 0x1ef   : > { %2170 = vmatpush1.bf16.msra.mxu1 %v1496_v52  ;;  %2130 = vmatprep.subr.bf16.mxu0 %v1437_v53  ;;  %v402_v52 = vld [vmem:[%s5140_s11 + $0x90] sm:$0xff]  ;;  %v1529_v53 = vunpack.c.l.s8.bf16 %v761_v45 }
 0x1f0   : > { %2171 = vmatprep.subr.bf16.mxu1 %v1501_v54  ;;  %v1593_v54 = vunpack.c.l.s8.bf16 %v793_v46 }
 0x1f2   : > { %2131 = vmatpush1.bf16.msra.mxu0 %v1436_v59  ;;  %v5408_v59 = vpack.c.bf16 %v400_v51, %v400_v51 }
 0x1f3   : > { %2172 = vmatpush1.bf16.msra.mxu1 %v1500_v60  ;;  %2132 = vmatprep.subr.bf16.mxu0 %v1441_v61  ;;  %v5410_v60 = vpack.c.bf16 %v402_v52, %v402_v52  ;;  %v405_v61 = vld [vmem:[%s5140_s11 + $0xa8] sm:$0xff] }
 0x1f4   : > { %2173 = vmatprep.subr.bf16.mxu1 %v1505_v62  ;;  %v407_v62 = vld [vmem:[%s5140_s11 + $0xb8] sm:$0xff]  ;;  %v5416_v5 = vpack.c.bf16 %v405_v61, %v405_v61 }
 0x1f5   : > { %v5418_v6 = vpack.c.bf16 %v407_v62, %v407_v62 }
 0x1f6   : > { %2133 = vmatpush1.bf16.msra.mxu0 %v1440_v1  ;;  %v1533_v1 = vunpack.c.h.s8.bf16 %v761_v45  ;;  %v773_v45 = vld [vmem:[%s5147_s30 + $0xa68] sm:$0xff] }
 0x1f7   : > { %2174 = vmatpush1.bf16.msra.mxu1 %v1504_v2  ;;  %2134 = vmatprep.subr.bf16.mxu0 %v1445_v3  ;;  %v1597_v2 = vunpack.c.h.s8.bf16 %v793_v46  ;;  %v765_v3 = vld [vmem:[%s5147_s30 + $0xa28] sm:$0xff]  ;;  %v1553_v51 = vunpack.c.l.s8.bf16 %v773_v45 }
 0x1f8   : > { %2175 = vmatprep.subr.bf16.mxu1 %v1509_v4  ;;  %v797_v4 = vld [vmem:[%s5147_s30 + $0xb28] sm:$0xff] }
 0x1f9   : > { %v805_v46 = vld [vmem:[%s5147_s30 + $0xb68] sm:$0xff] }
 0x1fa   : > { %2135 = vmatpush1.bf16.msra.mxu0 %v1444_v7  ;;  %v1532_v7 = vunpack.c.h.s8.bf16 %v760_v55  ;;  %v1617_v52 = vunpack.c.l.s8.bf16 %v805_v46 }
 0x1fb   : > { %2176 = vmatpush1.bf16.msra.mxu1 %v1508_v8  ;;  %2136 = vmatprep.subr.bf16.mxu0 %v1449_v9  ;;  %v1596_v8 = vunpack.c.h.s8.bf16 %v792_v56  ;;  %v1537_v9 = vunpack.c.l.s8.bf16 %v765_v3 }
 0x1fc   : > { %2177 = vmatprep.subr.bf16.mxu1 %v1513_v10  ;;  %v1601_v10 = vunpack.c.l.s8.bf16 %v797_v4 }
 0x1fe   : > { %2137 = vmatpush1.bf16.msra.mxu0 %v1448_v13  ;;  %v1536_v13 = vunpack.c.l.s8.bf16 %v764_v11 }
 0x1ff   : > { %2178 = vmatpush1.bf16.msra.mxu1 %v1512_v14  ;;  %2138 = vmatprep.subr.bf16.mxu0 %v1453_v16  ;;  %v1600_v14 = vunpack.c.l.s8.bf16 %v796_v12  ;;  %v1541_v16 = vunpack.c.h.s8.bf16 %v765_v3 }
 0x200   : > { %2179 = vmatprep.subr.bf16.mxu1 %v1517_v17  ;;  %v1605_v17 = vunpack.c.h.s8.bf16 %v797_v4 }
 0x202   : > { %2139 = vmatpush1.bf16.msra.mxu0 %v1452_v25  ;;  %v1540_v25 = vunpack.c.h.s8.bf16 %v764_v11 }
 0x203   : > { %2180 = vmatpush1.bf16.msra.mxu1 %v1516_v26  ;;  %2140 = vmatprep.subr.bf16.mxu0 %v1457_v27  ;;  %v1604_v26 = vunpack.c.h.s8.bf16 %v796_v12  ;;  %v1545_v27 = vunpack.c.l.s8.bf16 %v769_v19  ;;  %v809_v12 = vld [vmem:[%s5147_s30 + $0xb88] sm:$0xff] }
 0x204   : > { %2181 = vmatprep.subr.bf16.mxu1 %v1521_v28  ;;  %v1609_v28 = vunpack.c.l.s8.bf16 %v801_v20 }
 0x206   : > { %2141 = vmatpush1.bf16.msra.mxu0 %v1456_v35  ;;  %v1544_v35 = vunpack.c.l.s8.bf16 %v768_v31 }
 0x207   : > { %2182 = vmatpush1.bf16.msra.mxu1 %v1520_v36  ;;  %2142 = vmatprep.subr.bf16.mxu0 %v1461_v43  ;;  %v1608_v36 = vunpack.c.l.s8.bf16 %v800_v32  ;;  %v1549_v43 = vunpack.c.h.s8.bf16 %v769_v19  ;;  %v776_v19 = vld [vmem:[%s5147_s30 + $0xa80] sm:$0xff] }
 0x208   : > { %2183 = vmatprep.subr.bf16.mxu1 %v1525_v44  ;;  %v1613_v44 = vunpack.c.h.s8.bf16 %v801_v20  ;;  %v808_v20 = vld [vmem:[%s5147_s30 + $0xb80] sm:$0xff] }
 0x20a   : > { %2143 = vmatpush1.bf16.msra.mxu0 %v1460_v49  ;;  %v1548_v49 = vunpack.c.h.s8.bf16 %v768_v31  ;;  %v781_v31 = vld [vmem:[%s5147_s30 + $0xaa8] sm:$0xff] }
 0x20b   : > { %2184 = vmatpush1.bf16.msra.mxu1 %v1524_v50  ;;  %2194 = vmatprep.subr.bf16.mxu0 %v1529_v53  ;;  %v1612_v50 = vunpack.c.h.s8.bf16 %v800_v32  ;;  %v772_v53 = vld [vmem:[%s5147_s30 + $0xa60] sm:$0xff]  ;;  %v813_v32 = vld [vmem:[%s5147_s30 + $0xba8] sm:$0xff] }
 0x20c   : > { %2235 = vmatprep.subr.bf16.mxu1 %v1593_v54  ;;  %v804_v54 = vld [vmem:[%s5147_s30 + $0xb60] sm:$0xff]  ;;  %v1552_v3 = vunpack.c.l.s8.bf16 %v772_v53 }
 0x20d   : > { %2145 = vmatmul.mubr.bf16.vlgmr.msra.gmra.mrb[16].mxu0 %v5408_v59  ;;  %v1616_v4 = vunpack.c.l.s8.bf16 %v804_v54 }
 0x20e   : > { %2186 = vmatmul.mubr.bf16.vlgmr.msra.gmra.mrb[16].mxu1 %v5410_v60  ;;  %2195 = vmatpush1.bf16.msra.mxu0 %v1528_v63 }
 0x20f   : > { %2236 = vmatpush1.bf16.msra.mxu1 %v1592_v0  ;;  %2196 = vmatprep.subr.bf16.mxu0 %v1533_v1 }
 0x210   : > { %2237 = vmatprep.subr.bf16.mxu1 %v1597_v2  ;;  %2226 = vmatprep.mubr.bf16.mxu0 %v5416_v5 }
 0x211   : > { %2267 = vmatprep.mubr.bf16.mxu1 %v5418_v6 }
 0x212   : > { %2197 = vmatpush1.bf16.msra.mxu0 %v1532_v7 }
 0x213   : > { %2238 = vmatpush1.bf16.msra.mxu1 %v1596_v8  ;;  %2198 = vmatprep.subr.bf16.mxu0 %v1537_v9 }
 0x214   : > { %2239 = vmatprep.subr.bf16.mxu1 %v1601_v10  ;;  %v1621_v10 = vunpack.c.h.s8.bf16 %v805_v46  ;;  %v812_v46 = vld [vmem:[%s5147_s30 + $0xba0] sm:$0xff] }
 0x216   : > { %2199 = vmatpush1.bf16.msra.mxu0 %v1536_v13  ;;  %v1556_v13 = vunpack.c.h.s8.bf16 %v772_v53  ;;  %v785_v53 = vld [vmem:[%s5147_s30 + $0xac8] sm:$0xff] }
 0x217   : > { %2240 = vmatpush1.bf16.msra.mxu1 %v1600_v14  ;;  %2200 = vmatprep.subr.bf16.mxu0 %v1541_v16  ;;  %v1620_v14 = vunpack.c.h.s8.bf16 %v804_v54  ;;  %v817_v54 = vld [vmem:[%s5147_s30 + $0xbc8] sm:$0xff] }
 0x218   : > { %2241 = vmatprep.subr.bf16.mxu1 %v1605_v17  ;;  %v1625_v17 = vunpack.c.l.s8.bf16 %v809_v12 }
 0x21a   : > { %2201 = vmatpush1.bf16.msra.mxu0 %v1540_v25  ;;  %v1560_v25 = vunpack.c.l.s8.bf16 %v776_v19 }
 0x21b   : > { %2242 = vmatpush1.bf16.msra.mxu1 %v1604_v26  ;;  %2202 = vmatprep.subr.bf16.mxu0 %v1545_v27  ;;  %v1624_v26 = vunpack.c.l.s8.bf16 %v808_v20 }
 0x21c   : > { %2243 = vmatprep.subr.bf16.mxu1 %v1609_v28  ;;  %v1629_v28 = vunpack.c.h.s8.bf16 %v809_v12 }
 0x21e   : > { %2203 = vmatpush1.bf16.msra.mxu0 %v1544_v35  ;;  %v1564_v35 = vunpack.c.h.s8.bf16 %v776_v19 }
 0x21f   : > { %2244 = vmatpush1.bf16.msra.mxu1 %v1608_v36  ;;  %2204 = vmatprep.subr.bf16.mxu0 %v1549_v43  ;;  %v1628_v36 = vunpack.c.h.s8.bf16 %v808_v20  ;;  %v1569_v43 = vunpack.c.l.s8.bf16 %v781_v31 }
 0x220   : > { %2245 = vmatprep.subr.bf16.mxu1 %v1613_v44  ;;  %v1900_v55 = vpop.f32.mrb[4].mxu0  ;;  %v1633_v44 = vunpack.c.l.s8.bf16 %v813_v32 }
 0x221   : > { %v1941_v56 = vpop.f32.mrb[4].mxu1  ;;  %v1901_v61 = vadd.f32 %v1900_v55, %v5382_v15  ;;  %v1902_v62 = vpop.f32.mrb[5].mxu0  ;;  %v1557_v15 = vunpack.c.h.s8.bf16 %v773_v45  ;;  %v780_v45 = vld [vmem:[%s5147_s30 + $0xaa0] sm:$0xff] }
 0x222   : > { %v1943_v63 = vpop.f32.mrb[5].mxu1  ;;  %v1903_v0 = vadd.f32 %v1902_v62, %v5384_v18  ;;  %v1904_v1 = vpop.f32.mrb[6].mxu0  ;;  %2205 = vmatpush1.bf16.msra.mxu0 %v1548_v49  ;;  %v777_v18 = vld [vmem:[%s5147_s30 + $0xa88] sm:$0xff]  ;;  %v1568_v49 = vunpack.c.l.s8.bf16 %v780_v45  ;;  %v1572_v55 = vunpack.c.h.s8.bf16 %v780_v45  ;;  %v1641_v62 = vunpack.c.l.s8.bf16 %v817_v54 }
 0x223   : > { %v1945_v2 = vpop.f32.mrb[6].mxu1  ;;  %2246 = vmatpush1.bf16.msra.mxu1 %v1612_v50  ;;  %v5436_v7 = vadd.f32 %v1941_v56, %v1901_v61  ;;  %v1905_v8 = vpop.f32.mrb[7].mxu0  ;;  %2206 = vmatprep.subr.bf16.mxu0 %v1553_v51  ;;  %v1561_v16 = vunpack.c.l.s8.bf16 %v777_v18  ;;  %v1565_v27 = vunpack.c.h.s8.bf16 %v777_v18  ;;  %v1632_v50 = vunpack.c.l.s8.bf16 %v812_v46 }
 0x224   : > { %v1946_v9 = vpop.f32.mrb[7].mxu1  ;;  %2247 = vmatprep.subr.bf16.mxu1 %v1617_v52  ;;  %v5438_v11 = vadd.f32 %v1943_v63, %v1903_v0  ;;  %v1573_v51 = vunpack.c.h.s8.bf16 %v781_v31  ;;  %v1637_v52 = vunpack.c.h.s8.bf16 %v813_v32  ;;  %v1636_v56 = vunpack.c.h.s8.bf16 %v812_v46  ;;  %v784_v63 = vld [vmem:[%s5147_s30 + $0xac0] sm:$0xff]  ;;  %v789_v8 = vld [vmem:[%s5147_s30 + $0xae8] sm:$0xff]  ;;  %v406_v32 = vld [vmem:[%s5140_s11 + $0xb0] sm:$0xff] }
 0x225   : > { %v1577_v61 = vunpack.c.l.s8.bf16 %v785_v53  ;;  %v816_v0 = vld [vmem:[%s5147_s30 + $0xbc0] sm:$0xff]  ;;  %v1576_v1 = vunpack.c.l.s8.bf16 %v784_v63  ;;  %v821_v9 = vld [vmem:[%s5147_s30 + $0xbe8] sm:$0xff]  ;;  %v1585_v18 = vunpack.c.l.s8.bf16 %v789_v8  ;;  %v1589_v19 = vunpack.c.h.s8.bf16 %v789_v8 }
 0x226   : > { %2207 = vmatpush1.bf16.msra.mxu0 %v1552_v3  ;;  %v1640_v2 = vunpack.c.l.s8.bf16 %v816_v0  ;;  %v1581_v3 = vunpack.c.h.s8.bf16 %v785_v53  ;;  %v1649_v12 = vunpack.c.l.s8.bf16 %v821_v9  ;;  %v1653_v20 = vunpack.c.h.s8.bf16 %v821_v9  ;;  %v404_v31 = vld [vmem:[%s5140_s11 + $0xa0] sm:$0xff] }
 0x227   : > { %2248 = vmatpush1.bf16.msra.mxu1 %v1616_v4  ;;  %2208 = vmatprep.subr.bf16.mxu0 %v1557_v15  ;;  %v1645_v4 = vunpack.c.h.s8.bf16 %v817_v54  ;;  %v1580_v15 = vunpack.c.h.s8.bf16 %v784_v63  ;;  %v5462_v45 = vpack.c.bf16 %v404_v31, %v404_v31  ;;  %v5464_v46 = vpack.c.bf16 %v406_v32, %v406_v32  ;;  %v837_v31 = vld [vmem:[%s5147_s30 + $0xc68] sm:$0xff] }
 0x228   : > { %2249 = vmatprep.subr.bf16.mxu1 %v1621_v10  ;;  %v1644_v10 = vunpack.c.h.s8.bf16 %v816_v0  ;;  %v869_v32 = vld [vmem:[%s5147_s30 + $0xd68] sm:$0xff] }
 0x22a   : > { %2209 = vmatpush1.bf16.msra.mxu0 %v1556_v13  ;;  %v788_v13 = vld [vmem:[%s5147_s30 + $0xae0] sm:$0xff] }
 0x22b   : > { %2250 = vmatpush1.bf16.msra.mxu1 %v1620_v14  ;;  %2210 = vmatprep.subr.bf16.mxu0 %v1561_v16  ;;  %v820_v14 = vld [vmem:[%s5147_s30 + $0xbe0] sm:$0xff]  ;;  %v1584_v16 = vunpack.c.l.s8.bf16 %v788_v13 }
 0x22c   : > { %2251 = vmatprep.subr.bf16.mxu1 %v1625_v17  ;;  %v1648_v17 = vunpack.c.l.s8.bf16 %v820_v14 }
 0x22e   : > { %2211 = vmatpush1.bf16.msra.mxu0 %v1560_v25  ;;  %v825_v25 = vld [vmem:[%s5147_s30 + $0xc08] sm:$0xff] }
 0x22f   : > { %2252 = vmatpush1.bf16.msra.mxu1 %v1624_v26  ;;  %2212 = vmatprep.subr.bf16.mxu0 %v1565_v27  ;;  %v857_v26 = vld [vmem:[%s5147_s30 + $0xd08] sm:$0xff]  ;;  %v1588_v27 = vunpack.c.h.s8.bf16 %v788_v13  ;;  %v1661_v53 = vunpack.c.h.s8.bf16 %v825_v25 }
 0x230   : > { %2253 = vmatprep.subr.bf16.mxu1 %v1629_v28  ;;  %v1652_v28 = vunpack.c.h.s8.bf16 %v820_v14  ;;  %v1725_v54 = vunpack.c.h.s8.bf16 %v857_v26 }
 0x232   : > { %2213 = vmatpush1.bf16.msra.mxu0 %v1564_v35  ;;  %v1657_v35 = vunpack.c.l.s8.bf16 %v825_v25 }
 0x233   : > { %2254 = vmatpush1.bf16.msra.mxu1 %v1628_v36  ;;  %2214 = vmatprep.subr.bf16.mxu0 %v1569_v43  ;;  %v1721_v36 = vunpack.c.l.s8.bf16 %v857_v26  ;;  %v824_v43 = vld [vmem:[%s5147_s30 + $0xc00] sm:$0xff] }
 0x234   : > { %2255 = vmatprep.subr.bf16.mxu1 %v1633_v44  ;;  %v856_v44 = vld [vmem:[%s5147_s30 + $0xd00] sm:$0xff]  ;;  %v1660_v63 = vunpack.c.h.s8.bf16 %v824_v43 }
 0x235   : > { %v1724_v0 = vunpack.c.h.s8.bf16 %v856_v44 }
 0x236   : > { %2215 = vmatpush1.bf16.msra.mxu0 %v1568_v49  ;;  %v409_v49 = vld [vmem:[%s5140_s11 + $0xc8] sm:$0xff] }
 0x237   : > { %2256 = vmatpush1.bf16.msra.mxu1 %v1632_v50  ;;  %2216 = vmatprep.subr.bf16.mxu0 %v1573_v51  ;;  %v411_v50 = vld [vmem:[%s5140_s11 + $0xd8] sm:$0xff]  ;;  %v1656_v51 = vunpack.c.l.s8.bf16 %v824_v43  ;;  %v1681_v43 = vunpack.c.l.s8.bf16 %v837_v31 }
 0x238   : > { %2257 = vmatprep.subr.bf16.mxu1 %v1637_v52  ;;  %v1720_v52 = vunpack.c.l.s8.bf16 %v856_v44  ;;  %v1745_v44 = vunpack.c.l.s8.bf16 %v869_v32 }
 0x23a   : > { %2217 = vmatpush1.bf16.msra.mxu0 %v1572_v55  ;;  %v829_v55 = vld [vmem:[%s5147_s30 + $0xc28] sm:$0xff] }
 0x23b   : > { %2258 = vmatpush1.bf16.msra.mxu1 %v1636_v56  ;;  %2218 = vmatprep.subr.bf16.mxu0 %v1577_v61  ;;  %v861_v56 = vld [vmem:[%s5147_s30 + $0xd28] sm:$0xff]  ;;  %v5470_v61 = vpack.c.bf16 %v409_v49, %v409_v49  ;;  %v836_v49 = vld [vmem:[%s5147_s30 + $0xc60] sm:$0xff] }
 0x23c   : > { %2259 = vmatprep.subr.bf16.mxu1 %v1641_v62  ;;  %v5472_v62 = vpack.c.bf16 %v411_v50, %v411_v50  ;;  %v868_v50 = vld [vmem:[%s5147_s30 + $0xd60] sm:$0xff] }
 0x23e   : > { %2219 = vmatpush1.bf16.msra.mxu0 %v1576_v1  ;;  %v1665_v1 = vunpack.c.l.s8.bf16 %v829_v55 }
 0x23f   : > { %2260 = vmatpush1.bf16.msra.mxu1 %v1640_v2  ;;  %2220 = vmatprep.subr.bf16.mxu0 %v1581_v3  ;;  %v1729_v2 = vunpack.c.l.s8.bf16 %v861_v56  ;;  %v828_v3 = vld [vmem:[%s5147_s30 + $0xc20] sm:$0xff] }
 0x240   : > { %2261 = vmatprep.subr.bf16.mxu1 %v1645_v4  ;;  %v860_v4 = vld [vmem:[%s5147_s30 + $0xd20] sm:$0xff]  ;;  %v1664_v8 = vunpack.c.l.s8.bf16 %v828_v3  ;;  %v1668_v13 = vunpack.c.h.s8.bf16 %v828_v3 }
 0x241   : > { %v1728_v9 = vunpack.c.l.s8.bf16 %v860_v4  ;;  %v1732_v14 = vunpack.c.h.s8.bf16 %v860_v4 }
 0x242   : > { %2221 = vmatpush1.bf16.msra.mxu0 %v1580_v15  ;;  %v1669_v15 = vunpack.c.h.s8.bf16 %v829_v55 }
 0x243   : > { %2262 = vmatpush1.bf16.msra.mxu1 %v1644_v10  ;;  %2222 = vmatprep.subr.bf16.mxu0 %v1585_v18  ;;  %v1733_v10 = vunpack.c.h.s8.bf16 %v861_v56  ;;  %v833_v18 = vld [vmem:[%s5147_s30 + $0xc48] sm:$0xff] }
 0x244   : > { %2263 = vmatprep.subr.bf16.mxu1 %v1649_v12  ;;  %v865_v12 = vld [vmem:[%s5147_s30 + $0xd48] sm:$0xff] }
 0x246   : > { %2223 = vmatpush1.bf16.msra.mxu0 %v1584_v16  ;;  %v1673_v16 = vunpack.c.l.s8.bf16 %v833_v18 }
 0x247   : > { %2264 = vmatpush1.bf16.msra.mxu1 %v1648_v17  ;;  %2224 = vmatprep.subr.bf16.mxu0 %v1589_v19  ;;  %v1737_v17 = vunpack.c.l.s8.bf16 %v865_v12  ;;  %v832_v19 = vld [vmem:[%s5147_s30 + $0xc40] sm:$0xff] }
 0x248   : > { %2265 = vmatprep.subr.bf16.mxu1 %v1653_v20  ;;  %v864_v20 = vld [vmem:[%s5147_s30 + $0xd40] sm:$0xff]  ;;  %v1672_v25 = vunpack.c.l.s8.bf16 %v832_v19 }
 0x249   : > { %v1736_v26 = vunpack.c.l.s8.bf16 %v864_v20 }
 0x24a   : > { %2225 = vmatpush1.bf16.msra.mxu0 %v1588_v27  ;;  %v1677_v27 = vunpack.c.h.s8.bf16 %v833_v18  ;;  %v1684_v18 = vunpack.c.h.s8.bf16 %v836_v49 }
 0x24b   : > { %2266 = vmatpush1.bf16.msra.mxu1 %v1652_v28  ;;  %2276 = vmatprep.subr.bf16.mxu0 %v1657_v35  ;;  %v1741_v28 = vunpack.c.h.s8.bf16 %v865_v12  ;;  %v1676_v35 = vunpack.c.h.s8.bf16 %v832_v19  ;;  %v1748_v12 = vunpack.c.h.s8.bf16 %v868_v50 }
 0x24c   : > { %2317 = vmatprep.subr.bf16.mxu1 %v1721_v36  ;;  %v1740_v36 = vunpack.c.h.s8.bf16 %v864_v20 }
 0x24d   : > { %2227 = vmatmul.mubr.bf16.vlgmr.msra.gmra.mrb[20].mxu0 %v5462_v45 }
 0x24e   : > { %2268 = vmatmul.mubr.bf16.vlgmr.msra.gmra.mrb[20].mxu1 %v5464_v46  ;;  %2277 = vmatpush1.bf16.msra.mxu0 %v1656_v51 }
 0x24f   : > { %2318 = vmatpush1.bf16.msra.mxu1 %v1720_v52  ;;  %2278 = vmatprep.subr.bf16.mxu0 %v1661_v53 }
 0x250   : > { %2319 = vmatprep.subr.bf16.mxu1 %v1725_v54  ;;  %2308 = vmatprep.mubr.bf16.mxu0 %v5470_v61 }
 0x251   : > { %2349 = vmatprep.mubr.bf16.mxu1 %v5472_v62 }
 0x252   : > { %2279 = vmatpush1.bf16.msra.mxu0 %v1660_v63 }
 0x253   : > { %2320 = vmatpush1.bf16.msra.mxu1 %v1724_v0  ;;  %2280 = vmatprep.subr.bf16.mxu0 %v1665_v1  ;;  %v1680_v1 = vunpack.c.l.s8.bf16 %v836_v49 }
 0x254   : > { %2321 = vmatprep.subr.bf16.mxu1 %v1729_v2  ;;  %v1744_v2 = vunpack.c.l.s8.bf16 %v868_v50 }
 0x256   : > { %2281 = vmatpush1.bf16.msra.mxu0 %v1664_v8 }
 0x257   : > { %2322 = vmatpush1.bf16.msra.mxu1 %v1728_v9  ;;  %2282 = vmatprep.subr.bf16.mxu0 %v1669_v15  ;;  %v1749_v9 = vunpack.c.h.s8.bf16 %v869_v32 }
 0x258   : > { %2323 = vmatprep.subr.bf16.mxu1 %v1733_v10  ;;  %v873_v10 = vld [vmem:[%s5147_s30 + $0xd88] sm:$0xff] }
 0x25a   : > { %2283 = vmatpush1.bf16.msra.mxu0 %v1668_v13 }
 0x25b   : > { %2324 = vmatpush1.bf16.msra.mxu1 %v1732_v14  ;;  %2284 = vmatprep.subr.bf16.mxu0 %v1673_v16  ;;  %v1753_v14 = vunpack.c.l.s8.bf16 %v873_v10  ;;  %v840_v16 = vld [vmem:[%s5147_s30 + $0xc80] sm:$0xff] }
 0x25c   : > { %2325 = vmatprep.subr.bf16.mxu1 %v1737_v17  ;;  %v872_v17 = vld [vmem:[%s5147_s30 + $0xd80] sm:$0xff]  ;;  %v1688_v19 = vunpack.c.l.s8.bf16 %v840_v16 }
 0x25d   : > { %v1752_v20 = vunpack.c.l.s8.bf16 %v872_v17  ;;  %v1756_v32 = vunpack.c.h.s8.bf16 %v872_v17  ;;  %v884_v17 = vld [vmem:[%s5147_s30 + $0xde0] sm:$0xff] }
 0x25e   : > { %2285 = vmatpush1.bf16.msra.mxu0 %v1672_v25 }
 0x25f   : > { %2326 = vmatpush1.bf16.msra.mxu1 %v1736_v26  ;;  %2286 = vmatprep.subr.bf16.mxu0 %v1677_v27  ;;  %v1757_v26 = vunpack.c.h.s8.bf16 %v873_v10  ;;  %v845_v27 = vld [vmem:[%s5147_s30 + $0xca8] sm:$0xff] }
 0x260   : > { %2327 = vmatprep.subr.bf16.mxu1 %v1741_v28  ;;  %v1982_v51 = vpop.f32.mrb[8].mxu0  ;;  %v877_v28 = vld [vmem:[%s5147_s30 + $0xda8] sm:$0xff] }
 0x261   : > { %v2023_v52 = vpop.f32.mrb[8].mxu1  ;;  %v1983_v53 = vadd.f32 %v1982_v51, %v5436_v7  ;;  %v1984_v54 = vpop.f32.mrb[9].mxu0  ;;  %v1685_v7 = vunpack.c.h.s8.bf16 %v837_v31  ;;  %v1692_v31 = vunpack.c.h.s8.bf16 %v840_v16  ;;  %v1701_v51 = vunpack.c.h.s8.bf16 %v845_v27  ;;  %v885_v10 = vld [vmem:[%s5147_s30 + $0xde8] sm:$0xff]  ;;  %v852_v16 = vld [vmem:[%s5147_s30 + $0xce0] sm:$0xff] }
 0x262   : > { %v2025_v55 = vpop.f32.mrb[9].mxu1  ;;  %v1985_v56 = vadd.f32 %v1984_v54, %v5438_v11  ;;  %v1986_v63 = vpop.f32.mrb[10].mxu0  ;;  %2287 = vmatpush1.bf16.msra.mxu0 %v1676_v35  ;;  %v841_v11 = vld [vmem:[%s5147_s30 + $0xc88] sm:$0xff]  ;;  %v1697_v35 = vunpack.c.l.s8.bf16 %v845_v27  ;;  %v443_v27 = vld [vmem:[%s5147_s30 + $0x18] sm:$0xff] }
 0x263   : > { %v2027_v0 = vpop.f32.mrb[10].mxu1  ;;  %2328 = vmatpush1.bf16.msra.mxu1 %v1740_v36  ;;  %v5490_v3 = vadd.f32 %v2023_v52, %v1983_v53  ;;  %v1987_v4 = vpop.f32.mrb[11].mxu0  ;;  %2288 = vmatprep.subr.bf16.mxu0 %v1681_v43  ;;  %v1689_v13 = vunpack.c.l.s8.bf16 %v841_v11  ;;  %v1693_v25 = vunpack.c.h.s8.bf16 %v841_v11  ;;  %v1761_v36 = vunpack.c.l.s8.bf16 %v877_v28  ;;  %v844_v43 = vld [vmem:[%s5147_s30 + $0xca0] sm:$0xff]  ;;  %v849_v53 = vld [vmem:[%s5147_s30 + $0xcc8] sm:$0xff] }
 0x264   : > { %v2028_v8 = vpop.f32.mrb[11].mxu1  ;;  %2329 = vmatprep.subr.bf16.mxu1 %v1745_v44  ;;  %v5492_v15 = vadd.f32 %v2025_v55, %v1985_v56  ;;  %v876_v44 = vld [vmem:[%s5147_s30 + $0xda0] sm:$0xff]  ;;  %v1696_v49 = vunpack.c.l.s8.bf16 %v844_v43  ;;  %v1765_v52 = vunpack.c.h.s8.bf16 %v877_v28  ;;  %v881_v54 = vld [vmem:[%s5147_s30 + $0xdc8] sm:$0xff]  ;;  %v1700_v55 = vunpack.c.h.s8.bf16 %v844_v43  ;;  %v475_v28 = vld [vmem:[%s5147_s30 + $0x118] sm:$0xff] }
 0x265   : > { %v1760_v50 = vunpack.c.l.s8.bf16 %v876_v44  ;;  %v1764_v56 = vunpack.c.h.s8.bf16 %v876_v44  ;;  %v1705_v63 = vunpack.c.l.s8.bf16 %v849_v53  ;;  %v1769_v0 = vunpack.c.l.s8.bf16 %v881_v54  ;;  %v853_v11 = vld [vmem:[%s5147_s30 + $0xce8] sm:$0xff] }
 0x266   : > { %2289 = vmatpush1.bf16.msra.mxu0 %v1680_v1  ;;  %v848_v1 = vld [vmem:[%s5147_s30 + $0xcc0] sm:$0xff]  ;;  %v891_v43 = vunpack.c.l.s8.bf16 %v443_v27  ;;  %v955_v44 = vunpack.c.l.s8.bf16 %v475_v28 }
 0x267   : > { %2330 = vmatpush1.bf16.msra.mxu1 %v1744_v2  ;;  %2290 = vmatprep.subr.bf16.mxu0 %v1685_v7  ;;  %v880_v2 = vld [vmem:[%s5147_s30 + $0xdc0] sm:$0xff]  ;;  %v1704_v4 = vunpack.c.l.s8.bf16 %v848_v1  ;;  %v1709_v7 = vunpack.c.h.s8.bf16 %v849_v53 }
 0x268   : > { %2331 = vmatprep.subr.bf16.mxu1 %v1749_v9  ;;  %v1768_v8 = vunpack.c.l.s8.bf16 %v880_v2  ;;  %v1773_v9 = vunpack.c.h.s8.bf16 %v881_v54 }
 0x26a   : > { %2291 = vmatpush1.bf16.msra.mxu0 %v1684_v18  ;;  %v1708_v18 = vunpack.c.h.s8.bf16 %v848_v1 }
 0x26b   : > { %2332 = vmatpush1.bf16.msra.mxu1 %v1748_v12  ;;  %2292 = vmatprep.subr.bf16.mxu0 %v1689_v13  ;;  %v1772_v12 = vunpack.c.h.s8.bf16 %v880_v2  ;;  %v1713_v13 = vunpack.c.l.s8.bf16 %v853_v11 }
 0x26c   : > { %2333 = vmatprep.subr.bf16.mxu1 %v1753_v14  ;;  %v1777_v14 = vunpack.c.l.s8.bf16 %v885_v10 }
 0x26e   : > { %2293 = vmatpush1.bf16.msra.mxu0 %v1688_v19  ;;  %v1712_v19 = vunpack.c.l.s8.bf16 %v852_v16 }
 0x26f   : > { %2334 = vmatpush1.bf16.msra.mxu1 %v1752_v20  ;;  %2294 = vmatprep.subr.bf16.mxu0 %v1693_v25  ;;  %v1776_v20 = vunpack.c.l.s8.bf16 %v884_v17  ;;  %v1717_v25 = vunpack.c.h.s8.bf16 %v853_v11 }
 0x270   : > { %2335 = vmatprep.subr.bf16.mxu1 %v1757_v26  ;;  %v1781_v26 = vunpack.c.h.s8.bf16 %v885_v10 }
 0x272   : > { %2295 = vmatpush1.bf16.msra.mxu0 %v1692_v31  ;;  %v1716_v31 = vunpack.c.h.s8.bf16 %v852_v16 }
 0x273   : > { %2336 = vmatpush1.bf16.msra.mxu1 %v1756_v32  ;;  %2296 = vmatprep.subr.bf16.mxu0 %v1697_v35  ;;  %v1780_v32 = vunpack.c.h.s8.bf16 %v884_v17  ;;  %v408_v35 = vld [vmem:[%s5140_s11 + $0xc0] sm:$0xff] }
 0x274   : > { %2337 = vmatprep.subr.bf16.mxu1 %v1761_v36  ;;  %v410_v36 = vld [vmem:[%s5140_s11 + $0xd0] sm:$0xff] }
 0x276   : > { %2297 = vmatpush1.bf16.msra.mxu0 %v1696_v49  ;;  %v442_v49 = vld [vmem:[%s5147_s30 + $0x10] sm:$0xff] }
 0x277   : > { %2338 = vmatpush1.bf16.msra.mxu1 %v1760_v50  ;;  %2298 = vmatprep.subr.bf16.mxu0 %v1701_v51  ;;  %v474_v50 = vld [vmem:[%s5147_s30 + $0x110] sm:$0xff]  ;;  %v5516_v51 = vpack.c.bf16 %v408_v35, %v408_v35  ;;  %v890_v53 = vunpack.c.l.s8.bf16 %v442_v49  ;;  %v894_v1 = vunpack.c.h.s8.bf16 %v442_v49 }
 0x278   : > { %2339 = vmatprep.subr.bf16.mxu1 %v1765_v52  ;;  %v5518_v52 = vpack.c.bf16 %v410_v36, %v410_v36  ;;  %v954_v54 = vunpack.c.l.s8.bf16 %v474_v50  ;;  %v958_v2 = vunpack.c.h.s8.bf16 %v474_v50  ;;  %v454_v49 = vld [vmem:[%s5147_s30 + $0x70] sm:$0xff] }
 0x279   : > { %v486_v50 = vld [vmem:[%s5147_s30 + $0x170] sm:$0xff] }
 0x27a   : > { %2299 = vmatpush1.bf16.msra.mxu0 %v1700_v55  ;;  %v895_v55 = vunpack.c.h.s8.bf16 %v443_v27 }
 0x27b   : > { %2340 = vmatpush1.bf16.msra.mxu1 %v1764_v56  ;;  %2300 = vmatprep.subr.bf16.mxu0 %v1705_v63  ;;  %v959_v56 = vunpack.c.h.s8.bf16 %v475_v28  ;;  %v447_v63 = vld [vmem:[%s5147_s30 + $0x38] sm:$0xff] }
 0x27c   : > { %2341 = vmatprep.subr.bf16.mxu1 %v1769_v0  ;;  %v479_v0 = vld [vmem:[%s5147_s30 + $0x138] sm:$0xff] }
 0x27e   : > { %2301 = vmatpush1.bf16.msra.mxu0 %v1704_v4  ;;  %v899_v4 = vunpack.c.l.s8.bf16 %v447_v63 }
 0x27f   : > { %2342 = vmatpush1.bf16.msra.mxu1 %v1768_v8  ;;  %2302 = vmatprep.subr.bf16.mxu0 %v1709_v7  ;;  %v963_v8 = vunpack.c.l.s8.bf16 %v479_v0  ;;  %v446_v7 = vld [vmem:[%s5147_s30 + $0x30] sm:$0xff] }
 0x280   : > { %2343 = vmatprep.subr.bf16.mxu1 %v1773_v9  ;;  %v478_v9 = vld [vmem:[%s5147_s30 + $0x130] sm:$0xff]  ;;  %v898_v11 = vunpack.c.l.s8.bf16 %v446_v7  ;;  %v902_v16 = vunpack.c.h.s8.bf16 %v446_v7 }
 0x281   : > { %v962_v10 = vunpack.c.l.s8.bf16 %v478_v9  ;;  %v966_v17 = vunpack.c.h.s8.bf16 %v478_v9 }
 0x282   : > { %2303 = vmatpush1.bf16.msra.mxu0 %v1708_v18  ;;  %v903_v18 = vunpack.c.h.s8.bf16 %v447_v63 }
 0x283   : > { %2344 = vmatpush1.bf16.msra.mxu1 %v1772_v12  ;;  %2304 = vmatprep.subr.bf16.mxu0 %v1713_v13  ;;  %v967_v12 = vunpack.c.h.s8.bf16 %v479_v0  ;;  %v451_v13 = vld [vmem:[%s5147_s30 + $0x58] sm:$0xff] }
 0x284   : > { %2345 = vmatprep.subr.bf16.mxu1 %v1777_v14  ;;  %v483_v14 = vld [vmem:[%s5147_s30 + $0x158] sm:$0xff]  ;;  %v911_v27 = vunpack.c.h.s8.bf16 %v451_v13 }
 0x285   : > { %v975_v28 = vunpack.c.h.s8.bf16 %v483_v14 }
 0x286   : > { %2305 = vmatpush1.bf16.msra.mxu0 %v1712_v19  ;;  %v450_v19 = vld [vmem:[%s5147_s30 + $0x50] sm:$0xff] }
 0x287   : > { %2346 = vmatpush1.bf16.msra.mxu1 %v1776_v20  ;;  %2306 = vmatprep.subr.bf16.mxu0 %v1717_v25  ;;  %v482_v20 = vld [vmem:[%s5147_s30 + $0x150] sm:$0xff]  ;;  %v906_v25 = vunpack.c.l.s8.bf16 %v450_v19  ;;  %v910_v35 = vunpack.c.h.s8.bf16 %v450_v19 }
 0x288   : > { %2347 = vmatprep.subr.bf16.mxu1 %v1781_v26  ;;  %v970_v26 = vunpack.c.l.s8.bf16 %v482_v20  ;;  %v974_v36 = vunpack.c.h.s8.bf16 %v482_v20 }
 0x28a   : > { %2307 = vmatpush1.bf16.msra.mxu0 %v1716_v31  ;;  %v455_v31 = vld [vmem:[%s5147_s30 + $0x78] sm:$0xff] }
 0x28b   : > { %2348 = vmatpush1.bf16.msra.mxu1 %v1780_v32  ;;  %2358 = vmatprep.subr.bf16.mxu0 %v891_v43  ;;  %v487_v32 = vld [vmem:[%s5147_s30 + $0x178] sm:$0xff]  ;;  %v915_v43 = vunpack.c.l.s8.bf16 %v455_v31 }
 0x28c   : > { %2399 = vmatprep.subr.bf16.mxu1 %v955_v44  ;;  %v979_v44 = vunpack.c.l.s8.bf16 %v487_v32 }
 0x28d   : > { %2309 = vmatmul.mubr.bf16.vlgmr.msra.gmra.mrb[24].mxu0 %v5516_v51 }
 0x28e   : > { %2350 = vmatmul.mubr.bf16.vlgmr.msra.gmra.mrb[24].mxu1 %v5518_v52  ;;  %2359 = vmatpush1.bf16.msra.mxu0 %v890_v53 }
 0x28f   : > { %2400 = vmatpush1.bf16.msra.mxu1 %v954_v54  ;;  %2360 = vmatprep.subr.bf16.mxu0 %v895_v55 }
 0x290   : > { %2401 = vmatprep.subr.bf16.mxu1 %v959_v56  ;;  %2390 = vmatprep.mubr.bf16.mxu0 %v5180_v37  ;;  %v907_v37 = vunpack.c.l.s8.bf16 %v451_v13  ;;  %v918_v13 = vunpack.c.h.s8.bf16 %v454_v49 }
 0x291   : > { %2431 = vmatprep.mubr.bf16.mxu1 %v5182_v38  ;;  %v971_v38 = vunpack.c.l.s8.bf16 %v483_v14  ;;  %v982_v14 = vunpack.c.h.s8.bf16 %v486_v50 }
 0x292   : > { %2361 = vmatpush1.bf16.msra.mxu0 %v894_v1 }
 0x293   : > { %2402 = vmatpush1.bf16.msra.mxu1 %v958_v2  ;;  %2362 = vmatprep.subr.bf16.mxu0 %v899_v4  ;;  %v914_v4 = vunpack.c.l.s8.bf16 %v454_v49 }
 0x294   : > { %2403 = vmatprep.subr.bf16.mxu1 %v963_v8  ;;  %v978_v8 = vunpack.c.l.s8.bf16 %v486_v50 }
 0x296   : > { %2363 = vmatpush1.bf16.msra.mxu0 %v898_v11 }
 0x297   : > { %2404 = vmatpush1.bf16.msra.mxu1 %v962_v10  ;;  %2364 = vmatprep.subr.bf16.mxu0 %v903_v18  ;;  %v983_v10 = vunpack.c.h.s8.bf16 %v487_v32 }
 0x298   : > { %2405 = vmatprep.subr.bf16.mxu1 %v967_v12  ;;  %v491_v12 = vld [vmem:[%s5147_s30 + $0x198] sm:$0xff] }
 0x29a   : > { %2365 = vmatpush1.bf16.msra.mxu0 %v902_v16 }
 0x29b   : > { %2406 = vmatpush1.bf16.msra.mxu1 %v966_v17  ;;  %2366 = vmatprep.subr.bf16.mxu0 %v907_v37  ;;  %v987_v17 = vunpack.c.l.s8.bf16 %v491_v12  ;;  %v458_v37 = vld [vmem:[%s5147_s30 + $0x90] sm:$0xff] }
 0x29c   : > { %2407 = vmatprep.subr.bf16.mxu1 %v971_v38  ;;  %v490_v38 = vld [vmem:[%s5147_s30 + $0x190] sm:$0xff]  ;;  %v922_v19 = vunpack.c.l.s8.bf16 %v458_v37 }
 0x29d   : > { %v986_v20 = vunpack.c.l.s8.bf16 %v490_v38  ;;  %v990_v32 = vunpack.c.h.s8.bf16 %v490_v38  ;;  %v502_v38 = vld [vmem:[%s5147_s30 + $0x1f0] sm:$0xff] }
 0x29e   : > { %2367 = vmatpush1.bf16.msra.mxu0 %v906_v25 }
 0x29f   : > { %2408 = vmatpush1.bf16.msra.mxu1 %v970_v26  ;;  %2368 = vmatprep.subr.bf16.mxu0 %v911_v27  ;;  %v991_v26 = vunpack.c.h.s8.bf16 %v491_v12  ;;  %v463_v27 = vld [vmem:[%s5147_s30 + $0xb8] sm:$0xff] }
 0x2a0   : > { %2409 = vmatprep.subr.bf16.mxu1 %v975_v28  ;;  %v2064_v53 = vpop.f32.mrb[12].mxu0  ;;  %v495_v28 = vld [vmem:[%s5147_s30 + $0x1b8] sm:$0xff] }
 0x2a1   : > { %v2105_v54 = vpop.f32.mrb[12].mxu1  ;;  %v2065_v55 = vadd.f32 %v2064_v53, %v5490_v3  ;;  %v2066_v56 = vpop.f32.mrb[13].mxu0  ;;  %v919_v3 = vunpack.c.h.s8.bf16 %v455_v31  ;;  %v926_v31 = vunpack.c.h.s8.bf16 %v458_v37  ;;  %v935_v53 = vunpack.c.h.s8.bf16 %v463_v27  ;;  %v503_v12 = vld [vmem:[%s5147_s30 + $0x1f8] sm:$0xff]  ;;  %v470_v37 = vld [vmem:[%s5147_s30 + $0xf0] sm:$0xff] }
 0x2a2   : > { %v2107_v63 = vpop.f32.mrb[13].mxu1  ;;  %v2067_v0 = vadd.f32 %v2066_v56, %v5492_v15  ;;  %v2068_v1 = vpop.f32.mrb[14].mxu0  ;;  %2369 = vmatpush1.bf16.msra.mxu0 %v910_v35  ;;  %v459_v15 = vld [vmem:[%s5147_s30 + $0x98] sm:$0xff]  ;;  %v931_v35 = vunpack.c.l.s8.bf16 %v463_v27 }
 0x2a3   : > { %v2109_v2 = vpop.f32.mrb[14].mxu1  ;;  %2410 = vmatpush1.bf16.msra.mxu1 %v974_v36  ;;  %v5538_v7 = vadd.f32 %v2105_v54, %v2065_v55  ;;  %v2069_v9 = vpop.f32.mrb[15].mxu0  ;;  %2370 = vmatprep.subr.bf16.mxu0 %v915_v43  ;;  %v923_v16 = vunpack.c.l.s8.bf16 %v459_v15  ;;  %v927_v25 = vunpack.c.h.s8.bf16 %v459_v15  ;;  %v995_v36 = vunpack.c.l.s8.bf16 %v495_v28  ;;  %v462_v43 = vld [vmem:[%s5147_s30 + $0xb0] sm:$0xff]  ;;  %v467_v55 = vld [vmem:[%s5147_s30 + $0xd8] sm:$0xff] }
 0x2a4   : > { %v2110_v11 = vpop.f32.mrb[15].mxu1  ;;  %2411 = vmatprep.subr.bf16.mxu1 %v979_v44  ;;  %v5540_v18 = vadd.f32 %v2107_v63, %v2067_v0  ;;  %v494_v44 = vld [vmem:[%s5147_s30 + $0x1b0] sm:$0xff]  ;;  %v930_v49 = vunpack.c.l.s8.bf16 %v462_v43  ;;  %v999_v54 = vunpack.c.h.s8.bf16 %v495_v28  ;;  %v499_v56 = vld [vmem:[%s5147_s30 + $0x1d8] sm:$0xff]  ;;  %v934_v63 = vunpack.c.h.s8.bf16 %v462_v43 }
 0x2a5   : > { %v994_v50 = vunpack.c.l.s8.bf16 %v494_v44  ;;  %v998_v0 = vunpack.c.h.s8.bf16 %v494_v44  ;;  %v939_v1 = vunpack.c.l.s8.bf16 %v467_v55  ;;  %v1003_v2 = vunpack.c.l.s8.bf16 %v499_v56  ;;  %v471_v15 = vld [vmem:[%s5147_s30 + $0xf8] sm:$0xff]  ;;  %v506_v43 = vld [vmem:[%s5147_s30 + $0x210] sm:$0xff] }
 0x2a6   : > { %2371 = vmatpush1.bf16.msra.mxu0 %v914_v4  ;;  %v466_v4 = vld [vmem:[%s5147_s30 + $0xd0] sm:$0xff]  ;;  %v507_v27 = vld [vmem:[%s5147_s30 + $0x218] sm:$0xff] }
 0x2a7   : > { %2412 = vmatpush1.bf16.msra.mxu1 %v978_v8  ;;  %2372 = vmatprep.subr.bf16.mxu0 %v919_v3  ;;  %v498_v8 = vld [vmem:[%s5147_s30 + $0x1d0] sm:$0xff]  ;;  %v938_v9 = vunpack.c.l.s8.bf16 %v466_v4  ;;  %v943_v3 = vunpack.c.h.s8.bf16 %v467_v55  ;;  %v539_v28 = vld [vmem:[%s5147_s30 + $0x318] sm:$0xff] }
 0x2a8   : > { %2413 = vmatprep.subr.bf16.mxu1 %v983_v10  ;;  %v1002_v11 = vunpack.c.l.s8.bf16 %v498_v8  ;;  %v1007_v10 = vunpack.c.h.s8.bf16 %v499_v56  ;;  %v538_v44 = vld [vmem:[%s5147_s30 + $0x310] sm:$0xff]  ;;  %v511_v55 = vld [vmem:[%s5147_s30 + $0x238] sm:$0xff] }
 0x2a9   : > { %v543_v56 = vld [vmem:[%s5147_s30 + $0x338] sm:$0xff] }
 0x2aa   : > { %2373 = vmatpush1.bf16.msra.mxu0 %v918_v13  ;;  %v942_v13 = vunpack.c.h.s8.bf16 %v466_v4  ;;  %v510_v4 = vld [vmem:[%s5147_s30 + $0x230] sm:$0xff] }
 0x2ab   : > { %2414 = vmatpush1.bf16.msra.mxu1 %v982_v14  ;;  %2374 = vmatprep.subr.bf16.mxu0 %v923_v16  ;;  %v1006_v14 = vunpack.c.h.s8.bf16 %v498_v8  ;;  %v947_v16 = vunpack.c.l.s8.bf16 %v471_v15  ;;  %v542_v8 = vld [vmem:[%s5147_s30 + $0x330] sm:$0xff] }
 0x2ac   : > { %2415 = vmatprep.subr.bf16.mxu1 %v987_v17  ;;  %v1011_v17 = vunpack.c.l.s8.bf16 %v503_v12 }
 0x2ae   : > { %2375 = vmatpush1.bf16.msra.mxu0 %v922_v19  ;;  %v946_v19 = vunpack.c.l.s8.bf16 %v470_v37 }
 0x2af   : > { %2416 = vmatpush1.bf16.msra.mxu1 %v986_v20  ;;  %2376 = vmatprep.subr.bf16.mxu0 %v927_v25  ;;  %v1010_v20 = vunpack.c.l.s8.bf16 %v502_v38  ;;  %v951_v25 = vunpack.c.h.s8.bf16 %v471_v15  ;;  %v1030_v15 = vunpack.c.h.s8.bf16 %v510_v4 }
 0x2b0   : > { %2417 = vmatprep.subr.bf16.mxu1 %v991_v26  ;;  %v1015_v26 = vunpack.c.h.s8.bf16 %v503_v12  ;;  %v1094_v12 = vunpack.c.h.s8.bf16 %v542_v8 }
 0x2b2   : > { %2377 = vmatpush1.bf16.msra.mxu0 %v926_v31  ;;  %v950_v31 = vunpack.c.h.s8.bf16 %v470_v37 }
 0x2b3   : > { %2418 = vmatpush1.bf16.msra.mxu1 %v990_v32  ;;  %2378 = vmatprep.subr.bf16.mxu0 %v931_v35  ;;  %v1014_v32 = vunpack.c.h.s8.bf16 %v502_v38  ;;  %v1019_v35 = vunpack.c.l.s8.bf16 %v507_v27 }
 0x2b4   : > { %2419 = vmatprep.subr.bf16.mxu1 %v995_v36  ;;  %v1083_v36 = vunpack.c.l.s8.bf16 %v539_v28 }
 0x2b6   : > { %2379 = vmatpush1.bf16.msra.mxu0 %v930_v49  ;;  %v1018_v49 = vunpack.c.l.s8.bf16 %v506_v43 }
 0x2b7   : > { %2420 = vmatpush1.bf16.msra.mxu1 %v994_v50  ;;  %2380 = vmatprep.subr.bf16.mxu0 %v935_v53  ;;  %v1082_v50 = vunpack.c.l.s8.bf16 %v538_v44  ;;  %v1023_v53 = vunpack.c.h.s8.bf16 %v507_v27 }
 0x2b8   : > { %2421 = vmatprep.subr.bf16.mxu1 %v999_v54  ;;  %v1087_v54 = vunpack.c.h.s8.bf16 %v539_v28 }
 0x2ba   : > { %2381 = vmatpush1.bf16.msra.mxu0 %v934_v63  ;;  %v1022_v63 = vunpack.c.h.s8.bf16 %v506_v43 }
 0x2bb   : > { %2422 = vmatpush1.bf16.msra.mxu1 %v998_v0  ;;  %2382 = vmatprep.subr.bf16.mxu0 %v939_v1  ;;  %v1086_v0 = vunpack.c.h.s8.bf16 %v538_v44  ;;  %v1027_v1 = vunpack.c.l.s8.bf16 %v511_v55 }
 0x2bc   : > { %2423 = vmatprep.subr.bf16.mxu1 %v1003_v2  ;;  %v1091_v2 = vunpack.c.l.s8.bf16 %v543_v56 }
 0x2be   : > { %2383 = vmatpush1.bf16.msra.mxu0 %v938_v9  ;;  %v1031_v9 = vunpack.c.h.s8.bf16 %v511_v55 }
 0x2bf   : > { %2424 = vmatpush1.bf16.msra.mxu1 %v1002_v11  ;;  %2384 = vmatprep.subr.bf16.mxu0 %v943_v3  ;;  %v1095_v11 = vunpack.c.h.s8.bf16 %v543_v56  ;;  %v515_v3 = vld [vmem:[%s5147_s30 + $0x258] sm:$0xff] }
 0x2c0   : > { %2425 = vmatprep.subr.bf16.mxu1 %v1007_v10  ;;  %v547_v10 = vld [vmem:[%s5147_s30 + $0x358] sm:$0xff]  ;;  %v1039_v37 = vunpack.c.h.s8.bf16 %v515_v3 }
 0x2c1   : > { %v1103_v38 = vunpack.c.h.s8.bf16 %v547_v10 }
 0x2c2   : > { %2385 = vmatpush1.bf16.msra.mxu0 %v942_v13  ;;  %v514_v13 = vld [vmem:[%s5147_s30 + $0x250] sm:$0xff] }
 0x2c3   : > { %2426 = vmatpush1.bf16.msra.mxu1 %v1006_v14  ;;  %2386 = vmatprep.subr.bf16.mxu0 %v947_v16  ;;  %v546_v14 = vld [vmem:[%s5147_s30 + $0x350] sm:$0xff]  ;;  %v1034_v16 = vunpack.c.l.s8.bf16 %v514_v13 }
 0x2c4   : > { %2427 = vmatprep.subr.bf16.mxu1 %v1011_v17  ;;  %v1098_v17 = vunpack.c.l.s8.bf16 %v546_v14 }
 0x2c6   : > { %2387 = vmatpush1.bf16.msra.mxu0 %v946_v19  ;;  %v519_v19 = vld [vmem:[%s5147_s30 + $0x278] sm:$0xff] }
 0x2c7   : > { %2428 = vmatpush1.bf16.msra.mxu1 %v1010_v20  ;;  %2388 = vmatprep.subr.bf16.mxu0 %v951_v25  ;;  %v551_v20 = vld [vmem:[%s5147_s30 + $0x378] sm:$0xff]  ;;  %v1038_v25 = vunpack.c.h.s8.bf16 %v514_v13  ;;  %v1043_v27 = vunpack.c.l.s8.bf16 %v519_v19 }
 0x2c8   : > { %2429 = vmatprep.subr.bf16.mxu1 %v1015_v26  ;;  %v1102_v26 = vunpack.c.h.s8.bf16 %v546_v14  ;;  %v1107_v28 = vunpack.c.l.s8.bf16 %v551_v20  ;;  %v527_v13 = vld [vmem:[%s5147_s30 + $0x2b8] sm:$0xff] }
 0x2c9   : > { %v559_v14 = vld [vmem:[%s5147_s30 + $0x3b8] sm:$0xff] }
 0x2ca   : > { %2389 = vmatpush1.bf16.msra.mxu0 %v950_v31  ;;  %v518_v31 = vld [vmem:[%s5147_s30 + $0x270] sm:$0xff] }
 0x2cb   : > { %2430 = vmatpush1.bf16.msra.mxu1 %v1014_v32  ;;  %2440 = vmatprep.subr.bf16.mxu0 %v1019_v35  ;;  %v550_v32 = vld [vmem:[%s5147_s30 + $0x370] sm:$0xff]  ;;  %v1042_v55 = vunpack.c.l.s8.bf16 %v518_v31 }
 0x2cc   : > { %2481 = vmatprep.subr.bf16.mxu1 %v1083_v36  ;;  %v1106_v56 = vunpack.c.l.s8.bf16 %v550_v32 }
 0x2cd   : > { %2391 = vmatmul.mubr.bf16.vlgmr.msra.gmra.mrb[28].mxu0 %v5212_v47  ;;  %v1026_v47 = vunpack.c.l.s8.bf16 %v510_v4 }
 0x2ce   : > { %2432 = vmatmul.mubr.bf16.vlgmr.msra.gmra.mrb[28].mxu1 %v5214_v48  ;;  %2441 = vmatpush1.bf16.msra.mxu0 %v1018_v49  ;;  %v1090_v48 = vunpack.c.l.s8.bf16 %v542_v8  ;;  %v555_v8 = vld [vmem:[%s5147_s30 + $0x398] sm:$0xff] }
 0x2cf   : > { %2482 = vmatpush1.bf16.msra.mxu1 %v1082_v50  ;;  %2442 = vmatprep.subr.bf16.mxu0 %v1023_v53 }
 0x2d0   : > { %2483 = vmatprep.subr.bf16.mxu1 %v1087_v54  ;;  %2472 = vmatprep.mubr.bf16.mxu0 %v5220_v57  ;;  %v1035_v57 = vunpack.c.l.s8.bf16 %v515_v3  ;;  %v522_v3 = vld [vmem:[%s5147_s30 + $0x290] sm:$0xff] }
 0x2d1   : > { %2513 = vmatprep.mubr.bf16.mxu1 %v5222_v58  ;;  %v1099_v58 = vunpack.c.l.s8.bf16 %v547_v10  ;;  %v554_v10 = vld [vmem:[%s5147_s30 + $0x390] sm:$0xff] }
 0x2d2   : > { %2443 = vmatpush1.bf16.msra.mxu0 %v1022_v63 }
 0x2d3   : > { %2484 = vmatpush1.bf16.msra.mxu1 %v1086_v0  ;;  %2444 = vmatprep.subr.bf16.mxu0 %v1027_v1 }
 0x2d4   : > { %2485 = vmatprep.subr.bf16.mxu1 %v1091_v2  ;;  %v1111_v2 = vunpack.c.h.s8.bf16 %v551_v20  ;;  %v558_v20 = vld [vmem:[%s5147_s30 + $0x3b0] sm:$0xff] }
 0x2d6   : > { %2445 = vmatpush1.bf16.msra.mxu0 %v1026_v47  ;;  %v1046_v47 = vunpack.c.h.s8.bf16 %v518_v31  ;;  %v531_v31 = vld [vmem:[%s5147_s30 + $0x2d8] sm:$0xff] }
 0x2d7   : > { %2486 = vmatpush1.bf16.msra.mxu1 %v1090_v48  ;;  %2446 = vmatprep.subr.bf16.mxu0 %v1031_v9  ;;  %v1110_v48 = vunpack.c.h.s8.bf16 %v550_v32  ;;  %v563_v32 = vld [vmem:[%s5147_s30 + $0x3d8] sm:$0xff] }
 0x2d8   : > { %2487 = vmatprep.subr.bf16.mxu1 %v1095_v11  ;;  %v1115_v11 = vunpack.c.l.s8.bf16 %v555_v8 }
 0x2da   : > { %2447 = vmatpush1.bf16.msra.mxu0 %v1030_v15  ;;  %v1050_v15 = vunpack.c.l.s8.bf16 %v522_v3 }
 0x2db   : > { %2488 = vmatpush1.bf16.msra.mxu1 %v1094_v12  ;;  %2448 = vmatprep.subr.bf16.mxu0 %v1035_v57  ;;  %v1114_v12 = vunpack.c.l.s8.bf16 %v554_v10 }
 0x2dc   : > { %2489 = vmatprep.subr.bf16.mxu1 %v1099_v58  ;;  %v1119_v58 = vunpack.c.h.s8.bf16 %v555_v8 }
 0x2de   : > { %2449 = vmatpush1.bf16.msra.mxu0 %v1034_v16  ;;  %v1054_v16 = vunpack.c.h.s8.bf16 %v522_v3 }
 0x2df   : > { %2490 = vmatpush1.bf16.msra.mxu1 %v1098_v17  ;;  %2450 = vmatprep.subr.bf16.mxu0 %v1039_v37  ;;  %v1118_v17 = vunpack.c.h.s8.bf16 %v554_v10  ;;  %v1059_v37 = vunpack.c.l.s8.bf16 %v527_v13 }
 0x2e0   : > { %2491 = vmatprep.subr.bf16.mxu1 %v1103_v38  ;;  %v2146_v35 = vpop.f32.mrb[16].mxu0  ;;  %v1123_v38 = vunpack.c.l.s8.bf16 %v559_v14 }
 0x2e1   : > { %v2187_v36 = vpop.f32.mrb[16].mxu1  ;;  %v2147_v43 = vadd.f32 %v2146_v35, %v5538_v7  ;;  %v2148_v44 = vpop.f32.mrb[17].mxu0  ;;  %v1047_v7 = vunpack.c.h.s8.bf16 %v519_v19  ;;  %v526_v19 = vld [vmem:[%s5147_s30 + $0x2b0] sm:$0xff] }
 0x2e2   : > { %v2189_v49 = vpop.f32.mrb[17].mxu1  ;;  %v2149_v50 = vadd.f32 %v2148_v44, %v5540_v18  ;;  %v2150_v53 = vpop.f32.mrb[18].mxu0  ;;  %2451 = vmatpush1.bf16.msra.mxu0 %v1038_v25  ;;  %v523_v18 = vld [vmem:[%s5147_s30 + $0x298] sm:$0xff]  ;;  %v1058_v25 = vunpack.c.l.s8.bf16 %v526_v19  ;;  %v1062_v35 = vunpack.c.h.s8.bf16 %v526_v19  ;;  %v1131_v44 = vunpack.c.l.s8.bf16 %v563_v32 }
 0x2e3   : > { %v2191_v54 = vpop.f32.mrb[18].mxu1  ;;  %2492 = vmatpush1.bf16.msra.mxu1 %v1102_v26  ;;  %v5580_v63 = vadd.f32 %v2187_v36, %v2147_v43  ;;  %v2151_v0 = vpop.f32.mrb[19].mxu0  ;;  %2452 = vmatprep.subr.bf16.mxu0 %v1043_v27  ;;  %v1051_v9 = vunpack.c.l.s8.bf16 %v523_v18  ;;  %v1055_v57 = vunpack.c.h.s8.bf16 %v523_v18  ;;  %v1122_v26 = vunpack.c.l.s8.bf16 %v558_v20 }
 0x2e4   : > { %v2192_v1 = vpop.f32.mrb[19].mxu1  ;;  %2493 = vmatprep.subr.bf16.mxu1 %v1107_v28  ;;  %v5582_v4 = vadd.f32 %v2189_v49, %v2149_v50  ;;  %v1063_v27 = vunpack.c.h.s8.bf16 %v527_v13  ;;  %v1127_v28 = vunpack.c.h.s8.bf16 %v559_v14  ;;  %v1126_v36 = vunpack.c.h.s8.bf16 %v558_v20  ;;  %v530_v49 = vld [vmem:[%s5147_s30 + $0x2d0] sm:$0xff]  ;;  %v535_v0 = vld [vmem:[%s5147_s30 + $0x2f8] sm:$0xff] }
 0x2e5   : > { %v1067_v43 = vunpack.c.l.s8.bf16 %v531_v31  ;;  %v562_v50 = vld [vmem:[%s5147_s30 + $0x3d0] sm:$0xff]  ;;  %v1066_v53 = vunpack.c.l.s8.bf16 %v530_v49  ;;  %v567_v1 = vld [vmem:[%s5147_s30 + $0x3f8] sm:$0xff]  ;;  %v1075_v18 = vunpack.c.l.s8.bf16 %v535_v0  ;;  %v1079_v3 = vunpack.c.h.s8.bf16 %v535_v0 }
 0x2e6   : > { %2453 = vmatpush1.bf16.msra.mxu0 %v1042_v55  ;;  %v1130_v54 = vunpack.c.l.s8.bf16 %v562_v50  ;;  %v1071_v55 = vunpack.c.h.s8.bf16 %v531_v31  ;;  %v1139_v8 = vunpack.c.l.s8.bf16 %v567_v1  ;;  %v1143_v10 = vunpack.c.h.s8.bf16 %v567_v1 }
 0x2e7   : > { %2494 = vmatpush1.bf16.msra.mxu1 %v1106_v56  ;;  %2454 = vmatprep.subr.bf16.mxu0 %v1047_v7  ;;  %v1135_v56 = vunpack.c.h.s8.bf16 %v563_v32  ;;  %v1070_v7 = vunpack.c.h.s8.bf16 %v530_v49  ;;  %v579_v49 = vld [vmem:[%s5147_s30 + $0x458] sm:$0xff] }
 0x2e8   : > { %2495 = vmatprep.subr.bf16.mxu1 %v1111_v2  ;;  %v1134_v2 = vunpack.c.h.s8.bf16 %v562_v50  ;;  %v611_v50 = vld [vmem:[%s5147_s30 + $0x558] sm:$0xff] }
 0x2ea   : > { %2455 = vmatpush1.bf16.msra.mxu0 %v1046_v47  ;;  %v534_v47 = vld [vmem:[%s5147_s30 + $0x2f0] sm:$0xff] }
 0x2eb   : > { %2496 = vmatpush1.bf16.msra.mxu1 %v1110_v48  ;;  %2456 = vmatprep.subr.bf16.mxu0 %v1051_v9  ;;  %v566_v48 = vld [vmem:[%s5147_s30 + $0x3f0] sm:$0xff]  ;;  %v1074_v9 = vunpack.c.l.s8.bf16 %v534_v47 }
 0x2ec   : > { %2497 = vmatprep.subr.bf16.mxu1 %v1115_v11  ;;  %v1138_v11 = vunpack.c.l.s8.bf16 %v566_v48 }
 0x2ee   : > { %2457 = vmatpush1.bf16.msra.mxu0 %v1050_v15  ;;  %v571_v15 = vld [vmem:[%s5147_s30 + $0x418] sm:$0xff] }
 0x2ef   : > { %2498 = vmatpush1.bf16.msra.mxu1 %v1114_v12  ;;  %2458 = vmatprep.subr.bf16.mxu0 %v1055_v57  ;;  %v603_v12 = vld [vmem:[%s5147_s30 + $0x518] sm:$0xff]  ;;  %v1078_v57 = vunpack.c.h.s8.bf16 %v534_v47  ;;  %v1147_v13 = vunpack.c.l.s8.bf16 %v571_v15  ;;  %v1151_v19 = vunpack.c.h.s8.bf16 %v571_v15 }
 0x2f0   : > { %2499 = vmatprep.subr.bf16.mxu1 %v1119_v58  ;;  %v1142_v58 = vunpack.c.h.s8.bf16 %v566_v48  ;;  %v1211_v14 = vunpack.c.l.s8.bf16 %v603_v12  ;;  %v1215_v20 = vunpack.c.h.s8.bf16 %v603_v12 }
 0x2f2   : > { %2459 = vmatpush1.bf16.msra.mxu0 %v1054_v16  ;;  %v570_v16 = vld [vmem:[%s5147_s30 + $0x410] sm:$0xff] }
 0x2f3   : > { %2500 = vmatpush1.bf16.msra.mxu1 %v1118_v17  ;;  %2460 = vmatprep.subr.bf16.mxu0 %v1059_v37  ;;  %v602_v17 = vld [vmem:[%s5147_s30 + $0x510] sm:$0xff]  ;;  %v1146_v37 = vunpack.c.l.s8.bf16 %v570_v16 }
 0x2f4   : > { %2501 = vmatprep.subr.bf16.mxu1 %v1123_v38  ;;  %v1210_v38 = vunpack.c.l.s8.bf16 %v602_v17 }
 0x2f6   : > { %2461 = vmatpush1.bf16.msra.mxu0 %v1058_v25  ;;  %v575_v25 = vld [vmem:[%s5147_s30 + $0x438] sm:$0xff] }
 0x2f7   : > { %2502 = vmatpush1.bf16.msra.mxu1 %v1122_v26  ;;  %2462 = vmatprep.subr.bf16.mxu0 %v1063_v27  ;;  %v607_v26 = vld [vmem:[%s5147_s30 + $0x538] sm:$0xff]  ;;  %v1150_v27 = vunpack.c.h.s8.bf16 %v570_v16  ;;  %v1155_v31 = vunpack.c.l.s8.bf16 %v575_v25 }
 0x2f8   : > { %2503 = vmatprep.subr.bf16.mxu1 %v1127_v28  ;;  %v1214_v28 = vunpack.c.h.s8.bf16 %v602_v17  ;;  %v1219_v32 = vunpack.c.l.s8.bf16 %v607_v26 }
 0x2fa   : > { %2463 = vmatpush1.bf16.msra.mxu0 %v1062_v35  ;;  %v574_v35 = vld [vmem:[%s5147_s30 + $0x430] sm:$0xff] }
 0x2fb   : > { %2504 = vmatpush1.bf16.msra.mxu1 %v1126_v36  ;;  %2464 = vmatprep.subr.bf16.mxu0 %v1067_v43  ;;  %v606_v36 = vld [vmem:[%s5147_s30 + $0x530] sm:$0xff]  ;;  %v1159_v43 = vunpack.c.h.s8.bf16 %v575_v25 }
 0x2fc   : > { %2505 = vmatprep.subr.bf16.mxu1 %v1131_v44  ;;  %v1223_v44 = vunpack.c.h.s8.bf16 %v607_v26 }
 0x2fe   : > { %2465 = vmatpush1.bf16.msra.mxu0 %v1066_v53  ;;  %v1158_v53 = vunpack.c.h.s8.bf16 %v574_v35 }
 0x2ff   : > { %2506 = vmatpush1.bf16.msra.mxu1 %v1130_v54  ;;  %2466 = vmatprep.subr.bf16.mxu0 %v1071_v55  ;;  %v1222_v54 = vunpack.c.h.s8.bf16 %v606_v36  ;;  %v578_v55 = vld [vmem:[%s5147_s30 + $0x450] sm:$0xff] }
 0x300   : > { %2507 = vmatprep.subr.bf16.mxu1 %v1135_v56  ;;  %v610_v56 = vld [vmem:[%s5147_s30 + $0x550] sm:$0xff]  ;;  %v1162_v0 = vunpack.c.l.s8.bf16 %v578_v55  ;;  %v1166_v47 = vunpack.c.h.s8.bf16 %v578_v55 }
 0x301   : > { %v1226_v1 = vunpack.c.l.s8.bf16 %v610_v56  ;;  %v1230_v48 = vunpack.c.h.s8.bf16 %v610_v56 }
 0x302   : > { %2467 = vmatpush1.bf16.msra.mxu0 %v1070_v7  ;;  %v1167_v7 = vunpack.c.h.s8.bf16 %v579_v49 }
 0x303   : > { %2508 = vmatpush1.bf16.msra.mxu1 %v1134_v2  ;;  %2468 = vmatprep.subr.bf16.mxu0 %v1075_v18  ;;  %v1231_v2 = vunpack.c.h.s8.bf16 %v611_v50  ;;  %v583_v18 = vld [vmem:[%s5147_s30 + $0x478] sm:$0xff] }
 0x304   : > { %2509 = vmatprep.subr.bf16.mxu1 %v1139_v8  ;;  %v615_v8 = vld [vmem:[%s5147_s30 + $0x578] sm:$0xff] }
 0x305   : > { %v1239_v26 = vunpack.c.h.s8.bf16 %v615_v8 }
 0x306   : > { %2469 = vmatpush1.bf16.msra.mxu0 %v1074_v9  ;;  %v1171_v9 = vunpack.c.l.s8.bf16 %v583_v18 }
 0x307   : > { %2510 = vmatpush1.bf16.msra.mxu1 %v1138_v11  ;;  %2470 = vmatprep.subr.bf16.mxu0 %v1079_v3  ;;  %v1235_v11 = vunpack.c.l.s8.bf16 %v615_v8  ;;  %v582_v3 = vld [vmem:[%s5147_s30 + $0x470] sm:$0xff] }
 0x308   : > { %2511 = vmatprep.subr.bf16.mxu1 %v1143_v10  ;;  %v614_v10 = vld [vmem:[%s5147_s30 + $0x570] sm:$0xff] }
 0x30a   : > { %2471 = vmatpush1.bf16.msra.mxu0 %v1078_v57 }
 0x30b   : > { %2512 = vmatpush1.bf16.msra.mxu1 %v1142_v58  ;;  %2522 = vmatprep.subr.bf16.mxu0 %v1147_v13 }
 0x30c   : > { %2563 = vmatprep.subr.bf16.mxu1 %v1211_v14 }
 0x30d   : > { %2473 = vmatmul.mubr.bf16.vlgmr.msra.gmra.mrb[32].mxu0 %v5260_v29  ;;  %v1154_v29 = vunpack.c.l.s8.bf16 %v574_v35 }
 0x30e   : > { %2514 = vmatmul.mubr.bf16.vlgmr.msra.gmra.mrb[32].mxu1 %v5262_v30  ;;  %2523 = vmatpush1.bf16.msra.mxu0 %v1146_v37  ;;  %v1218_v30 = vunpack.c.l.s8.bf16 %v606_v36  ;;  %v1170_v37 = vunpack.c.l.s8.bf16 %v582_v3 }
 0x30f   : > { %2564 = vmatpush1.bf16.msra.mxu1 %v1210_v38  ;;  %2524 = vmatprep.subr.bf16.mxu0 %v1151_v19  ;;  %v1234_v38 = vunpack.c.l.s8.bf16 %v614_v10 }
 0x310   : > { %2565 = vmatprep.subr.bf16.mxu1 %v1215_v20  ;;  %2554 = vmatprep.mubr.bf16.mxu0 %v5268_v41  ;;  %v1163_v41 = vunpack.c.l.s8.bf16 %v579_v49 }
 0x311   : > { %2595 = vmatprep.mubr.bf16.mxu1 %v5270_v42  ;;  %v1227_v42 = vunpack.c.l.s8.bf16 %v611_v50 }
 0x312   : > { %2525 = vmatpush1.bf16.msra.mxu0 %v1150_v27 }
 0x313   : > { %2566 = vmatpush1.bf16.msra.mxu1 %v1214_v28  ;;  %2526 = vmatprep.subr.bf16.mxu0 %v1155_v31  ;;  %v619_v28 = vld [vmem:[%s5147_s30 + $0x598] sm:$0xff]  ;;  %v1174_v31 = vunpack.c.h.s8.bf16 %v582_v3 }
 0x314   : > { %2567 = vmatprep.subr.bf16.mxu1 %v1219_v32  ;;  %v1238_v32 = vunpack.c.h.s8.bf16 %v614_v10  ;;  %v1243_v36 = vunpack.c.l.s8.bf16 %v619_v28  ;;  %v1247_v50 = vunpack.c.h.s8.bf16 %v619_v28 }
 0x316   : > { %2527 = vmatpush1.bf16.msra.mxu0 %v1154_v29  ;;  %v586_v29 = vld [vmem:[%s5147_s30 + $0x490] sm:$0xff] }
 0x317   : > { %2568 = vmatpush1.bf16.msra.mxu1 %v1218_v30  ;;  %2528 = vmatprep.subr.bf16.mxu0 %v1159_v43  ;;  %v618_v30 = vld [vmem:[%s5147_s30 + $0x590] sm:$0xff]  ;;  %v1178_v43 = vunpack.c.l.s8.bf16 %v586_v29 }
 0x318   : > { %2569 = vmatprep.subr.bf16.mxu1 %v1223_v44  ;;  %v1242_v44 = vunpack.c.l.s8.bf16 %v618_v30 }
 0x31a   : > { %2529 = vmatpush1.bf16.msra.mxu0 %v1158_v53  ;;  %v591_v53 = vld [vmem:[%s5147_s30 + $0x4b8] sm:$0xff] }
 0x31b   : > { %2570 = vmatpush1.bf16.msra.mxu1 %v1222_v54  ;;  %2530 = vmatprep.subr.bf16.mxu0 %v1163_v41  ;;  %v623_v54 = vld [vmem:[%s5147_s30 + $0x5b8] sm:$0xff]  ;;  %v1182_v41 = vunpack.c.h.s8.bf16 %v586_v29  ;;  %v1187_v55 = vunpack.c.l.s8.bf16 %v591_v53 }
 0x31c   : > { %2571 = vmatprep.subr.bf16.mxu1 %v1227_v42  ;;  %v1246_v42 = vunpack.c.h.s8.bf16 %v618_v30  ;;  %v1251_v56 = vunpack.c.l.s8.bf16 %v623_v54  ;;  %v1255_v8 = vunpack.c.h.s8.bf16 %v623_v54 }
 0x31e   : > { %2531 = vmatpush1.bf16.msra.mxu0 %v1162_v0  ;;  %v590_v0 = vld [vmem:[%s5147_s30 + $0x4b0] sm:$0xff] }
 0x31f   : > { %2572 = vmatpush1.bf16.msra.mxu1 %v1226_v1  ;;  %2532 = vmatprep.subr.bf16.mxu0 %v1167_v7  ;;  %v622_v1 = vld [vmem:[%s5147_s30 + $0x5b0] sm:$0xff]  ;;  %v1186_v7 = vunpack.c.l.s8.bf16 %v590_v0 }
 0x320   : > { %2573 = vmatprep.subr.bf16.mxu1 %v1231_v2  ;;  %v2228_v15 = vpop.f32.mrb[20].mxu0  ;;  %v1250_v2 = vunpack.c.l.s8.bf16 %v622_v1 }
 0x321   : > { %v2269_v12 = vpop.f32.mrb[20].mxu1  ;;  %v2229_v57 = vadd.f32 %v2228_v15, %v5580_v63  ;;  %v2230_v58 = vpop.f32.mrb[21].mxu0  ;;  %v1175_v63 = vunpack.c.h.s8.bf16 %v583_v18  ;;  %v1191_v18 = vunpack.c.h.s8.bf16 %v591_v53  ;;  %v594_v15 = vld [vmem:[%s5147_s30 + $0x4d0] sm:$0xff] }
 0x322   : > { %v2271_v13 = vpop.f32.mrb[21].mxu1  ;;  %v2231_v14 = vadd.f32 %v2230_v58, %v5582_v4  ;;  %v2232_v16 = vpop.f32.mrb[22].mxu0  ;;  %2533 = vmatpush1.bf16.msra.mxu0 %v1166_v47  ;;  %v587_v4 = vld [vmem:[%s5147_s30 + $0x498] sm:$0xff] }
 0x323   : > { %v2273_v17 = vpop.f32.mrb[22].mxu1  ;;  %2574 = vmatpush1.bf16.msra.mxu1 %v1230_v48  ;;  %v5622_v19 = vadd.f32 %v2269_v12, %v2229_v57  ;;  %v2233_v20 = vpop.f32.mrb[23].mxu0  ;;  %2534 = vmatprep.subr.bf16.mxu0 %v1171_v9  ;;  %v1179_v35 = vunpack.c.l.s8.bf16 %v587_v4  ;;  %v1183_v49 = vunpack.c.h.s8.bf16 %v587_v4  ;;  %v595_v47 = vld [vmem:[%s5147_s30 + $0x4d8] sm:$0xff]  ;;  %v1190_v9 = vunpack.c.h.s8.bf16 %v590_v0  ;;  %v626_v12 = vld [vmem:[%s5147_s30 + $0x5d0] sm:$0xff] }
 0x324   : > { %v2274_v25 = vpop.f32.mrb[23].mxu1  ;;  %2575 = vmatprep.subr.bf16.mxu1 %v1235_v11  ;;  %v5624_v27 = vadd.f32 %v2271_v13, %v2231_v14  ;;  %v627_v48 = vld [vmem:[%s5147_s30 + $0x5d8] sm:$0xff]  ;;  %v1254_v11 = vunpack.c.h.s8.bf16 %v622_v1  ;;  %v1195_v3 = vunpack.c.l.s8.bf16 %v595_v47  ;;  %v1194_v57 = vunpack.c.l.s8.bf16 %v594_v15 }
 0x325   : > { %v1259_v10 = vunpack.c.l.s8.bf16 %v627_v48  ;;  %v1258_v58 = vunpack.c.l.s8.bf16 %v626_v12  ;;  %v1199_v13 = vunpack.c.h.s8.bf16 %v595_v47  ;;  %v1263_v14 = vunpack.c.h.s8.bf16 %v627_v48  ;;  %v599_v16 = vld [vmem:[%s5147_s30 + $0x4f8] sm:$0xff] }
 0x326   : > { %2535 = vmatpush1.bf16.msra.mxu0 %v1170_v37  ;;  %v631_v17 = vld [vmem:[%s5147_s30 + $0x5f8] sm:$0xff]  ;;  %v1198_v37 = vunpack.c.h.s8.bf16 %v594_v15  ;;  %v1203_v20 = vunpack.c.l.s8.bf16 %v599_v16  ;;  %v642_v15 = vld [vmem:[%s5147_s30 + $0x650] sm:$0xff] }
 0x327   : > { %2576 = vmatpush1.bf16.msra.mxu1 %v1234_v38  ;;  %2536 = vmatprep.subr.bf16.mxu0 %v1175_v63  ;;  %v1262_v38 = vunpack.c.h.s8.bf16 %v626_v12  ;;  %v1267_v25 = vunpack.c.l.s8.bf16 %v631_v17  ;;  %v598_v63 = vld [vmem:[%s5147_s30 + $0x4f0] sm:$0xff] }
 0x328   : > { %2577 = vmatprep.subr.bf16.mxu1 %v1239_v26  ;;  %v630_v26 = vld [vmem:[%s5147_s30 + $0x5f0] sm:$0xff]  ;;  %v1202_v4 = vunpack.c.l.s8.bf16 %v598_v63  ;;  %v1206_v29 = vunpack.c.h.s8.bf16 %v598_v63 }
 0x329   : > { %v1266_v28 = vunpack.c.l.s8.bf16 %v630_v26  ;;  %v1270_v30 = vunpack.c.h.s8.bf16 %v630_v26  ;;  %v674_v12 = vld [vmem:[%s5147_s30 + $0x750] sm:$0xff] }
 0x32a   : > { %2537 = vmatpush1.bf16.msra.mxu0 %v1174_v31  ;;  %v1207_v31 = vunpack.c.h.s8.bf16 %v599_v16  ;;  %v647_v16 = vld [vmem:[%s5147_s30 + $0x678] sm:$0xff]  ;;  %v646_v63 = vld [vmem:[%s5147_s30 + $0x670] sm:$0xff] }
 0x32b   : > { %2578 = vmatpush1.bf16.msra.mxu1 %v1238_v32  ;;  %2538 = vmatprep.subr.bf16.mxu0 %v1179_v35  ;;  %v1271_v32 = vunpack.c.h.s8.bf16 %v631_v17  ;;  %v635_v35 = vld [vmem:[%s5147_s30 + $0x618] sm:$0xff]  ;;  %v678_v26 = vld [vmem:[%s5147_s30 + $0x770] sm:$0xff] }
 0x32c   : > { %2579 = vmatprep.subr.bf16.mxu1 %v1243_v36  ;;  %v667_v36 = vld [vmem:[%s5147_s30 + $0x718] sm:$0xff] }
 0x32d   : > { %v679_v17 = vld [vmem:[%s5147_s30 + $0x778] sm:$0xff] }
 0x32e   : > { %2539 = vmatpush1.bf16.msra.mxu0 %v1178_v43  ;;  %v1275_v43 = vunpack.c.l.s8.bf16 %v635_v35 }
 0x32f   : > { %2580 = vmatpush1.bf16.msra.mxu1 %v1242_v44  ;;  %2540 = vmatprep.subr.bf16.mxu0 %v1183_v49  ;;  %v1339_v44 = vunpack.c.l.s8.bf16 %v667_v36  ;;  %v634_v49 = vld [vmem:[%s5147_s30 + $0x610] sm:$0xff] }
 0x330   : > { %2581 = vmatprep.subr.bf16.mxu1 %v1247_v50  ;;  %v666_v50 = vld [vmem:[%s5147_s30 + $0x710] sm:$0xff]  ;;  %v1274_v53 = vunpack.c.l.s8.bf16 %v634_v49  ;;  %v1278_v0 = vunpack.c.h.s8.bf16 %v634_v49  ;;  %v1362_v49 = vunpack.c.l.s8.bf16 %v678_v26 }
 0x331   : > { %v1338_v54 = vunpack.c.l.s8.bf16 %v666_v50  ;;  %v1342_v1 = vunpack.c.h.s8.bf16 %v666_v50 }
 0x332   : > { %2541 = vmatpush1.bf16.msra.mxu0 %v1182_v41  ;;  %v1279_v41 = vunpack.c.h.s8.bf16 %v635_v35 }
 0x333   : > { %2582 = vmatpush1.bf16.msra.mxu1 %v1246_v42  ;;  %2542 = vmatprep.subr.bf16.mxu0 %v1187_v55  ;;  %v1343_v42 = vunpack.c.h.s8.bf16 %v667_v36  ;;  %v639_v55 = vld [vmem:[%s5147_s30 + $0x638] sm:$0xff]  ;;  %v380_v36 = vld [vmem:[#allocation13] sm:$0xff] }
 0x334   : > { %2583 = vmatprep.subr.bf16.mxu1 %v1251_v56  ;;  %v671_v56 = vld [vmem:[%s5147_s30 + $0x738] sm:$0xff]  ;;  %v1287_v47 = vunpack.c.h.s8.bf16 %v639_v55 }
 0x335   : > { %v1351_v48 = vunpack.c.h.s8.bf16 %v671_v56 }
 0x336   : > { %2543 = vmatpush1.bf16.msra.mxu0 %v1186_v7  ;;  %v1283_v7 = vunpack.c.l.s8.bf16 %v639_v55 }
 0x337   : > { %2584 = vmatpush1.bf16.msra.mxu1 %v1250_v2  ;;  %2544 = vmatprep.subr.bf16.mxu0 %v1191_v18  ;;  %v1347_v2 = vunpack.c.l.s8.bf16 %v671_v56  ;;  %v638_v18 = vld [vmem:[%s5147_s30 + $0x630] sm:$0xff]  ;;  %v683_v56 = vld [vmem:[%s5147_s30 + $0x798] sm:$0xff] }
 0x338   : > { %2585 = vmatprep.subr.bf16.mxu1 %v1255_v8  ;;  %v670_v8 = vld [vmem:[%s5147_s30 + $0x730] sm:$0xff] }
 0x33a   : > { %2545 = vmatpush1.bf16.msra.mxu0 %v1190_v9  ;;  %v643_v9 = vld [vmem:[%s5147_s30 + $0x658] sm:$0xff] }
 0x33b   : > { %2586 = vmatpush1.bf16.msra.mxu1 %v1254_v11  ;;  %2546 = vmatprep.subr.bf16.mxu0 %v1195_v3  ;;  %v675_v11 = vld [vmem:[%s5147_s30 + $0x758] sm:$0xff]  ;;  %v1286_v3 = vunpack.c.h.s8.bf16 %v638_v18 }
 0x33c   : > { %2587 = vmatprep.subr.bf16.mxu1 %v1259_v10  ;;  %v1350_v10 = vunpack.c.h.s8.bf16 %v670_v8 }
 0x33e   : > { %2547 = vmatpush1.bf16.msra.mxu0 %v1194_v57  ;;  %v1290_v57 = vunpack.c.l.s8.bf16 %v642_v15 }
 0x33f   : > { %2588 = vmatpush1.bf16.msra.mxu1 %v1258_v58  ;;  %2548 = vmatprep.subr.bf16.mxu0 %v1199_v13  ;;  %v1354_v58 = vunpack.c.l.s8.bf16 %v674_v12  ;;  %v1295_v13 = vunpack.c.h.s8.bf16 %v643_v9 }
 0x340   : > { %2589 = vmatprep.subr.bf16.mxu1 %v1263_v14  ;;  %v1359_v14 = vunpack.c.h.s8.bf16 %v675_v11 }
 0x342   : > { %2549 = vmatpush1.bf16.msra.mxu0 %v1198_v37  ;;  %v1294_v37 = vunpack.c.h.s8.bf16 %v642_v15 }
 0x343   : > { %2590 = vmatpush1.bf16.msra.mxu1 %v1262_v38  ;;  %2550 = vmatprep.subr.bf16.mxu0 %v1203_v20  ;;  %v1358_v38 = vunpack.c.h.s8.bf16 %v674_v12  ;;  %v1299_v20 = vunpack.c.l.s8.bf16 %v647_v16 }
 0x344   : > { %2591 = vmatprep.subr.bf16.mxu1 %v1267_v25  ;;  %v1363_v25 = vunpack.c.l.s8.bf16 %v679_v17 }
 0x346   : > { %2551 = vmatpush1.bf16.msra.mxu0 %v1202_v4 }
 0x347   : > { %2592 = vmatpush1.bf16.msra.mxu1 %v1266_v28  ;;  %2552 = vmatprep.subr.bf16.mxu0 %v1207_v31 }
 0x348   : > { %2593 = vmatprep.subr.bf16.mxu1 %v1271_v32 }
 0x34a   : > { %2553 = vmatpush1.bf16.msra.mxu0 %v1206_v29 }
 0x34b   : > { %2594 = vmatpush1.bf16.msra.mxu1 %v1270_v30  ;;  %2604 = vmatprep.subr.bf16.mxu0 %v1275_v43 }
 0x34c   : > { %2645 = vmatprep.subr.bf16.mxu1 %v1339_v44  ;;  %v1298_v44 = vunpack.c.l.s8.bf16 %v646_v63 }
 0x34d   : > { %2555 = vmatmul.mubr.bf16.vlgmr.msra.gmra.mrb[36].mxu0 %v5308_v21  ;;  %v1282_v21 = vunpack.c.l.s8.bf16 %v638_v18 }
 0x34e   : > { %2596 = vmatmul.mubr.bf16.vlgmr.msra.gmra.mrb[36].mxu1 %v5310_v22  ;;  %2605 = vmatpush1.bf16.msra.mxu0 %v1274_v53  ;;  %v1346_v22 = vunpack.c.l.s8.bf16 %v670_v8  ;;  %v381_v53 = vld [vmem:[#allocation13 + $0x8] sm:$0xff]  ;;  %v1371_v8 = vunpack.c.l.s8.bf16 %v683_v56 }
 0x34f   : > { %2646 = vmatpush1.bf16.msra.mxu1 %v1338_v54  ;;  %2606 = vmatprep.subr.bf16.mxu0 %v1279_v41 }
 0x350   : > { %2647 = vmatprep.subr.bf16.mxu1 %v1343_v42  ;;  %2636 = vmatprep.mubr.bf16.mxu0 %v5316_v33  ;;  %v1291_v33 = vunpack.c.l.s8.bf16 %v643_v9  ;;  %v1367_v42 = vunpack.c.h.s8.bf16 %v679_v17 }
 0x351   : > { %2677 = vmatprep.mubr.bf16.mxu1 %v5318_v34  ;;  %v1355_v34 = vunpack.c.l.s8.bf16 %v675_v11  ;;  %v1375_v11 = vunpack.c.h.s8.bf16 %v683_v56  ;;  %v731_v56 = vld [vmem:[%s5147_s30 + $0x918] sm:$0xff] }
 0x352   : > { %2607 = vmatpush1.bf16.msra.mxu0 %v1278_v0 }
 0x353   : > { %2648 = vmatpush1.bf16.msra.mxu1 %v1342_v1  ;;  %2608 = vmatprep.subr.bf16.mxu0 %v1283_v7  ;;  %v1302_v7 = vunpack.c.h.s8.bf16 %v646_v63 }
 0x354   : > { %2649 = vmatprep.subr.bf16.mxu1 %v1347_v2  ;;  %v1366_v2 = vunpack.c.h.s8.bf16 %v678_v26 }
 0x356   : > { %2609 = vmatpush1.bf16.msra.mxu0 %v1282_v21  ;;  %v650_v21 = vld [vmem:[%s5147_s30 + $0x690] sm:$0xff] }
 0x357   : > { %2650 = vmatpush1.bf16.msra.mxu1 %v1346_v22  ;;  %2610 = vmatprep.subr.bf16.mxu0 %v1287_v47  ;;  %v682_v22 = vld [vmem:[%s5147_s30 + $0x790] sm:$0xff]  ;;  %v1306_v47 = vunpack.c.l.s8.bf16 %v650_v21 }
 0x358   : > { %2651 = vmatprep.subr.bf16.mxu1 %v1351_v48  ;;  %v1370_v48 = vunpack.c.l.s8.bf16 %v682_v22 }
 0x35a   : > { %2611 = vmatpush1.bf16.msra.mxu0 %v1286_v3  ;;  %v655_v3 = vld [vmem:[%s5147_s30 + $0x6b8] sm:$0xff] }
 0x35b   : > { %2652 = vmatpush1.bf16.msra.mxu1 %v1350_v10  ;;  %2612 = vmatprep.subr.bf16.mxu0 %v1291_v33  ;;  %v687_v10 = vld [vmem:[%s5147_s30 + $0x7b8] sm:$0xff]  ;;  %v1310_v33 = vunpack.c.h.s8.bf16 %v650_v21  ;;  %v1315_v15 = vunpack.c.l.s8.bf16 %v655_v3 }
 0x35c   : > { %2653 = vmatprep.subr.bf16.mxu1 %v1355_v34  ;;  %v1374_v34 = vunpack.c.h.s8.bf16 %v682_v22  ;;  %v1379_v12 = vunpack.c.l.s8.bf16 %v687_v10  ;;  %v1383_v17 = vunpack.c.h.s8.bf16 %v687_v10 }
 0x35e   : > { %2613 = vmatpush1.bf16.msra.mxu0 %v1290_v57  ;;  %v654_v57 = vld [vmem:[%s5147_s30 + $0x6b0] sm:$0xff] }
 0x35f   : > { %2654 = vmatpush1.bf16.msra.mxu1 %v1354_v58  ;;  %2614 = vmatprep.subr.bf16.mxu0 %v1295_v13  ;;  %v686_v58 = vld [vmem:[%s5147_s30 + $0x7b0] sm:$0xff]  ;;  %v1314_v13 = vunpack.c.l.s8.bf16 %v654_v57 }
 0x360   : > { %2655 = vmatprep.subr.bf16.mxu1 %v1359_v14  ;;  %v2310_v4 = vpop.f32.mrb[24].mxu0  ;;  %v1378_v14 = vunpack.c.l.s8.bf16 %v686_v58 }
 0x361   : > { %v2351_v28 = vpop.f32.mrb[24].mxu1  ;;  %v2311_v31 = vadd.f32 %v2310_v4, %v5622_v19  ;;  %v2312_v32 = vpop.f32.mrb[25].mxu0  ;;  %v1303_v19 = vunpack.c.h.s8.bf16 %v647_v16  ;;  %v1319_v16 = vunpack.c.h.s8.bf16 %v655_v3  ;;  %v658_v4 = vld [vmem:[%s5147_s30 + $0x6d0] sm:$0xff] }
 0x362   : > { %v2353_v35 = vpop.f32.mrb[25].mxu1  ;;  %v2313_v29 = vadd.f32 %v2312_v32, %v5624_v27  ;;  %v2314_v30 = vpop.f32.mrb[26].mxu0  ;;  %2615 = vmatpush1.bf16.msra.mxu0 %v1294_v37  ;;  %v651_v27 = vld [vmem:[%s5147_s30 + $0x698] sm:$0xff] }
 0x363   : > { %v2355_v43 = vpop.f32.mrb[26].mxu1  ;;  %2656 = vmatpush1.bf16.msra.mxu1 %v1358_v38  ;;  %v2352_v50 = vadd.f32 %v2351_v28, %v2311_v31  ;;  %v2315_v54 = vpop.f32.mrb[27].mxu0  ;;  %2616 = vmatprep.subr.bf16.mxu0 %v1299_v20  ;;  %v1307_v18 = vunpack.c.l.s8.bf16 %v651_v27  ;;  %v1311_v9 = vunpack.c.h.s8.bf16 %v651_v27  ;;  %v659_v37 = vld [vmem:[%s5147_s30 + $0x6d8] sm:$0xff]  ;;  %v1318_v20 = vunpack.c.h.s8.bf16 %v654_v57  ;;  %v690_v28 = vld [vmem:[%s5147_s30 + $0x7d0] sm:$0xff] }
 0x364   : > { %v2356_v41 = vpop.f32.mrb[27].mxu1  ;;  %2657 = vmatprep.subr.bf16.mxu1 %v1363_v25  ;;  %v2354_v55 = vadd.f32 %v2353_v35, %v2313_v29  ;;  %v691_v38 = vld [vmem:[%s5147_s30 + $0x7d8] sm:$0xff]  ;;  %v1382_v25 = vunpack.c.h.s8.bf16 %v686_v58  ;;  %v1323_v63 = vunpack.c.l.s8.bf16 %v659_v37  ;;  %v1322_v31 = vunpack.c.l.s8.bf16 %v658_v4  ;;  %v694_v54 = vld [vmem:[%s5147_s30 + $0x7f0] sm:$0xff] }
 0x365   : > { %v2932_v0 = vadd.f32 %v2352_v50, %v380_v36  ;;  %v1387_v26 = vunpack.c.l.s8.bf16 %v691_v38  ;;  %v1386_v32 = vunpack.c.l.s8.bf16 %v690_v28  ;;  %v1327_v35 = vunpack.c.h.s8.bf16 %v659_v37  ;;  %v663_v29 = vld [vmem:[%s5147_s30 + $0x6f8] sm:$0xff]  ;;  %v706_v37 = vld [vmem:[%s5147_s30 + $0x850] sm:$0xff] }
 0x366   : > { %v2933_v1 = vadd.f32 %v2354_v55, %v381_v53  ;;  %2617 = vmatpush1.bf16.msra.mxu0 %v1298_v44  ;;  %v1391_v36 = vunpack.c.h.s8.bf16 %v691_v38  ;;  %v695_v30 = vld [vmem:[%s5147_s30 + $0x7f8] sm:$0xff]  ;;  %v1326_v43 = vunpack.c.h.s8.bf16 %v658_v4  ;;  %v1390_v44 = vunpack.c.h.s8.bf16 %v690_v28  ;;  %v662_v53 = vld [vmem:[%s5147_s30 + $0x6f0] sm:$0xff] }
 0x367   : > { %2658 = vmatpush1.bf16.msra.mxu1 %v1362_v49  ;;  %2936 = vst [vmem:[#allocation13] sm:$0xff] %v2932_v0  ;;  %2618 = vmatprep.subr.bf16.mxu0 %v1303_v19  ;;  %v1331_v49 = vunpack.c.l.s8.bf16 %v663_v29  ;;  %v1395_v50 = vunpack.c.l.s8.bf16 %v695_v30  ;;  %v1330_v41 = vunpack.c.l.s8.bf16 %v662_v53  ;;  %v1394_v19 = vunpack.c.l.s8.bf16 %v694_v54  ;;  %v699_v27 = vld [vmem:[%s5147_s30 + $0x818] sm:$0xff]  ;;  %v738_v38 = vld [vmem:[%s5147_s30 + $0x950] sm:$0xff] }
 0x368   : > { %2659 = vmatprep.subr.bf16.mxu1 %v1367_v42  ;;  %2937 = vst [vmem:[#allocation13 + $0x8] sm:$0xff] %v2933_v1  ;;  %v1335_v42 = vunpack.c.h.s8.bf16 %v663_v29  ;;  %v1399_v55 = vunpack.c.h.s8.bf16 %v695_v30  ;;  %v1334_v0 = vunpack.c.h.s8.bf16 %v662_v53  ;;  %v1398_v1 = vunpack.c.h.s8.bf16 %v694_v54  ;;  %v711_v4 = vld [vmem:[%s5147_s30 + $0x878] sm:$0xff]  ;;  %v710_v29 = vld [vmem:[%s5147_s30 + $0x870] sm:$0xff] }
 0x369   : > { %v743_v28 = vld [vmem:[%s5147_s30 + $0x978] sm:$0xff]  ;;  %v742_v30 = vld [vmem:[%s5147_s30 + $0x970] sm:$0xff] }
 0x36a   : > { %2619 = vmatpush1.bf16.msra.mxu0 %v1302_v7  ;;  %v1403_v7 = vunpack.c.l.s8.bf16 %v699_v27 }
 0x36b   : > { %2660 = vmatpush1.bf16.msra.mxu1 %v1366_v2  ;;  %2620 = vmatprep.subr.bf16.mxu0 %v1307_v18  ;;  %v1467_v2 = vunpack.c.l.s8.bf16 %v731_v56  ;;  %v698_v18 = vld [vmem:[%s5147_s30 + $0x810] sm:$0xff] }
 0x36c   : > { %2661 = vmatprep.subr.bf16.mxu1 %v1371_v8  ;;  %v730_v8 = vld [vmem:[%s5147_s30 + $0x910] sm:$0xff]  ;;  %v1402_v21 = vunpack.c.l.s8.bf16 %v698_v18  ;;  %v1406_v3 = vunpack.c.h.s8.bf16 %v698_v18  ;;  %v1430_v18 = vunpack.c.h.s8.bf16 %v710_v29 }
 0x36d   : > { %v1466_v22 = vunpack.c.l.s8.bf16 %v730_v8  ;;  %v1470_v10 = vunpack.c.h.s8.bf16 %v730_v8  ;;  %v1494_v8 = vunpack.c.h.s8.bf16 %v742_v30 }
 0x36e   : > { %2621 = vmatpush1.bf16.msra.mxu0 %v1306_v47  ;;  %v1407_v47 = vunpack.c.h.s8.bf16 %v699_v27 }
 0x36f   : > { %2662 = vmatpush1.bf16.msra.mxu1 %v1370_v48  ;;  %2622 = vmatprep.subr.bf16.mxu0 %v1311_v9  ;;  %v1471_v48 = vunpack.c.h.s8.bf16 %v731_v56  ;;  %v703_v9 = vld [vmem:[%s5147_s30 + $0x838] sm:$0xff] }
 0x370   : > { %2663 = vmatprep.subr.bf16.mxu1 %v1375_v11  ;;  %v735_v11 = vld [vmem:[%s5147_s30 + $0x938] sm:$0xff]  ;;  %v1415_v57 = vunpack.c.h.s8.bf16 %v703_v9 }
 0x371   : > { %v1479_v58 = vunpack.c.h.s8.bf16 %v735_v11 }
 0x372   : > { %2623 = vmatpush1.bf16.msra.mxu0 %v1310_v33  ;;  %v1411_v33 = vunpack.c.l.s8.bf16 %v703_v9 }
 0x373   : > { %2664 = vmatpush1.bf16.msra.mxu1 %v1374_v34  ;;  %2624 = vmatprep.subr.bf16.mxu0 %v1315_v15  ;;  %v1475_v34 = vunpack.c.l.s8.bf16 %v735_v11  ;;  %v702_v15 = vld [vmem:[%s5147_s30 + $0x830] sm:$0xff] }
 0x374   : > { %2665 = vmatprep.subr.bf16.mxu1 %v1379_v12  ;;  %v734_v12 = vld [vmem:[%s5147_s30 + $0x930] sm:$0xff] }
 0x376   : > { %2625 = vmatpush1.bf16.msra.mxu0 %v1314_v13  ;;  %v707_v13 = vld [vmem:[%s5147_s30 + $0x858] sm:$0xff] }
 0x377   : > { %2666 = vmatpush1.bf16.msra.mxu1 %v1378_v14  ;;  %2626 = vmatprep.subr.bf16.mxu0 %v1319_v16  ;;  %v739_v14 = vld [vmem:[%s5147_s30 + $0x958] sm:$0xff]  ;;  %v1414_v16 = vunpack.c.h.s8.bf16 %v702_v15 }
 0x378   : > { %2667 = vmatprep.subr.bf16.mxu1 %v1383_v17  ;;  %v1478_v17 = vunpack.c.h.s8.bf16 %v734_v12 }
 0x37a   : > { %2627 = vmatpush1.bf16.msra.mxu0 %v1318_v20  ;;  %v1418_v20 = vunpack.c.l.s8.bf16 %v706_v37 }
 0x37b   : > { %2668 = vmatpush1.bf16.msra.mxu1 %v1382_v25  ;;  %2628 = vmatprep.subr.bf16.mxu0 %v1323_v63  ;;  %v1482_v25 = vunpack.c.l.s8.bf16 %v738_v38  ;;  %v1423_v63 = vunpack.c.h.s8.bf16 %v707_v13 }
 0x37c   : > { %2669 = vmatprep.subr.bf16.mxu1 %v1387_v26  ;;  %v1487_v26 = vunpack.c.h.s8.bf16 %v739_v14 }
 0x37e   : > { %2629 = vmatpush1.bf16.msra.mxu0 %v1322_v31  ;;  %v1422_v31 = vunpack.c.h.s8.bf16 %v706_v37 }
 0x37f   : > { %2670 = vmatpush1.bf16.msra.mxu1 %v1386_v32  ;;  %2630 = vmatprep.subr.bf16.mxu0 %v1327_v35  ;;  %v1486_v32 = vunpack.c.h.s8.bf16 %v738_v38  ;;  %v1427_v35 = vunpack.c.l.s8.bf16 %v711_v4 }
 0x380   : > { %2671 = vmatprep.subr.bf16.mxu1 %v1391_v36  ;;  %v1491_v36 = vunpack.c.l.s8.bf16 %v743_v28 }
 0x382   : > { %2631 = vmatpush1.bf16.msra.mxu0 %v1326_v43 }
 0x383   : > { %2672 = vmatpush1.bf16.msra.mxu1 %v1390_v44  ;;  %2632 = vmatprep.subr.bf16.mxu0 %v1331_v49 }
 0x384   : > { %2673 = vmatprep.subr.bf16.mxu1 %v1395_v50 }
 0x386   : > { %2633 = vmatpush1.bf16.msra.mxu0 %v1330_v41 }
 0x387   : > { %2674 = vmatpush1.bf16.msra.mxu1 %v1394_v19  ;;  %2634 = vmatprep.subr.bf16.mxu0 %v1335_v42  ;;  %v1426_v42 = vunpack.c.l.s8.bf16 %v710_v29 }
 0x388   : > { %2675 = vmatprep.subr.bf16.mxu1 %v1399_v55  ;;  %v1490_v55 = vunpack.c.l.s8.bf16 %v742_v30 }
 0x38a   : > { %2635 = vmatpush1.bf16.msra.mxu0 %v1334_v0  ;;  %v1431_v0 = vunpack.c.h.s8.bf16 %v711_v4 }
 0x38b   : > { %2676 = vmatpush1.bf16.msra.mxu1 %v1398_v1  ;;  %2686 = vmatprep.subr.bf16.mxu0 %v1403_v7  ;;  %v1495_v1 = vunpack.c.h.s8.bf16 %v743_v28  ;;  %v715_v7 = vld [vmem:[%s5147_s30 + $0x898] sm:$0xff] }
 0x38c   : > { %2727 = vmatprep.subr.bf16.mxu1 %v1467_v2  ;;  %v747_v2 = vld [vmem:[%s5147_s30 + $0x998] sm:$0xff] }
 0x38d   : > { %2637 = vmatmul.mubr.bf16.vlgmr.msra.gmra.mrb[40].mxu0 %v5356_v23  ;;  %v1410_v23 = vunpack.c.l.s8.bf16 %v702_v15 }
 0x38e   : > { %2678 = vmatmul.mubr.bf16.vlgmr.msra.gmra.mrb[40].mxu1 %v5358_v24  ;;  %2687 = vmatpush1.bf16.msra.mxu0 %v1402_v21  ;;  %v1474_v24 = vunpack.c.l.s8.bf16 %v734_v12  ;;  %v1435_v21 = vunpack.c.l.s8.bf16 %v715_v7 }
 0x38f   : > { %2728 = vmatpush1.bf16.msra.mxu1 %v1466_v22  ;;  %2688 = vmatprep.subr.bf16.mxu0 %v1407_v47  ;;  %v1499_v22 = vunpack.c.l.s8.bf16 %v747_v2  ;;  %v714_v47 = vld [vmem:[%s5147_s30 + $0x890] sm:$0xff] }
 0x390   : > { %2729 = vmatprep.subr.bf16.mxu1 %v1471_v48  ;;  %2718 = vmatprep.mubr.bf16.mxu0 %v5364_v39  ;;  %v1419_v39 = vunpack.c.l.s8.bf16 %v707_v13  ;;  %v746_v48 = vld [vmem:[%s5147_s30 + $0x990] sm:$0xff]  ;;  %v1434_v9 = vunpack.c.l.s8.bf16 %v714_v47  ;;  %v1438_v15 = vunpack.c.h.s8.bf16 %v714_v47 }
 0x391   : > { %2759 = vmatprep.mubr.bf16.mxu1 %v5366_v40  ;;  %v1483_v40 = vunpack.c.l.s8.bf16 %v739_v14  ;;  %v1498_v11 = vunpack.c.l.s8.bf16 %v746_v48  ;;  %v1502_v12 = vunpack.c.h.s8.bf16 %v746_v48 }
 0x392   : > { %2689 = vmatpush1.bf16.msra.mxu0 %v1406_v3  ;;  %v1439_v3 = vunpack.c.h.s8.bf16 %v715_v7 }
 0x393   : > { %2730 = vmatpush1.bf16.msra.mxu1 %v1470_v10  ;;  %2690 = vmatprep.subr.bf16.mxu0 %v1411_v33  ;;  %v1503_v10 = vunpack.c.h.s8.bf16 %v747_v2  ;;  %v719_v33 = vld [vmem:[%s5147_s30 + $0x8b8] sm:$0xff] }
 0x394   : > { %2731 = vmatprep.subr.bf16.mxu1 %v1475_v34  ;;  %v751_v34 = vld [vmem:[%s5147_s30 + $0x9b8] sm:$0xff] }
 0x396   : > { %2691 = vmatpush1.bf16.msra.mxu0 %v1410_v23  ;;  %v1443_v23 = vunpack.c.l.s8.bf16 %v719_v33 }
 0x397   : > { %2732 = vmatpush1.bf16.msra.mxu1 %v1474_v24  ;;  %2692 = vmatprep.subr.bf16.mxu0 %v1415_v57  ;;  %v1507_v24 = vunpack.c.l.s8.bf16 %v751_v34  ;;  %v718_v57 = vld [vmem:[%s5147_s30 + $0x8b0] sm:$0xff] }
 0x398   : > { %2733 = vmatprep.subr.bf16.mxu1 %v1479_v58  ;;  %v750_v58 = vld [vmem:[%s5147_s30 + $0x9b0] sm:$0xff]  ;;  %v1442_v13 = vunpack.c.l.s8.bf16 %v718_v57  ;;  %v1446_v37 = vunpack.c.h.s8.bf16 %v718_v57  ;;  %v771_v57 = vld [vmem:[%s5147_s30 + $0xa58] sm:$0xff] }
 0x399   : > { %v1506_v14 = vunpack.c.l.s8.bf16 %v750_v58  ;;  %v1510_v38 = vunpack.c.h.s8.bf16 %v750_v58  ;;  %v803_v58 = vld [vmem:[%s5147_s30 + $0xb58] sm:$0xff] }
 0x39a   : > { %2693 = vmatpush1.bf16.msra.mxu0 %v1414_v16  ;;  %v1447_v16 = vunpack.c.h.s8.bf16 %v719_v33 }
 0x39b   : > { %2734 = vmatpush1.bf16.msra.mxu1 %v1478_v17  ;;  %2694 = vmatprep.subr.bf16.mxu0 %v1419_v39  ;;  %v1511_v17 = vunpack.c.h.s8.bf16 %v751_v34  ;;  %v723_v39 = vld [vmem:[%s5147_s30 + $0x8d8] sm:$0xff] }
 0x39c   : > { %2735 = vmatprep.subr.bf16.mxu1 %v1483_v40  ;;  %v755_v40 = vld [vmem:[%s5147_s30 + $0x9d8] sm:$0xff] }
 0x39e   : > { %2695 = vmatpush1.bf16.msra.mxu0 %v1418_v20  ;;  %v1451_v20 = vunpack.c.l.s8.bf16 %v723_v39 }
 0x39f   : > { %2736 = vmatpush1.bf16.msra.mxu1 %v1482_v25  ;;  %2696 = vmatprep.subr.bf16.mxu0 %v1423_v63  ;;  %v1515_v25 = vunpack.c.l.s8.bf16 %v755_v40  ;;  %v722_v63 = vld [vmem:[%s5147_s30 + $0x8d0] sm:$0xff] }
 0x3a0   : > { %2737 = vmatprep.subr.bf16.mxu1 %v1487_v26  ;;  %v2392_v43 = vpop.f32.mrb[28].mxu0  ;;  %v754_v26 = vld [vmem:[%s5147_s30 + $0x9d0] sm:$0xff]  ;;  %v1450_v4 = vunpack.c.l.s8.bf16 %v722_v63  ;;  %v1454_v29 = vunpack.c.h.s8.bf16 %v722_v63 }
 0x3a1   : > { %v2433_v44 = vpop.f32.mrb[28].mxu1  ;;  %v2394_v50 = vpop.f32.mrb[29].mxu0  ;;  %v1514_v28 = vunpack.c.l.s8.bf16 %v754_v26  ;;  %v1518_v30 = vunpack.c.h.s8.bf16 %v754_v26 }
 0x3a2   : > { %v5700_v49 = vadd.f32 %v2433_v44, %v2392_v43  ;;  %v2435_v53 = vpop.f32.mrb[29].mxu1  ;;  %v2396_v41 = vpop.f32.mrb[30].mxu0  ;;  %2697 = vmatpush1.bf16.msra.mxu0 %v1422_v31  ;;  %v1455_v31 = vunpack.c.h.s8.bf16 %v723_v39 }
 0x3a3   : > { %v5702_v54 = vadd.f32 %v2435_v53, %v2394_v50  ;;  %v2437_v19 = vpop.f32.mrb[30].mxu1  ;;  %2738 = vmatpush1.bf16.msra.mxu1 %v1486_v32  ;;  %v2397_v27 = vpop.f32.mrb[31].mxu0  ;;  %2698 = vmatprep.subr.bf16.mxu0 %v1427_v35  ;;  %v1519_v32 = vunpack.c.h.s8.bf16 %v755_v40  ;;  %v727_v35 = vld [vmem:[%s5147_s30 + $0x8f8] sm:$0xff]  ;;  %v726_v50 = vld [vmem:[%s5147_s30 + $0x8f0] sm:$0xff] }
 0x3a4   : > { %v2438_v56 = vpop.f32.mrb[31].mxu1  ;;  %2739 = vmatprep.subr.bf16.mxu1 %v1491_v36  ;;  %v759_v36 = vld [vmem:[%s5147_s30 + $0x9f8] sm:$0xff]  ;;  %v1459_v43 = vunpack.c.l.s8.bf16 %v727_v35  ;;  %v758_v53 = vld [vmem:[%s5147_s30 + $0x9f0] sm:$0xff]  ;;  %v1458_v41 = vunpack.c.l.s8.bf16 %v726_v50 }
 0x3a5   : > { %v1523_v44 = vunpack.c.l.s8.bf16 %v759_v36  ;;  %v1522_v19 = vunpack.c.l.s8.bf16 %v758_v53  ;;  %v763_v27 = vld [vmem:[%s5147_s30 + $0xa18] sm:$0xff] }
 0x3a6   : > { %2699 = vmatpush1.bf16.msra.mxu0 %v1426_v42  ;;  %v1463_v42 = vunpack.c.h.s8.bf16 %v727_v35  ;;  %v795_v56 = vld [vmem:[%s5147_s30 + $0xb18] sm:$0xff]  ;;  %v1531_v7 = vunpack.c.l.s8.bf16 %v763_v27  ;;  %v1535_v47 = vunpack.c.h.s8.bf16 %v763_v27 }
 0x3a7   : > { %2740 = vmatpush1.bf16.msra.mxu1 %v1490_v55  ;;  %2700 = vmatprep.subr.bf16.mxu0 %v1431_v0  ;;  %v1527_v55 = vunpack.c.h.s8.bf16 %v759_v36  ;;  %v1462_v0 = vunpack.c.h.s8.bf16 %v726_v50  ;;  %v1595_v2 = vunpack.c.l.s8.bf16 %v795_v56  ;;  %v1599_v48 = vunpack.c.h.s8.bf16 %v795_v56 }
 0x3a8   : > { %2741 = vmatprep.subr.bf16.mxu1 %v1495_v1  ;;  %v1526_v1 = vunpack.c.h.s8.bf16 %v758_v53 }
 0x3aa   : > { %2701 = vmatpush1.bf16.msra.mxu0 %v1430_v18  ;;  %v762_v18 = vld [vmem:[%s5147_s30 + $0xa10] sm:$0xff] }
 0x3ab   : > { %2742 = vmatpush1.bf16.msra.mxu1 %v1494_v8  ;;  %2702 = vmatprep.subr.bf16.mxu0 %v1435_v21  ;;  %v794_v8 = vld [vmem:[%s5147_s30 + $0xb10] sm:$0xff]  ;;  %v1530_v21 = vunpack.c.l.s8.bf16 %v762_v18 }
 0x3ac   : > { %2743 = vmatprep.subr.bf16.mxu1 %v1499_v22  ;;  %v1594_v22 = vunpack.c.l.s8.bf16 %v794_v8 }
 0x3ae   : > { %2703 = vmatpush1.bf16.msra.mxu0 %v1434_v9  ;;  %v767_v9 = vld [vmem:[%s5147_s30 + $0xa38] sm:$0xff] }
 0x3af   : > { %2744 = vmatpush1.bf16.msra.mxu1 %v1498_v11  ;;  %2704 = vmatprep.subr.bf16.mxu0 %v1439_v3  ;;  %v799_v11 = vld [vmem:[%s5147_s30 + $0xb38] sm:$0xff]  ;;  %v1534_v3 = vunpack.c.h.s8.bf16 %v762_v18  ;;  %v1539_v33 = vunpack.c.l.s8.bf16 %v767_v9 }
 0x3b0   : > { %2745 = vmatprep.subr.bf16.mxu1 %v1503_v10  ;;  %v1598_v10 = vunpack.c.h.s8.bf16 %v794_v8  ;;  %v1603_v34 = vunpack.c.l.s8.bf16 %v799_v11 }
 0x3b2   : > { %2705 = vmatpush1.bf16.msra.mxu0 %v1438_v15  ;;  %v766_v15 = vld [vmem:[%s5147_s30 + $0xa30] sm:$0xff] }
 0x3b3   : > { %2746 = vmatpush1.bf16.msra.mxu1 %v1502_v12  ;;  %2706 = vmatprep.subr.bf16.mxu0 %v1443_v23  ;;  %v798_v12 = vld [vmem:[%s5147_s30 + $0xb30] sm:$0xff]  ;;  %v1543_v23 = vunpack.c.h.s8.bf16 %v767_v9 }
 0x3b4   : > { %2747 = vmatprep.subr.bf16.mxu1 %v1507_v24  ;;  %v1607_v24 = vunpack.c.h.s8.bf16 %v799_v11 }
 0x3b6   : > { %2707 = vmatpush1.bf16.msra.mxu0 %v1442_v13  ;;  %v1542_v13 = vunpack.c.h.s8.bf16 %v766_v15 }
 0x3b7   : > { %2748 = vmatpush1.bf16.msra.mxu1 %v1506_v14  ;;  %2708 = vmatprep.subr.bf16.mxu0 %v1447_v16  ;;  %v1606_v14 = vunpack.c.h.s8.bf16 %v798_v12  ;;  %v770_v16 = vld [vmem:[%s5147_s30 + $0xa50] sm:$0xff] }
 0x3b8   : > { %2749 = vmatprep.subr.bf16.mxu1 %v1511_v17  ;;  %v802_v17 = vld [vmem:[%s5147_s30 + $0xb50] sm:$0xff]  ;;  %v1546_v39 = vunpack.c.l.s8.bf16 %v770_v16  ;;  %v1550_v63 = vunpack.c.h.s8.bf16 %v770_v16 }
 0x3b9   : > { %v1610_v40 = vunpack.c.l.s8.bf16 %v802_v17  ;;  %v1614_v26 = vunpack.c.h.s8.bf16 %v802_v17 }
 0x3ba   : > { %2709 = vmatpush1.bf16.msra.mxu0 %v1446_v37  ;;  %v1551_v37 = vunpack.c.h.s8.bf16 %v771_v57 }
 0x3bb   : > { %2750 = vmatpush1.bf16.msra.mxu1 %v1510_v38  ;;  %2710 = vmatprep.subr.bf16.mxu0 %v1451_v20  ;;  %v1615_v38 = vunpack.c.h.s8.bf16 %v803_v58  ;;  %v775_v20 = vld [vmem:[%s5147_s30 + $0xa78] sm:$0xff] }
 0x3bc   : > { %2751 = vmatprep.subr.bf16.mxu1 %v1515_v25  ;;  %v807_v25 = vld [vmem:[%s5147_s30 + $0xb78] sm:$0xff] }
 0x3bd   : > { %v1623_v56 = vunpack.c.h.s8.bf16 %v807_v25 }
 0x3be   : > { %2711 = vmatpush1.bf16.msra.mxu0 %v1450_v4  ;;  %v1555_v4 = vunpack.c.l.s8.bf16 %v775_v20 }
 0x3bf   : > { %2752 = vmatpush1.bf16.msra.mxu1 %v1514_v28  ;;  %2712 = vmatprep.subr.bf16.mxu0 %v1455_v31  ;;  %v1619_v28 = vunpack.c.l.s8.bf16 %v807_v25  ;;  %v774_v31 = vld [vmem:[%s5147_s30 + $0xa70] sm:$0xff] }
 0x3c0   : > { %2753 = vmatprep.subr.bf16.mxu1 %v1519_v32  ;;  %v806_v32 = vld [vmem:[%s5147_s30 + $0xb70] sm:$0xff] }
 0x3c2   : > { %2713 = vmatpush1.bf16.msra.mxu0 %v1454_v29 }
 0x3c3   : > { %2754 = vmatpush1.bf16.msra.mxu1 %v1518_v30  ;;  %2714 = vmatprep.subr.bf16.mxu0 %v1459_v43 }
 0x3c4   : > { %2755 = vmatprep.subr.bf16.mxu1 %v1523_v44 }
 0x3c6   : > { %2715 = vmatpush1.bf16.msra.mxu0 %v1458_v41  ;;  %v1554_v41 = vunpack.c.l.s8.bf16 %v774_v31 }
 0x3c7   : > { %2756 = vmatpush1.bf16.msra.mxu1 %v1522_v19  ;;  %2716 = vmatprep.subr.bf16.mxu0 %v1463_v42  ;;  %v1618_v19 = vunpack.c.l.s8.bf16 %v806_v32 }
 0x3c8   : > { %2757 = vmatprep.subr.bf16.mxu1 %v1527_v55 }
 0x3ca   : > { %2717 = vmatpush1.bf16.msra.mxu0 %v1462_v0 }
 0x3cb   : > { %2758 = vmatpush1.bf16.msra.mxu1 %v1526_v1  ;;  %2768 = vmatprep.subr.bf16.mxu0 %v1531_v7  ;;  %v811_v1 = vld [vmem:[%s5147_s30 + $0xb98] sm:$0xff]  ;;  %v1558_v7 = vunpack.c.h.s8.bf16 %v774_v31 }
 0x3cc   : > { %2809 = vmatprep.subr.bf16.mxu1 %v1595_v2  ;;  %v1622_v2 = vunpack.c.h.s8.bf16 %v806_v32  ;;  %v1627_v8 = vunpack.c.l.s8.bf16 %v811_v1  ;;  %v1631_v11 = vunpack.c.h.s8.bf16 %v811_v1 }
 0x3cd   : > { %2719 = vmatmul.mubr.bf16.vlgmr.msra.gmra.mrb[44].mxu0 %v5408_v59  ;;  %v1538_v59 = vunpack.c.l.s8.bf16 %v766_v15 }
 0x3ce   : > { %2760 = vmatmul.mubr.bf16.vlgmr.msra.gmra.mrb[44].mxu1 %v5410_v60  ;;  %2769 = vmatpush1.bf16.msra.mxu0 %v1530_v21  ;;  %v1602_v60 = vunpack.c.l.s8.bf16 %v798_v12  ;;  %v778_v21 = vld [vmem:[%s5147_s30 + $0xa90] sm:$0xff] }
 0x3cf   : > { %2810 = vmatpush1.bf16.msra.mxu1 %v1594_v22  ;;  %2770 = vmatprep.subr.bf16.mxu0 %v1535_v47  ;;  %v810_v22 = vld [vmem:[%s5147_s30 + $0xb90] sm:$0xff]  ;;  %v1562_v47 = vunpack.c.l.s8.bf16 %v778_v21 }
 0x3d0   : > { %2811 = vmatprep.subr.bf16.mxu1 %v1599_v48  ;;  %2800 = vmatprep.mubr.bf16.mxu0 %v5416_v5  ;;  %v1547_v5 = vunpack.c.l.s8.bf16 %v771_v57  ;;  %v1626_v48 = vunpack.c.l.s8.bf16 %v810_v22 }
 0x3d1   : > { %2841 = vmatprep.mubr.bf16.mxu1 %v5418_v6  ;;  %v1611_v6 = vunpack.c.l.s8.bf16 %v803_v58 }
 0x3d2   : > { %2771 = vmatpush1.bf16.msra.mxu0 %v1534_v3  ;;  %v783_v3 = vld [vmem:[%s5147_s30 + $0xab8] sm:$0xff] }
 0x3d3   : > { %2812 = vmatpush1.bf16.msra.mxu1 %v1598_v10  ;;  %2772 = vmatprep.subr.bf16.mxu0 %v1539_v33  ;;  %v815_v10 = vld [vmem:[%s5147_s30 + $0xbb8] sm:$0xff]  ;;  %v1566_v33 = vunpack.c.h.s8.bf16 %v778_v21  ;;  %v1571_v15 = vunpack.c.l.s8.bf16 %v783_v3  ;;  %v1575_v57 = vunpack.c.h.s8.bf16 %v783_v3 }
 0x3d4   : > { %2813 = vmatprep.subr.bf16.mxu1 %v1603_v34  ;;  %v1630_v34 = vunpack.c.h.s8.bf16 %v810_v22  ;;  %v1635_v12 = vunpack.c.l.s8.bf16 %v815_v10  ;;  %v1639_v58 = vunpack.c.h.s8.bf16 %v815_v10 }
 0x3d6   : > { %2773 = vmatpush1.bf16.msra.mxu0 %v1538_v59  ;;  %v782_v59 = vld [vmem:[%s5147_s30 + $0xab0] sm:$0xff] }
 0x3d7   : > { %2814 = vmatpush1.bf16.msra.mxu1 %v1602_v60  ;;  %2774 = vmatprep.subr.bf16.mxu0 %v1543_v23  ;;  %v814_v60 = vld [vmem:[%s5147_s30 + $0xbb0] sm:$0xff]  ;;  %v1570_v23 = vunpack.c.l.s8.bf16 %v782_v59 }
 0x3d8   : > { %2815 = vmatprep.subr.bf16.mxu1 %v1607_v24  ;;  %v1634_v24 = vunpack.c.l.s8.bf16 %v814_v60 }
 0x3da   : > { %2775 = vmatpush1.bf16.msra.mxu0 %v1542_v13  ;;  %v787_v13 = vld [vmem:[%s5147_s30 + $0xad8] sm:$0xff] }
 0x3db   : > { %2816 = vmatpush1.bf16.msra.mxu1 %v1606_v14  ;;  %2776 = vmatprep.subr.bf16.mxu0 %v1547_v5  ;;  %v819_v14 = vld [vmem:[%s5147_s30 + $0xbd8] sm:$0xff]  ;;  %v1574_v5 = vunpack.c.h.s8.bf16 %v782_v59  ;;  %v1579_v16 = vunpack.c.l.s8.bf16 %v787_v13  ;;  %v834_v59 = vld [vmem:[%s5147_s30 + $0xc50] sm:$0xff] }
 0x3dc   : > { %2817 = vmatprep.subr.bf16.mxu1 %v1611_v6  ;;  %v1638_v6 = vunpack.c.h.s8.bf16 %v814_v60  ;;  %v1643_v17 = vunpack.c.l.s8.bf16 %v819_v14  ;;  %v1647_v25 = vunpack.c.h.s8.bf16 %v819_v14  ;;  %v866_v60 = vld [vmem:[%s5147_s30 + $0xd50] sm:$0xff]  ;;  %v871_v14 = vld [vmem:[%s5147_s30 + $0xd78] sm:$0xff] }
 0x3de   : > { %2777 = vmatpush1.bf16.msra.mxu0 %v1546_v39  ;;  %v786_v39 = vld [vmem:[%s5147_s30 + $0xad0] sm:$0xff] }
 0x3df   : > { %2818 = vmatpush1.bf16.msra.mxu1 %v1610_v40  ;;  %2778 = vmatprep.subr.bf16.mxu0 %v1551_v37  ;;  %v818_v40 = vld [vmem:[%s5147_s30 + $0xbd0] sm:$0xff]  ;;  %v1578_v37 = vunpack.c.l.s8.bf16 %v786_v39 }
 0x3e0   : > { %2819 = vmatprep.subr.bf16.mxu1 %v1615_v38  ;;  %v2474_v35 = vpop.f32.mrb[32].mxu0  ;;  %v1642_v38 = vunpack.c.l.s8.bf16 %v818_v40 }
 0x3e1   : > { %v2515_v36 = vpop.f32.mrb[32].mxu1  ;;  %v2475_v29 = vadd.f32 %v2474_v35, %v5700_v49  ;;  %v2476_v30 = vpop.f32.mrb[33].mxu0  ;;  %v1559_v49 = vunpack.c.h.s8.bf16 %v775_v20  ;;  %v1583_v20 = vunpack.c.h.s8.bf16 %v787_v13  ;;  %v790_v35 = vld [vmem:[%s5147_s30 + $0xaf0] sm:$0xff]  ;;  %v839_v13 = vld [vmem:[%s5147_s30 + $0xc78] sm:$0xff] }
 0x3e2   : > { %v2517_v43 = vpop.f32.mrb[33].mxu1  ;;  %v2477_v44 = vadd.f32 %v2476_v30, %v5702_v54  ;;  %v2478_v50 = vpop.f32.mrb[34].mxu0  ;;  %2779 = vmatpush1.bf16.msra.mxu0 %v1550_v63  ;;  %v779_v54 = vld [vmem:[%s5147_s30 + $0xa98] sm:$0xff] }
 0x3e3   : > { %v2519_v53 = vpop.f32.mrb[34].mxu1  ;;  %2820 = vmatpush1.bf16.msra.mxu1 %v1614_v26  ;;  %v5742_v42 = vadd.f32 %v2515_v36, %v2475_v29  ;;  %v2479_v55 = vpop.f32.mrb[35].mxu0  ;;  %2780 = vmatprep.subr.bf16.mxu0 %v1555_v4  ;;  %v1563_v18 = vunpack.c.l.s8.bf16 %v779_v54  ;;  %v1567_v9 = vunpack.c.h.s8.bf16 %v779_v54  ;;  %v791_v63 = vld [vmem:[%s5147_s30 + $0xaf8] sm:$0xff]  ;;  %v1582_v4 = vunpack.c.h.s8.bf16 %v786_v39  ;;  %v822_v36 = vld [vmem:[%s5147_s30 + $0xbf0] sm:$0xff] }
 0x3e4   : > { %v2520_v27 = vpop.f32.mrb[35].mxu1  ;;  %2821 = vmatprep.subr.bf16.mxu1 %v1619_v28  ;;  %v5744_v0 = vadd.f32 %v2517_v43, %v2477_v44  ;;  %v823_v26 = vld [vmem:[%s5147_s30 + $0xbf8] sm:$0xff]  ;;  %v1646_v28 = vunpack.c.h.s8.bf16 %v818_v40  ;;  %v1587_v31 = vunpack.c.l.s8.bf16 %v791_v63  ;;  %v1586_v29 = vunpack.c.l.s8.bf16 %v790_v35  ;;  %v838_v39 = vld [vmem:[%s5147_s30 + $0xc70] sm:$0xff] }
 0x3e5   : > { %v1651_v32 = vunpack.c.l.s8.bf16 %v823_v26  ;;  %v1650_v30 = vunpack.c.l.s8.bf16 %v822_v36  ;;  %v1591_v43 = vunpack.c.h.s8.bf16 %v791_v63  ;;  %v1655_v44 = vunpack.c.h.s8.bf16 %v823_v26  ;;  %v827_v50 = vld [vmem:[%s5147_s30 + $0xc18] sm:$0xff]  ;;  %v870_v40 = vld [vmem:[%s5147_s30 + $0xd70] sm:$0xff] }
 0x3e6   : > { %2781 = vmatpush1.bf16.msra.mxu0 %v1554_v41  ;;  %v859_v53 = vld [vmem:[%s5147_s30 + $0xd18] sm:$0xff]  ;;  %v1590_v41 = vunpack.c.h.s8.bf16 %v790_v35  ;;  %v1659_v55 = vunpack.c.l.s8.bf16 %v827_v50 }
 0x3e7   : > { %2822 = vmatpush1.bf16.msra.mxu1 %v1618_v19  ;;  %2782 = vmatprep.subr.bf16.mxu0 %v1559_v49  ;;  %v1654_v19 = vunpack.c.h.s8.bf16 %v822_v36  ;;  %v1723_v27 = vunpack.c.l.s8.bf16 %v859_v53  ;;  %v826_v49 = vld [vmem:[%s5147_s30 + $0xc10] sm:$0xff] }
 0x3e8   : > { %2823 = vmatprep.subr.bf16.mxu1 %v1623_v56  ;;  %v858_v56 = vld [vmem:[%s5147_s30 + $0xd10] sm:$0xff]  ;;  %v1658_v54 = vunpack.c.l.s8.bf16 %v826_v49  ;;  %v1662_v21 = vunpack.c.h.s8.bf16 %v826_v49 }
 0x3e9   : > { %v1722_v1 = vunpack.c.l.s8.bf16 %v858_v56  ;;  %v1726_v22 = vunpack.c.h.s8.bf16 %v858_v56 }
 0x3ea   : > { %2783 = vmatpush1.bf16.msra.mxu0 %v1558_v7  ;;  %v1663_v7 = vunpack.c.h.s8.bf16 %v827_v50  ;;  %v1686_v50 = vunpack.c.h.s8.bf16 %v838_v39 }
 0x3eb   : > { %2824 = vmatpush1.bf16.msra.mxu1 %v1622_v2  ;;  %2784 = vmatprep.subr.bf16.mxu0 %v1563_v18  ;;  %v1727_v2 = vunpack.c.h.s8.bf16 %v859_v53  ;;  %v831_v18 = vld [vmem:[%s5147_s30 + $0xc38] sm:$0xff]  ;;  %v1750_v53 = vunpack.c.h.s8.bf16 %v870_v40 }
 0x3ec   : > { %2825 = vmatprep.subr.bf16.mxu1 %v1627_v8  ;;  %v863_v8 = vld [vmem:[%s5147_s30 + $0xd38] sm:$0xff]  ;;  %v1671_v3 = vunpack.c.h.s8.bf16 %v831_v18 }
 0x3ed   : > { %v1735_v10 = vunpack.c.h.s8.bf16 %v863_v8 }
 0x3ee   : > { %2785 = vmatpush1.bf16.msra.mxu0 %v1562_v47  ;;  %v1667_v47 = vunpack.c.l.s8.bf16 %v831_v18 }
 0x3ef   : > { %2826 = vmatpush1.bf16.msra.mxu1 %v1626_v48  ;;  %2786 = vmatprep.subr.bf16.mxu0 %v1567_v9  ;;  %v1731_v48 = vunpack.c.l.s8.bf16 %v863_v8  ;;  %v830_v9 = vld [vmem:[%s5147_s30 + $0xc30] sm:$0xff] }
 0x3f0   : > { %2827 = vmatprep.subr.bf16.mxu1 %v1631_v11  ;;  %v862_v11 = vld [vmem:[%s5147_s30 + $0xd30] sm:$0xff] }
 0x3f2   : > { %2787 = vmatpush1.bf16.msra.mxu0 %v1566_v33  ;;  %v835_v33 = vld [vmem:[%s5147_s30 + $0xc58] sm:$0xff] }
 0x3f3   : > { %2828 = vmatpush1.bf16.msra.mxu1 %v1630_v34  ;;  %2788 = vmatprep.subr.bf16.mxu0 %v1571_v15  ;;  %v867_v34 = vld [vmem:[%s5147_s30 + $0xd58] sm:$0xff]  ;;  %v1670_v15 = vunpack.c.h.s8.bf16 %v830_v9 }
 0x3f4   : > { %2829 = vmatprep.subr.bf16.mxu1 %v1635_v12  ;;  %v1734_v12 = vunpack.c.h.s8.bf16 %v862_v11 }
 0x3f6   : > { %2789 = vmatpush1.bf16.msra.mxu0 %v1570_v23  ;;  %v1674_v23 = vunpack.c.l.s8.bf16 %v834_v59 }
 0x3f7   : > { %2830 = vmatpush1.bf16.msra.mxu1 %v1634_v24  ;;  %2790 = vmatprep.subr.bf16.mxu0 %v1575_v57  ;;  %v1738_v24 = vunpack.c.l.s8.bf16 %v866_v60  ;;  %v1679_v57 = vunpack.c.h.s8.bf16 %v835_v33 }
 0x3f8   : > { %2831 = vmatprep.subr.bf16.mxu1 %v1639_v58  ;;  %v1743_v58 = vunpack.c.h.s8.bf16 %v867_v34 }
 0x3fa   : > { %2791 = vmatpush1.bf16.msra.mxu0 %v1574_v5  ;;  %v1678_v5 = vunpack.c.h.s8.bf16 %v834_v59 }
 0x3fb   : > { %2832 = vmatpush1.bf16.msra.mxu1 %v1638_v6  ;;  %2792 = vmatprep.subr.bf16.mxu0 %v1579_v16  ;;  %v1742_v6 = vunpack.c.h.s8.bf16 %v866_v60  ;;  %v1683_v16 = vunpack.c.l.s8.bf16 %v839_v13 }
 0x3fc   : > { %2833 = vmatprep.subr.bf16.mxu1 %v1643_v17  ;;  %v1747_v17 = vunpack.c.l.s8.bf16 %v871_v14 }
 0x3fe   : > { %2793 = vmatpush1.bf16.msra.mxu0 %v1578_v37 }
 0x3ff   : > { %2834 = vmatpush1.bf16.msra.mxu1 %v1642_v38  ;;  %2794 = vmatprep.subr.bf16.mxu0 %v1583_v20 }
 0x400   : > { %2835 = vmatprep.subr.bf16.mxu1 %v1647_v25 }
 0x402   : > { %2795 = vmatpush1.bf16.msra.mxu0 %v1582_v4 }
 0x403   : > { %2836 = vmatpush1.bf16.msra.mxu1 %v1646_v28  ;;  %2796 = vmatprep.subr.bf16.mxu0 %v1587_v31  ;;  %v1682_v31 = vunpack.c.l.s8.bf16 %v838_v39 }
 0x404   : > { %2837 = vmatprep.subr.bf16.mxu1 %v1651_v32  ;;  %v1746_v32 = vunpack.c.l.s8.bf16 %v870_v40 }
 0x406   : > { %2797 = vmatpush1.bf16.msra.mxu0 %v1586_v29 }
 0x407   : > { %2838 = vmatpush1.bf16.msra.mxu1 %v1650_v30  ;;  %2798 = vmatprep.subr.bf16.mxu0 %v1591_v43  ;;  %v1751_v30 = vunpack.c.h.s8.bf16 %v871_v14 }
 0x408   : > { %2839 = vmatprep.subr.bf16.mxu1 %v1655_v44  ;;  %v875_v44 = vld [vmem:[%s5147_s30 + $0xd98] sm:$0xff] }
 0x40a   : > { %2799 = vmatpush1.bf16.msra.mxu0 %v1590_v41 }
 0x40b   : > { %2840 = vmatpush1.bf16.msra.mxu1 %v1654_v19  ;;  %2850 = vmatprep.subr.bf16.mxu0 %v1659_v55  ;;  %v1755_v19 = vunpack.c.l.s8.bf16 %v875_v44  ;;  %v842_v55 = vld [vmem:[%s5147_s30 + $0xc90] sm:$0xff] }
 0x40c   : > { %2891 = vmatprep.subr.bf16.mxu1 %v1723_v27  ;;  %v874_v27 = vld [vmem:[%s5147_s30 + $0xd90] sm:$0xff]  ;;  %v1690_v49 = vunpack.c.l.s8.bf16 %v842_v55  ;;  %v1694_v18 = vunpack.c.h.s8.bf16 %v842_v55 }
 0x40d   : > { %2801 = vmatmul.mubr.bf16.vlgmr.msra.gmra.mrb[48].mxu0 %v5462_v45  ;;  %v1666_v45 = vunpack.c.l.s8.bf16 %v830_v9  ;;  %v1754_v56 = vunpack.c.l.s8.bf16 %v874_v27  ;;  %v1758_v8 = vunpack.c.h.s8.bf16 %v874_v27 }
 0x40e   : > { %2842 = vmatmul.mubr.bf16.vlgmr.msra.gmra.mrb[48].mxu1 %v5464_v46  ;;  %2851 = vmatpush1.bf16.msra.mxu0 %v1658_v54  ;;  %v1730_v46 = vunpack.c.l.s8.bf16 %v862_v11 }
 0x40f   : > { %2892 = vmatpush1.bf16.msra.mxu1 %v1722_v1  ;;  %2852 = vmatprep.subr.bf16.mxu0 %v1663_v7  ;;  %v1759_v1 = vunpack.c.h.s8.bf16 %v875_v44  ;;  %v847_v7 = vld [vmem:[%s5147_s30 + $0xcb8] sm:$0xff] }
 0x410   : > { %2893 = vmatprep.subr.bf16.mxu1 %v1727_v2  ;;  %2882 = vmatprep.mubr.bf16.mxu0 %v5470_v61  ;;  %v1675_v61 = vunpack.c.l.s8.bf16 %v835_v33  ;;  %v879_v2 = vld [vmem:[%s5147_s30 + $0xdb8] sm:$0xff] }
 0x411   : > { %2923 = vmatprep.mubr.bf16.mxu1 %v5472_v62  ;;  %v1739_v62 = vunpack.c.l.s8.bf16 %v867_v34 }
 0x412   : > { %2853 = vmatpush1.bf16.msra.mxu0 %v1662_v21  ;;  %v1699_v21 = vunpack.c.l.s8.bf16 %v847_v7 }
 0x413   : > { %2894 = vmatpush1.bf16.msra.mxu1 %v1726_v22  ;;  %2854 = vmatprep.subr.bf16.mxu0 %v1667_v47  ;;  %v1763_v22 = vunpack.c.l.s8.bf16 %v879_v2  ;;  %v846_v47 = vld [vmem:[%s5147_s30 + $0xcb0] sm:$0xff] }
 0x414   : > { %2895 = vmatprep.subr.bf16.mxu1 %v1731_v48  ;;  %v878_v48 = vld [vmem:[%s5147_s30 + $0xdb0] sm:$0xff]  ;;  %v1698_v9 = vunpack.c.l.s8.bf16 %v846_v47  ;;  %v1702_v33 = vunpack.c.h.s8.bf16 %v846_v47 }
 0x415   : > { %v1762_v11 = vunpack.c.l.s8.bf16 %v878_v48  ;;  %v1766_v34 = vunpack.c.h.s8.bf16 %v878_v48 }
 0x416   : > { %2855 = vmatpush1.bf16.msra.mxu0 %v1666_v45  ;;  %v1703_v45 = vunpack.c.h.s8.bf16 %v847_v7 }
 0x417   : > { %2896 = vmatpush1.bf16.msra.mxu1 %v1730_v46  ;;  %2856 = vmatprep.subr.bf16.mxu0 %v1671_v3  ;;  %v1767_v46 = vunpack.c.h.s8.bf16 %v879_v2  ;;  %v851_v3 = vld [vmem:[%s5147_s30 + $0xcd8] sm:$0xff] }
 0x418   : > { %2897 = vmatprep.subr.bf16.mxu1 %v1735_v10  ;;  %v883_v10 = vld [vmem:[%s5147_s30 + $0xdd8] sm:$0xff] }
 0x41a   : > { %2857 = vmatpush1.bf16.msra.mxu0 %v1670_v15  ;;  %v1707_v15 = vunpack.c.l.s8.bf16 %v851_v3 }
 0x41b   : > { %2898 = vmatpush1.bf16.msra.mxu1 %v1734_v12  ;;  %2858 = vmatprep.subr.bf16.mxu0 %v1675_v61  ;;  %v1771_v12 = vunpack.c.l.s8.bf16 %v883_v10  ;;  %v850_v61 = vld [vmem:[%s5147_s30 + $0xcd0] sm:$0xff] }
 0x41c   : > { %2899 = vmatprep.subr.bf16.mxu1 %v1739_v62  ;;  %v882_v62 = vld [vmem:[%s5147_s30 + $0xdd0] sm:$0xff]  ;;  %v1706_v59 = vunpack.c.l.s8.bf16 %v850_v61 }
 0x41d   : > { %v1770_v60 = vunpack.c.l.s8.bf16 %v882_v62  ;;  %v1774_v14 = vunpack.c.h.s8.bf16 %v882_v62 }
 0x41e   : > { %2859 = vmatpush1.bf16.msra.mxu0 %v1674_v23  ;;  %v1711_v23 = vunpack.c.h.s8.bf16 %v851_v3 }
 0x41f   : > { %2900 = vmatpush1.bf16.msra.mxu1 %v1738_v24  ;;  %2860 = vmatprep.subr.bf16.mxu0 %v1679_v57  ;;  %v1775_v24 = vunpack.c.h.s8.bf16 %v883_v10  ;;  %v855_v57 = vld [vmem:[%s5147_s30 + $0xcf8] sm:$0xff] }
 0x420   : > { %2901 = vmatprep.subr.bf16.mxu1 %v1743_v58  ;;  %v2556_v37 = vpop.f32.mrb[36].mxu0  ;;  %v887_v58 = vld [vmem:[%s5147_s30 + $0xdf8] sm:$0xff] }
 0x421   : > { %v2597_v38 = vpop.f32.mrb[36].mxu1  ;;  %v2557_v20 = vadd.f32 %v2556_v37, %v5742_v42  ;;  %v2558_v25 = vpop.f32.mrb[37].mxu0  ;;  %v1687_v42 = vunpack.c.h.s8.bf16 %v839_v13  ;;  %v1710_v13 = vunpack.c.h.s8.bf16 %v850_v61  ;;  %v1719_v37 = vunpack.c.h.s8.bf16 %v855_v57 }
 0x422   : > { %v2599_v63 = vpop.f32.mrb[37].mxu1  ;;  %v2559_v26 = vadd.f32 %v2558_v25, %v5744_v0  ;;  %v2560_v4 = vpop.f32.mrb[38].mxu0  ;;  %2861 = vmatpush1.bf16.msra.mxu0 %v1678_v5  ;;  %v843_v0 = vld [vmem:[%s5147_s30 + $0xc98] sm:$0xff]  ;;  %v1715_v5 = vunpack.c.l.s8.bf16 %v855_v57 }
 0x423   : > { %v2601_v28 = vpop.f32.mrb[38].mxu1  ;;  %2902 = vmatpush1.bf16.msra.mxu1 %v1742_v6  ;;  %v5784_v35 = vadd.f32 %v2597_v38, %v2557_v20  ;;  %v2561_v36 = vpop.f32.mrb[39].mxu0  ;;  %2862 = vmatprep.subr.bf16.mxu0 %v1683_v16  ;;  %v1691_v41 = vunpack.c.l.s8.bf16 %v843_v0  ;;  %v1695_v54 = vunpack.c.h.s8.bf16 %v843_v0  ;;  %v1779_v6 = vunpack.c.l.s8.bf16 %v887_v58  ;;  %v854_v16 = vld [vmem:[%s5147_s30 + $0xcf0] sm:$0xff] }
 0x424   : > { %v2602_v29 = vpop.f32.mrb[39].mxu1  ;;  %2903 = vmatprep.subr.bf16.mxu1 %v1747_v17  ;;  %v5786_v43 = vadd.f32 %v2599_v63, %v2559_v26  ;;  %v886_v17 = vld [vmem:[%s5147_s30 + $0xdf0] sm:$0xff]  ;;  %v1714_v39 = vunpack.c.l.s8.bf16 %v854_v16  ;;  %v1783_v38 = vunpack.c.h.s8.bf16 %v887_v58  ;;  %v1718_v20 = vunpack.c.h.s8.bf16 %v854_v16  ;;  %v4393_v16 = vld [vmem:[#allocation10 + $0x24] ss:$16 sps:$4 sm:$0xff] (!%p4121_p8)  }
 0x425   : > { %v1778_v40 = vunpack.c.l.s8.bf16 %v886_v17  ;;  %v1782_v25 = vunpack.c.h.s8.bf16 %v886_v17  ;;  %v4395_v17 = vld [vmem:[#allocation10 + $0x2c] ss:$16 sps:$4 sm:$0xff] (!%p4121_p8)  }
 0x426   : > { %2863 = vmatpush1.bf16.msra.mxu0 %v1682_v31 }
 0x427   : > { %2904 = vmatpush1.bf16.msra.mxu1 %v1746_v32  ;;  %2864 = vmatprep.subr.bf16.mxu0 %v1687_v42 }
 0x428   : > { %2905 = vmatprep.subr.bf16.mxu1 %v1751_v30 }
 0x42a   : > { %2865 = vmatpush1.bf16.msra.mxu0 %v1686_v50 }
 0x42b   : > { %2906 = vmatpush1.bf16.msra.mxu1 %v1750_v53  ;;  %2866 = vmatprep.subr.bf16.mxu0 %v1691_v41 }
 0x42c   : > { %2907 = vmatprep.subr.bf16.mxu1 %v1755_v19 }
 0x42e   : > { %2867 = vmatpush1.bf16.msra.mxu0 %v1690_v49 }
 0x42f   : > { %2908 = vmatpush1.bf16.msra.mxu1 %v1754_v56  ;;  %2868 = vmatprep.subr.bf16.mxu0 %v1695_v54 }
 0x430   : > { %2909 = vmatprep.subr.bf16.mxu1 %v1759_v1 }
 0x432   : > { %2869 = vmatpush1.bf16.msra.mxu0 %v1694_v18 }
 0x433   : > { %2910 = vmatpush1.bf16.msra.mxu1 %v1758_v8  ;;  %2870 = vmatprep.subr.bf16.mxu0 %v1699_v21 }
 0x434   : > { %2911 = vmatprep.subr.bf16.mxu1 %v1763_v22 }
 0x436   : > { %2871 = vmatpush1.bf16.msra.mxu0 %v1698_v9 }
 0x437   : > { %2912 = vmatpush1.bf16.msra.mxu1 %v1762_v11  ;;  %2872 = vmatprep.subr.bf16.mxu0 %v1703_v45 }
 0x438   : > { %2913 = vmatprep.subr.bf16.mxu1 %v1767_v46 }
 0x43a   : > { %2873 = vmatpush1.bf16.msra.mxu0 %v1702_v33 }
 0x43b   : > { %2914 = vmatpush1.bf16.msra.mxu1 %v1766_v34  ;;  %2874 = vmatprep.subr.bf16.mxu0 %v1707_v15  ;;  %v382_v34 = vld [vmem:[#allocation13 + $0x10] sm:$0xff] }
 0x43c   : > { %2915 = vmatprep.subr.bf16.mxu1 %v1771_v12 }
 0x43e   : > { %2875 = vmatpush1.bf16.msra.mxu0 %v1706_v59  ;;  %v383_v59 = vld [vmem:[#allocation13 + $0x18] sm:$0xff] }
 0x43f   : > { %2916 = vmatpush1.bf16.msra.mxu1 %v1770_v60  ;;  %2876 = vmatprep.subr.bf16.mxu0 %v1711_v23 }
 0x440   : > { %2917 = vmatprep.subr.bf16.mxu1 %v1775_v24 }
 0x442   : > { %2877 = vmatpush1.bf16.msra.mxu0 %v1710_v13  ;;  %v4387_v13 = vld [vmem:[#allocation10 + $0x4] ss:$16 sps:$4 sm:$0xff] (!%p4121_p8)  }
 0x443   : > { %2918 = vmatpush1.bf16.msra.mxu1 %v1774_v14  ;;  %2878 = vmatprep.subr.bf16.mxu0 %v1715_v5  ;;  %v4389_v14 = vld [vmem:[#allocation10 + $0xc] ss:$16 sps:$4 sm:$0xff] (!%p4121_p8)   ;;  %v4391_v5 = vld [vmem:[#allocation10] ss:$16 sps:$4 sm:$0xff] (!%p4121_p8)  }
 0x444   : > { %2919 = vmatprep.subr.bf16.mxu1 %v1779_v6  ;;  %v4392_v6 = vld [vmem:[#allocation10 + $0x8] ss:$16 sps:$4 sm:$0xff] (!%p4121_p8)  }
 0x446   : > { %2879 = vmatpush1.bf16.msra.mxu0 %v1714_v39  ;;  %v4397_v39 = vld [vmem:[#allocation10 + $0x20] ss:$16 sps:$4 sm:$0xff] (!%p4121_p8)  }
 0x447   : > { %2920 = vmatpush1.bf16.msra.mxu1 %v1778_v40  ;;  %2880 = vmatprep.subr.bf16.mxu0 %v1719_v37  ;;  %v4398_v40 = vld [vmem:[#allocation10 + $0x28] ss:$16 sps:$4 sm:$0xff] (!%p4121_p8)   ;;  %v4399_v37 = vld [vmem:[#allocation10 + $0x44] ss:$16 sps:$4 sm:$0xff] (!%p4121_p8)  }
 0x448   : > { %2921 = vmatprep.subr.bf16.mxu1 %v1783_v38  ;;  %v4401_v38 = vld [vmem:[#allocation10 + $0x4c] ss:$16 sps:$4 sm:$0xff] (!%p4121_p8)  }
 0x44a   : > { %2881 = vmatpush1.bf16.msra.mxu0 %v1718_v20  ;;  %v4403_v20 = vld [vmem:[#allocation10 + $0x40] ss:$16 sps:$4 sm:$0xff] (!%p4121_p8)  }
 0x44b   : > { %2922 = vmatpush1.bf16.msra.mxu1 %v1782_v25  ;;  %3798 = vmatprep.subr.bf16.mxu0 (!%p4121_p8), %v4387_v13  ;;  %v4404_v25 = vld [vmem:[#allocation10 + $0x48] ss:$16 sps:$4 sm:$0xff] (!%p4121_p8)  }
 0x44c   : > { %3880 = vmatprep.subr.bf16.mxu1 (!%p4121_p8), %v4389_v14  ;;  %v2944_v14 = vld [vmem:[#allocation13] sm:$0xff] (!%p4121_p8) }
 0x44d   : > { %2883 = vmatmul.mubr.bf16.vlgmr.msra.gmra.mrb[52].mxu0 %v5516_v51 }
 0x44e   : > { %2924 = vmatmul.mubr.bf16.vlgmr.msra.gmra.mrb[52].mxu1 %v5518_v52  ;;  %3799 = vmatpush1.bf16.msra.mxu0 (!%p4121_p8), %v4391_v5  ;;  %v4467_v5 = vld [vmem:[#allocation10 + $0x1ac] ss:$16 sps:$4 sm:$0xff] (!%p4121_p8)  }
 0x44f   : > { %3881 = vmatpush1.bf16.msra.mxu1 (!%p4121_p8), %v4392_v6  ;;  %3800 = vmatprep.subr.bf16.mxu0 (!%p4121_p8), %v4393_v16  ;;  %v4469_v16 = vld [vmem:[#allocation10 + $0x1a0] ss:$16 sps:$4 sm:$0xff] (!%p4121_p8)  }
 0x450   : > { %3882 = vmatprep.subr.bf16.mxu1 (!%p4121_p8), %v4395_v17  ;;  %v4470_v17 = vld [vmem:[#allocation10 + $0x1a8] ss:$16 sps:$4 sm:$0xff] (!%p4121_p8)  }
 0x452   : > { %3801 = vmatpush1.bf16.msra.mxu0 (!%p4121_p8), %v4397_v39 }
 0x453   : > { %3883 = vmatpush1.bf16.msra.mxu1 (!%p4121_p8), %v4398_v40  ;;  %3802 = vmatprep.subr.bf16.mxu0 (!%p4121_p8), %v4399_v37  ;;  %v4471_v37 = vld [vmem:[#allocation10 + $0x1c4] ss:$16 sps:$4 sm:$0xff] (!%p4121_p8)  }
 0x454   : > { %3884 = vmatprep.subr.bf16.mxu1 (!%p4121_p8), %v4401_v38 }
 0x456   : > { %3803 = vmatpush1.bf16.msra.mxu0 (!%p4121_p8), %v4403_v20  ;;  %v4473_v20 = vld [vmem:[#allocation10 + $0x1cc] ss:$16 sps:$4 sm:$0xff] (!%p4121_p8)  }
 0x457   : > { %3885 = vmatpush1.bf16.msra.mxu1 (!%p4121_p8), %v4404_v25  ;;  %v4475_v25 = vld [vmem:[#allocation10 + $0x1c0] ss:$16 sps:$4 sm:$0xff] (!%p4121_p8)  }
 0x460   : > { %v2638_v63 = vpop.f32.mrb[40].mxu0 }
 0x461   : > { %v2679_v26 = vpop.f32.mrb[40].mxu1  ;;  %v2639_v4 = vadd.f32 %v2638_v63, %v5784_v35  ;;  %v2640_v28 = vpop.f32.mrb[41].mxu0  ;;  %v4405_v63 = vld [vmem:[#allocation10 + $0x64] ss:$16 sps:$4 sm:$0xff] (!%p4121_p8)  }
 0x462   : > { %v2681_v31 = vpop.f32.mrb[41].mxu1  ;;  %v2641_v32 = vadd.f32 %v2640_v28, %v5786_v43  ;;  %v2642_v36 = vpop.f32.mrb[42].mxu0  ;;  %v4410_v28 = vld [vmem:[#allocation10 + $0x68] ss:$16 sps:$4 sm:$0xff] (!%p4121_p8)   ;;  %3804 = vmatprep.subr.bf16.mxu0 (!%p4121_p8), %v4405_v63 }
 0x463   : > { %v2683_v29 = vpop.f32.mrb[42].mxu1  ;;  %v2680_v42 = vadd.f32 %v2679_v26, %v2639_v4  ;;  %v2643_v30 = vpop.f32.mrb[43].mxu0  ;;  %v4407_v26 = vld [vmem:[#allocation10 + $0x6c] ss:$16 sps:$4 sm:$0xff] (!%p4121_p8)   ;;  %v4409_v4 = vld [vmem:[#allocation10 + $0x60] ss:$16 sps:$4 sm:$0xff] (!%p4121_p8)  }
 0x464   : > { %v2684_v0 = vpop.f32.mrb[43].mxu1  ;;  %v2682_v44 = vadd.f32 %v2681_v31, %v2641_v32  ;;  %v4411_v31 = vld [vmem:[#allocation10 + $0x84] ss:$16 sps:$4 sm:$0xff] (!%p4121_p8)   ;;  %3886 = vmatprep.subr.bf16.mxu1 (!%p4121_p8), %v4407_v26  ;;  %v4413_v32 = vld [vmem:[#allocation10 + $0x8c] ss:$16 sps:$4 sm:$0xff] (!%p4121_p8)   ;;  %3805 = vmatpush1.bf16.msra.mxu0 (!%p4121_p8), %v4409_v4 }
 0x465   : > { %v4415_v36 = vld [vmem:[#allocation10 + $0x80] ss:$16 sps:$4 sm:$0xff] (!%p4121_p8)   ;;  %v4416_v29 = vld [vmem:[#allocation10 + $0x88] ss:$16 sps:$4 sm:$0xff] (!%p4121_p8)   ;;  %3887 = vmatpush1.bf16.msra.mxu1 (!%p4121_p8), %v4410_v28  ;;  %3806 = vmatprep.subr.bf16.mxu0 (!%p4121_p8), %v4411_v31  ;;  %v4419_v30 = vld [vmem:[#allocation10 + $0xac] ss:$16 sps:$4 sm:$0xff] (!%p4121_p8)  }
 0x466   : > { %3888 = vmatprep.subr.bf16.mxu1 (!%p4121_p8), %v4413_v32  ;;  %v4421_v0 = vld [vmem:[#allocation10 + $0xa0] ss:$16 sps:$4 sm:$0xff] (!%p4121_p8)   ;;  %v4476_v63 = vld [vmem:[#allocation10 + $0x1c8] ss:$16 sps:$4 sm:$0xff] (!%p4121_p8)   ;;  %v4477_v4 = vld [vmem:[#allocation10 + $0x1e4] ss:$16 sps:$4 sm:$0xff] (!%p4121_p8)  }
 0x467   : > { %v4479_v28 = vld [vmem:[#allocation10 + $0x1ec] ss:$16 sps:$4 sm:$0xff] (!%p4121_p8)   ;;  %v4481_v31 = vld [vmem:[#allocation10 + $0x1e0] ss:$16 sps:$4 sm:$0xff] (!%p4121_p8)   ;;  %v4482_v32 = vld [vmem:[#allocation10 + $0x1e8] ss:$16 sps:$4 sm:$0xff] (!%p4121_p8)  }
 0x468   : > { %3807 = vmatpush1.bf16.msra.mxu0 (!%p4121_p8), %v4415_v36 }
 0x469   : > { %3889 = vmatpush1.bf16.msra.mxu1 (!%p4121_p8), %v4416_v29  ;;  %v4485_v29 = vld [vmem:[#allocation10 + $0x204] ss:$16 sps:$4 sm:$0xff] (!%p4121_p8)  }
 0x46a   : > { %3890 = vmatprep.subr.bf16.mxu1 (!%p4121_p8), %v4419_v30  ;;  %v4483_v30 = vld [vmem:[#allocation10 + $0x200] ss:$16 sps:$4 sm:$0xff] (!%p4121_p8)  }
 0x4a0   : > { %v2720_v50 = vpop.f32.mrb[44].mxu0 }
 0x4a1   : > { %v2761_v53 = vpop.f32.mrb[44].mxu1  ;;  %v2721_v41 = vadd.f32 %v2720_v50, %v2680_v42  ;;  %v2722_v51 = vpop.f32.mrb[45].mxu0  ;;  %v4417_v42 = vld [vmem:[#allocation10 + $0xa4] ss:$16 sps:$4 sm:$0xff] (!%p4121_p8)  }
 0x4a2   : > { %v2763_v19 = vpop.f32.mrb[45].mxu1  ;;  %v2723_v52 = vadd.f32 %v2722_v51, %v2682_v44  ;;  %v2724_v55 = vpop.f32.mrb[46].mxu0  ;;  %v4422_v44 = vld [vmem:[#allocation10 + $0xa8] ss:$16 sps:$4 sm:$0xff] (!%p4121_p8)   ;;  %v4423_v50 = vld [vmem:[#allocation10 + $0xc4] ss:$16 sps:$4 sm:$0xff] (!%p4121_p8)   ;;  %3808 = vmatprep.subr.bf16.mxu0 (!%p4121_p8), %v4417_v42 }
 0x4a3   : > { %v2765_v27 = vpop.f32.mrb[46].mxu1  ;;  %v2762_v49 = vadd.f32 %v2761_v53, %v2721_v41  ;;  %v2725_v35 = vpop.f32.mrb[47].mxu0  ;;  %v4425_v53 = vld [vmem:[#allocation10 + $0xcc] ss:$16 sps:$4 sm:$0xff] (!%p4121_p8)   ;;  %v4427_v41 = vld [vmem:[#allocation10 + $0xc0] ss:$16 sps:$4 sm:$0xff] (!%p4121_p8)   ;;  %3809 = vmatpush1.bf16.msra.mxu0 (!%p4121_p8), %v4421_v0  ;;  %3891 = vmatpush1.bf16.msra.mxu1 (!%p4121_p8), %v4422_v44 }
 0x4a4   : > { %v2766_v56 = vpop.f32.mrb[47].mxu1  ;;  %v2764_v54 = vadd.f32 %v2763_v19, %v2723_v52  ;;  %v4428_v51 = vld [vmem:[#allocation10 + $0xc8] ss:$16 sps:$4 sm:$0xff] (!%p4121_p8)   ;;  %v4429_v19 = vld [vmem:[#allocation10 + $0xe4] ss:$16 sps:$4 sm:$0xff] (!%p4121_p8)   ;;  %3810 = vmatprep.subr.bf16.mxu0 (!%p4121_p8), %v4423_v50  ;;  %3892 = vmatprep.subr.bf16.mxu1 (!%p4121_p8), %v4425_v53 }
 0x4a5   : > { %v4431_v52 = vld [vmem:[#allocation10 + $0xec] ss:$16 sps:$4 sm:$0xff] (!%p4121_p8)   ;;  %v4433_v55 = vld [vmem:[#allocation10 + $0xe0] ss:$16 sps:$4 sm:$0xff] (!%p4121_p8)   ;;  %v4434_v27 = vld [vmem:[#allocation10 + $0xe8] ss:$16 sps:$4 sm:$0xff] (!%p4121_p8)  }
 0x4a6   : > { %v4437_v35 = vld [vmem:[#allocation10 + $0x10c] ss:$16 sps:$4 sm:$0xff] (!%p4121_p8)   ;;  %v4439_v56 = vld [vmem:[#allocation10 + $0x100] ss:$16 sps:$4 sm:$0xff] (!%p4121_p8)   ;;  %v4486_v0 = vld [vmem:[#allocation10 + $0x208] ss:$16 sps:$4 sm:$0xff] (!%p4121_p8)  }
 0x4a7   : > { %3811 = vmatpush1.bf16.msra.mxu0 (!%p4121_p8), %v4427_v41  ;;  %3893 = vmatpush1.bf16.msra.mxu1 (!%p4121_p8), %v4428_v51  ;;  %v4488_v42 = vld [vmem:[#allocation10 + $0x20c] ss:$16 sps:$4 sm:$0xff] (!%p4121_p8)   ;;  %v4491_v50 = vld [vmem:[#allocation10 + $0x224] ss:$16 sps:$4 sm:$0xff] (!%p4121_p8)   ;;  %v4489_v41 = vld [vmem:[#allocation10 + $0x220] ss:$16 sps:$4 sm:$0xff] (!%p4121_p8)  }
 0x4a8   : > { %3812 = vmatprep.subr.bf16.mxu0 (!%p4121_p8), %v4429_v19  ;;  %3894 = vmatprep.subr.bf16.mxu1 (!%p4121_p8), %v4431_v52  ;;  %v4494_v53 = vld [vmem:[#allocation10 + $0x22c] ss:$16 sps:$4 sm:$0xff] (!%p4121_p8)   ;;  %v4492_v51 = vld [vmem:[#allocation10 + $0x228] ss:$16 sps:$4 sm:$0xff] (!%p4121_p8)   ;;  %v4497_v19 = vld [vmem:[#allocation10 + $0x244] ss:$16 sps:$4 sm:$0xff] (!%p4121_p8)  }
 0x4a9   : > { %v4500_v52 = vld [vmem:[#allocation10 + $0x24c] ss:$16 sps:$4 sm:$0xff] (!%p4121_p8)  }
 0x4ab   : > { %3813 = vmatpush1.bf16.msra.mxu0 (!%p4121_p8), %v4433_v55  ;;  %3895 = vmatpush1.bf16.msra.mxu1 (!%p4121_p8), %v4434_v27  ;;  %v4495_v55 = vld [vmem:[#allocation10 + $0x240] ss:$16 sps:$4 sm:$0xff] (!%p4121_p8)   ;;  %v4498_v27 = vld [vmem:[#allocation10 + $0x248] ss:$16 sps:$4 sm:$0xff] (!%p4121_p8)  }
 0x4ac   : > { %3896 = vmatprep.subr.bf16.mxu1 (!%p4121_p8), %v4437_v35  ;;  %v4506_v35 = vld [vmem:[#allocation10 + $0x26c] ss:$16 sps:$4 sm:$0xff] (!%p4121_p8)  }
 0x4e0   : > { %v2802_v1 = vpop.f32.mrb[48].mxu0 }
 0x4e1   : > { %v2843_v43 = vpop.f32.mrb[48].mxu1  ;;  %v2803_v7 = vadd.f32 %v2802_v1, %v2762_v49  ;;  %v2804_v2 = vpop.f32.mrb[49].mxu0  ;;  %v4435_v49 = vld [vmem:[#allocation10 + $0x104] ss:$16 sps:$4 sm:$0xff] (!%p4121_p8)  }
 0x4e2   : > { %v2845_v18 = vpop.f32.mrb[49].mxu1  ;;  %v2805_v8 = vadd.f32 %v2804_v2, %v2764_v54  ;;  %v2806_v21 = vpop.f32.mrb[50].mxu0  ;;  %v4440_v54 = vld [vmem:[#allocation10 + $0x108] ss:$16 sps:$4 sm:$0xff] (!%p4121_p8)   ;;  %v4441_v1 = vld [vmem:[#allocation10 + $0x124] ss:$16 sps:$4 sm:$0xff] (!%p4121_p8)   ;;  %3814 = vmatprep.subr.bf16.mxu0 (!%p4121_p8), %v4435_v49 }
 0x4e3   : > { %v2847_v22 = vpop.f32.mrb[50].mxu1  ;;  %v2844_v47 = vadd.f32 %v2843_v43, %v2803_v7  ;;  %v2807_v48 = vpop.f32.mrb[51].mxu0  ;;  %v2950_v43 = vlaneseq (!%p4121_p8)  ;;  %v4443_v7 = vld [vmem:[#allocation10 + $0x12c] ss:$16 sps:$4 sm:$0xff] (!%p4121_p8)   ;;  %v4445_v2 = vld [vmem:[#allocation10 + $0x120] ss:$16 sps:$4 sm:$0xff] (!%p4121_p8)   ;;  %3815 = vmatpush1.bf16.msra.mxu0 (!%p4121_p8), %v4439_v56  ;;  %3897 = vmatpush1.bf16.msra.mxu1 (!%p4121_p8), %v4440_v54 }
 0x4e4   : > { %v2848_v9 = vpop.f32.mrb[51].mxu1  ;;  %v2846_v11 = vadd.f32 %v2845_v18, %v2805_v8  ;;  %v4446_v18 = vld [vmem:[#allocation10 + $0x128] ss:$16 sps:$4 sm:$0xff] (!%p4121_p8)   ;;  %v4447_v8 = vld [vmem:[#allocation10 + $0x144] ss:$16 sps:$4 sm:$0xff] (!%p4121_p8)   ;;  %3816 = vmatprep.subr.bf16.mxu0 (!%p4121_p8), %v4441_v1  ;;  %3898 = vmatprep.subr.bf16.mxu1 (!%p4121_p8), %v4443_v7 }
 0x4e5   : > { %v5809_v21 = vshrl.u32 (!%p4121_p8), %v2950_v43, 7  ;;  %v4449_v22 = vld [vmem:[#allocation10 + $0x14c] ss:$16 sps:$4 sm:$0xff] (!%p4121_p8)   ;;  %v4452_v48 = vld [vmem:[#allocation10 + $0x148] ss:$16 sps:$4 sm:$0xff] (!%p4121_p8)  }
 0x4e6   : > { %v4453_v9 = vld [vmem:[#allocation10 + $0x164] ss:$16 sps:$4 sm:$0xff] (!%p4121_p8)   ;;  %v4501_v56 = vld [vmem:[#allocation10 + $0x260] ss:$16 sps:$4 sm:$0xff] (!%p4121_p8)   ;;  %v4504_v54 = vld [vmem:[#allocation10 + $0x268] ss:$16 sps:$4 sm:$0xff] (!%p4121_p8)  }
 0x4e7   : > { %3817 = vmatpush1.bf16.msra.mxu0 (!%p4121_p8), %v4445_v2  ;;  %3899 = vmatpush1.bf16.msra.mxu1 (!%p4121_p8), %v4446_v18  ;;  %v4503_v49 = vld [vmem:[#allocation10 + $0x264] ss:$16 sps:$4 sm:$0xff] (!%p4121_p8)   ;;  %v4512_v43 = vld [vmem:[#allocation10 + $0x28c] ss:$16 sps:$4 sm:$0xff] (!%p4121_p8)   ;;  %v4507_v7 = vld [vmem:[#allocation10 + $0x280] ss:$16 sps:$4 sm:$0xff] (!%p4121_p8)  }
 0x4e8   : > { %3818 = vmatprep.subr.bf16.mxu0 (!%p4121_p8), %v4447_v8  ;;  %3900 = vmatprep.subr.bf16.mxu1 (!%p4121_p8), %v4449_v22  ;;  %v4509_v1 = vld [vmem:[#allocation10 + $0x284] ss:$16 sps:$4 sm:$0xff] (!%p4121_p8)   ;;  %v4510_v2 = vld [vmem:[#allocation10 + $0x288] ss:$16 sps:$4 sm:$0xff] (!%p4121_p8)   ;;  %v5830_v18 = vsub.s32 (!%p4121_p8), 3, %v5809_v21  ;;  %v5833_v22 = vsub.s32 (!%p4121_p8), 2, %v5809_v21 }
 0x4e9   : > { %v4515_v8 = vld [vmem:[#allocation10 + $0x2a4] ss:$16 sps:$4 sm:$0xff] (!%p4121_p8)  }
 0x4eb   : > { %3901 = vmatpush1.bf16.msra.mxu1 (!%p4121_p8), %v4452_v48  ;;  %v4513_v48 = vld [vmem:[#allocation10 + $0x2a0] ss:$16 sps:$4 sm:$0xff] (!%p4121_p8)  }
 0x520   : > { %v2884_v45 = vpop.f32.mrb[52].mxu0 }
 0x521   : > { %v2925_v46 = vpop.f32.mrb[52].mxu1  ;;  %v2885_v3 = vadd.f32 %v2884_v45, %v2844_v47  ;;  %v2886_v10 = vpop.f32.mrb[53].mxu0  ;;  %v4451_v47 = vld [vmem:[#allocation10 + $0x140] ss:$16 sps:$4 sm:$0xff] (!%p4121_p8)   ;;  %v4455_v45 = vld [vmem:[#allocation10 + $0x16c] ss:$16 sps:$4 sm:$0xff] (!%p4121_p8)  }
 0x522   : > { %v2927_v33 = vpop.f32.mrb[53].mxu1  ;;  %v2887_v15 = vadd.f32 %v2886_v10, %v2846_v11  ;;  %v2888_v12 = vpop.f32.mrb[54].mxu0  ;;  %2943 = sbr.rel (%p4121_p8) target bundleno = 1620 (0x654), region = 76  ;;  %v5812_v11 = vsub.s32 (!%p4121_p8), 1, %v5809_v21  ;;  %v5814_v10 = vld [vmem:[#allocation7] sm:$0xf] (!%p4121_p8)  ;;  %3819 = vmatpush1.bf16.msra.mxu0 (!%p4121_p8), %v4451_v47  ;;  %3902 = vmatprep.subr.bf16.mxu1 (!%p4121_p8), %v4455_v45 }
 0x523   : > { %v2929_v61 = vpop.f32.mrb[54].mxu1  ;;  %v2926_v62 = vadd.f32 %v2925_v46, %v2885_v3  ;;  %v2889_v60 = vpop.f32.mrb[55].mxu0  ;;  %v4457_v46 = vld [vmem:[#allocation10 + $0x160] ss:$16 sps:$4 sm:$0xff] (!%p4121_p8)   ;;  %v4459_v12 = vld [vmem:[#allocation10 + $0x184] ss:$16 sps:$4 sm:$0xff] (!%p4121_p8)   ;;  %3820 = vmatprep.subr.bf16.mxu0 (!%p4121_p8), %v4453_v9  ;;  %v2965_v45 = vrot.slane (!%p4121_p8), %v5814_v10, %v5830_v18 }
 0x524   : > { %v2930_v23 = vpop.f32.mrb[55].mxu1  ;;  %v2928_v24 = vadd.f32 %v2927_v33, %v2887_v15  ;;  %v2945_v3 = vld [vmem:[#allocation13 + $0x8] sm:$0xff] (!%p4121_p8)  ;;  %v5816_v33 = vld [vmem:[#allocation8] sm:$0xf] (!%p4121_p8)  ;;  %v4458_v15 = vld [vmem:[#allocation10 + $0x168] ss:$16 sps:$4 sm:$0xff] (!%p4121_p8)   ;;  %v2957_v61 = vrot.slane (!%p4121_p8), %v5814_v10, %v5812_v11 }
 0x525   : > { %v2934_v57 = vadd.f32 %v2926_v62, %v382_v34  ;;  %v5819_v34 = vsub.s32 (!%p4121_p8), 0, %v5809_v21  ;;  %v2983_v62 = vrot.slane (!%p4121_p8), %v5816_v33, %v5812_v11  ;;  %v4463_v60 = vld [vmem:[#allocation10 + $0x180] ss:$16 sps:$4 sm:$0xff] (!%p4121_p8)   ;;  %3903 = vmatpush1.bf16.msra.mxu1 (!%p4121_p8), %v4458_v15  ;;  %v4518_v47 = vld [vmem:[#allocation10 + $0x2ac] ss:$16 sps:$4 sm:$0xff] (!%p4121_p8)   ;;  %v2991_v21 = vrot.slane (!%p4121_p8), %v5816_v33, %v5830_v18 }
 0x526   : > { %v2935_v58 = vadd.f32 %v2928_v24, %v383_v59  ;;  %v4461_v59 = vld [vmem:[#allocation10 + $0x18c] ss:$16 sps:$4 sm:$0xff] (!%p4121_p8)   ;;  %v2971_v23 = vmul.f32 (!%p4121_p8), %v2957_v61, %v2945_v3  ;;  %v4464_v24 = vld [vmem:[#allocation10 + $0x188] ss:$16 sps:$4 sm:$0xff] (!%p4121_p8)   ;;  %3821 = vmatpush1.bf16.msra.mxu0 (!%p4121_p8), %v4457_v46  ;;  %v4521_v46 = vld [vmem:[#allocation10 + $0x2c4] ss:$16 sps:$4 sm:$0xff] (!%p4121_p8)   ;;  %v2961_v3 = vrot.slane (!%p4121_p8), %v5814_v10, %v5833_v22  ;;  %v2987_v61 = vrot.slane (!%p4121_p8), %v5816_v33, %v5833_v22 }
 0x527   : > { %2938 = vst [vmem:[#allocation13 + $0x10] sm:$0xff] %v2934_v57  ;;  %v4465_v57 = vld [vmem:[#allocation10 + $0x1a4] ss:$16 sps:$4 sm:$0xff] (!%p4121_p8)   ;;  %3822 = vmatprep.subr.bf16.mxu0 (!%p4121_p8), %v4459_v12  ;;  %3904 = vmatprep.subr.bf16.mxu1 (!%p4121_p8), %v4461_v59  ;;  %v2979_v40 = vrot.slane (!%p4121_p8), %v5816_v33, %v5819_v34  ;;  %v4516_v9 = vld [vmem:[#allocation10 + $0x2a8] ss:$16 sps:$4 sm:$0xff] (!%p4121_p8)  }
 0x528   : > { %2939 = vst [vmem:[#allocation13 + $0x18] sm:$0xff] %v2935_v58  ;;  %v2953_v58 = vrot.slane (!%p4121_p8), %v5814_v10, %v5819_v34  ;;  %v2997_v13 = vadd.f32 (!%p4121_p8), %v2983_v62, %v2971_v23  ;;  %v4524_v15 = vld [vmem:[#allocation10 + $0x2cc] ss:$16 sps:$4 sm:$0xff] (!%p4121_p8)   ;;  %v4522_v23 = vld [vmem:[#allocation10 + $0x2c8] ss:$16 sps:$4 sm:$0xff] (!%p4121_p8)  }
 0x529   : > { %3905 = vmatpush1.bf16.msra.mxu1 %v4464_v24  ;;  %v4527_v10 = vld [vmem:[#allocation10 + $0x2e4] ss:$16 sps:$4 sm:$0xff]  }
 0x52a   : > { %v3001_v6 = vmax.f32 %v2997_v13, 0.0  ;;  %v2970_v39 = vmul.f32 %v2953_v58, %v2944_v14  ;;  %3823 = vmatpush1.bf16.msra.mxu0 %v4463_v60  ;;  %3906 = vmatprep.subr.bf16.mxu1 %v4467_v5  ;;  %v4519_v60 = vld [vmem:[#allocation10 + $0x2c0] ss:$16 sps:$4 sm:$0xff]   ;;  %v4533_v33 = vld [vmem:[#allocation10 + $0x304] ss:$16 sps:$4 sm:$0xff]  }
 0x52b   : > { %3824 = vmatprep.subr.bf16.mxu0 %v4465_v57  ;;  %v4530_v57 = vld [vmem:[#allocation10 + $0x2ec] ss:$16 sps:$4 sm:$0xff]   ;;  %v4525_v5 = vld [vmem:[#allocation10 + $0x2e0] ss:$16 sps:$4 sm:$0xff]  }
 0x52c   : > { %v3005_v38 = vpack.c.bf16 %v3001_v6, %v3001_v6  ;;  %v2996_v26 = vadd.f32 %v2979_v40, %v2970_v39  ;;  %v4528_v6 = vld [vmem:[#allocation10 + $0x2e8] ss:$16 sps:$4 sm:$0xff]   ;;  %v4531_v39 = vld [vmem:[#allocation10 + $0x300] ss:$16 sps:$4 sm:$0xff]  }
 0x52d   : > { %3907 = vmatpush1.bf16.msra.mxu1 %v4470_v17  ;;  %v4534_v40 = vld [vmem:[#allocation10 + $0x308] ss:$16 sps:$4 sm:$0xff]  }
 0x52e   : > { %3830 = vmatprep.mubr.bf16.mxu0 %v3005_v38  ;;  %3912 = vmatprep.mubr.bf16.mxu1 %v3005_v38  ;;  %v3000_v36 = vmax.f32 %v2996_v26, 0.0  ;;  %v2946_v59 = vld [vmem:[#allocation13 + $0x10] sm:$0xff]  ;;  %v4542_v38 = vld [vmem:[#allocation10 + $0x32c] ss:$16 sps:$4 sm:$0xff]  }
 0x52f   : > { %3825 = vmatpush1.bf16.msra.mxu0 %v4469_v16  ;;  %3908 = vmatprep.subr.bf16.mxu1 %v4473_v20  ;;  %v2947_v12 = vld [vmem:[#allocation13 + $0x18] sm:$0xff]  ;;  %v2972_v24 = vmul.f32 %v2961_v3, %v2946_v59 }
 0x530   : > { %3826 = vmatprep.subr.bf16.mxu0 %v4471_v37  ;;  %v3004_v44 = vpack.c.bf16 %v3000_v36, %v3000_v36  ;;  %v2973_v62 = vmul.f32 %v2965_v45, %v2947_v12  ;;  %v4536_v16 = vld [vmem:[#allocation10 + $0x30c] ss:$16 sps:$4 sm:$0xff]   ;;  %v4539_v37 = vld [vmem:[#allocation10 + $0x324] ss:$16 sps:$4 sm:$0xff]   ;;  %v4537_v20 = vld [vmem:[#allocation10 + $0x320] ss:$16 sps:$4 sm:$0xff]  }
 0x531   : > { %3909 = vmatpush1.bf16.msra.mxu1 %v4476_v63  ;;  %v5843_v13 = vadd.f32 %v2987_v61, %v2972_v24  ;;  %v4545_v63 = vld [vmem:[#allocation10 + $0x344] ss:$16 sps:$4 sm:$0xff]   ;;  %v4548_v26 = vld [vmem:[#allocation10 + $0x34c] ss:$16 sps:$4 sm:$0xff]   ;;  %v4549_v36 = vld [vmem:[#allocation10 + $0x360] ss:$16 sps:$4 sm:$0xff]  }
 0x532   : > { %3910 = vmatprep.subr.bf16.mxu1 %v4479_v28  ;;  %v2999_v58 = vadd.f32 %v2991_v21, %v2973_v62  ;;  %v4546_v28 = vld [vmem:[#allocation10 + $0x348] ss:$16 sps:$4 sm:$0xff]  }
 0x533   : > { %3827 = vmatpush1.bf16.msra.mxu0 %v4475_v25  ;;  %v4540_v25 = vld [vmem:[#allocation10 + $0x328] ss:$16 sps:$4 sm:$0xff]  }
 0x534   : > { %3828 = vmatprep.subr.bf16.mxu0 %v4477_v4  ;;  %v3003_v14 = vmax.f32 %v2999_v58, 0.0  ;;  %v4543_v4 = vld [vmem:[#allocation10 + $0x340] ss:$16 sps:$4 sm:$0xff]  }
 0x535   : > { %3911 = vmatpush1.bf16.msra.mxu1 %v4482_v32  ;;  %v4554_v32 = vld [vmem:[#allocation10 + $0x36c] ss:$16 sps:$4 sm:$0xff]  }
 0x536   : > { %3921 = vmatprep.subr.bf16.mxu1 %v4488_v42  ;;  %v3007_v17 = vpack.c.bf16 %v3003_v14, %v3003_v14  ;;  %v4557_v42 = vld [vmem:[#allocation10 + $0x384] ss:$16 sps:$4 sm:$0xff]  }
 0x537   : > { %3829 = vmatpush1.bf16.msra.mxu0 %v4481_v31  ;;  %v4551_v31 = vld [vmem:[#allocation10 + $0x364] ss:$16 sps:$4 sm:$0xff]  }
 0x538   : > { %3839 = vmatprep.subr.bf16.mxu0 %v4485_v29  ;;  %3913 = vmatmul.mubr.bf16.vlgmr.msra.gmra.mrb[0].mxu1 %v3004_v44  ;;  %v4552_v29 = vld [vmem:[#allocation10 + $0x368] ss:$16 sps:$4 sm:$0xff]  }
 0x539   : > { %3922 = vmatpush1.bf16.msra.mxu1 %v4486_v0  ;;  %3953 = vmatprep.mubr.bf16.mxu1 %v3007_v17  ;;  %v4555_v0 = vld [vmem:[#allocation10 + $0x380] ss:$16 sps:$4 sm:$0xff]  }
 0x53a   : > { %3831 = vmatmul.mubr.bf16.vlgmr.msra.gmra.mrb[0].mxu0 %v3004_v44  ;;  %3923 = vmatprep.subr.bf16.mxu1 %v4494_v53  ;;  %v4558_v44 = vld [vmem:[#allocation10 + $0x388] ss:$16 sps:$4 sm:$0xff]   ;;  %v4566_v53 = vld [vmem:[#allocation10 + $0x3ac] ss:$16 sps:$4 sm:$0xff]  }
 0x53b   : > { %3840 = vmatpush1.bf16.msra.mxu0 %v4483_v30  ;;  %3871 = vmatprep.mubr.bf16.mxu0 %v3007_v17  ;;  %v4560_v30 = vld [vmem:[#allocation10 + $0x38c] ss:$16 sps:$4 sm:$0xff]  }
 0x53c   : > { %3841 = vmatprep.subr.bf16.mxu0 %v4491_v50  ;;  %v4563_v50 = vld [vmem:[#allocation10 + $0x3a4] ss:$16 sps:$4 sm:$0xff]  }
 0x53d   : > { %3924 = vmatpush1.bf16.msra.mxu1 %v4492_v51  ;;  %v4564_v51 = vld [vmem:[#allocation10 + $0x3a8] ss:$16 sps:$4 sm:$0xff]  }
 0x53e   : > { %3925 = vmatprep.subr.bf16.mxu1 %v4500_v52  ;;  %v4572_v52 = vld [vmem:[#allocation10 + $0x3cc] ss:$16 sps:$4 sm:$0xff]  }
 0x53f   : > { %3842 = vmatpush1.bf16.msra.mxu0 %v4489_v41  ;;  %v4561_v41 = vld [vmem:[#allocation10 + $0x3a0] ss:$16 sps:$4 sm:$0xff]  }
 0x540   : > { %3843 = vmatprep.subr.bf16.mxu0 %v4497_v19  ;;  %v4569_v19 = vld [vmem:[#allocation10 + $0x3c4] ss:$16 sps:$4 sm:$0xff]  }
 0x541   : > { %3926 = vmatpush1.bf16.msra.mxu1 %v4498_v27  ;;  %v4570_v27 = vld [vmem:[#allocation10 + $0x3c8] ss:$16 sps:$4 sm:$0xff]  }
 0x542   : > { %3927 = vmatprep.subr.bf16.mxu1 %v4506_v35  ;;  %v4578_v35 = vld [vmem:[#allocation10 + $0x3ec] ss:$16 sps:$4 sm:$0xff]  }
 0x543   : > { %3844 = vmatpush1.bf16.msra.mxu0 %v4495_v55  ;;  %v4567_v55 = vld [vmem:[#allocation10 + $0x3c0] ss:$16 sps:$4 sm:$0xff]  }
 0x544   : > { %3845 = vmatprep.subr.bf16.mxu0 %v4503_v49  ;;  %v4575_v49 = vld [vmem:[#allocation10 + $0x3e4] ss:$16 sps:$4 sm:$0xff]  }
 0x545   : > { %3928 = vmatpush1.bf16.msra.mxu1 %v4504_v54  ;;  %v4573_v54 = vld [vmem:[#allocation10 + $0x3e0] ss:$16 sps:$4 sm:$0xff]  }
 0x546   : > { %3929 = vmatprep.subr.bf16.mxu1 %v4512_v43 }
 0x547   : > { %3846 = vmatpush1.bf16.msra.mxu0 %v4501_v56  ;;  %v3002_v56 = vmax.f32 %v5843_v13, 0.0 }
 0x548   : > { %3847 = vmatprep.subr.bf16.mxu0 %v4509_v1  ;;  %v4576_v1 = vld [vmem:[#allocation10 + $0x3e8] ss:$16 sps:$4 sm:$0xff]  }
 0x549   : > { %3930 = vmatpush1.bf16.msra.mxu1 %v4510_v2  ;;  %v3006_v43 = vpack.c.bf16 %v3002_v56, %v3002_v56 }
 0x54a   : > { %3931 = vmatprep.subr.bf16.mxu1 %v4518_v47 }
 0x54b   : > { %3848 = vmatpush1.bf16.msra.mxu0 %v4507_v7  ;;  %v3136_v7 = vld [vmem:[#allocation11] sm:$0xf] }
 0x54c   : > { %3849 = vmatprep.subr.bf16.mxu0 %v4515_v8  ;;  %v3141_v2 = vrot.slane %v3136_v7, %v5819_v34  ;;  %v3149_v8 = vrot.slane %v3136_v7, %v5833_v22  ;;  %v3145_v47 = vrot.slane %v3136_v7, %v5812_v11 }
 0x54d   : > { %3932 = vmatpush1.bf16.msra.mxu1 %v4516_v9 }
 0x54e   : > { %3933 = vmatprep.subr.bf16.mxu1 %v4524_v15 }
 0x54f   : > { %3850 = vmatpush1.bf16.msra.mxu0 %v4513_v48  ;;  %v3153_v48 = vrot.slane %v3136_v7, %v5830_v18 }
 0x550   : > { %3851 = vmatprep.subr.bf16.mxu0 %v4521_v46 }
 0x551   : > { %3934 = vmatpush1.bf16.msra.mxu1 %v4522_v23 }
 0x552   : > { %3935 = vmatprep.subr.bf16.mxu1 %v4530_v57 }
 0x553   : > { %3852 = vmatpush1.bf16.msra.mxu0 %v4519_v60 }
 0x554   : > { %3853 = vmatprep.subr.bf16.mxu0 %v4527_v10 }
 0x555   : > { %3936 = vmatpush1.bf16.msra.mxu1 %v4528_v6 }
 0x556   : > { %3937 = vmatprep.subr.bf16.mxu1 %v4536_v16 }
 0x557   : > { %3854 = vmatpush1.bf16.msra.mxu0 %v4525_v5 }
 0x558   : > { %3855 = vmatprep.subr.bf16.mxu0 %v4533_v33 }
 0x559   : > { %3938 = vmatpush1.bf16.msra.mxu1 %v4534_v40 }
 0x55a   : > { %3939 = vmatprep.subr.bf16.mxu1 %v4542_v38 }
 0x55b   : > { %3856 = vmatpush1.bf16.msra.mxu0 %v4531_v39 }
 0x55c   : > { %3857 = vmatprep.subr.bf16.mxu0 %v4539_v37 }
 0x55d   : > { %3940 = vmatpush1.bf16.msra.mxu1 %v4540_v25 }
 0x55e   : > { %3941 = vmatprep.subr.bf16.mxu1 %v4548_v26 }
 0x55f   : > { %3858 = vmatpush1.bf16.msra.mxu0 %v4537_v20 }
 0x560   : > { %3859 = vmatprep.subr.bf16.mxu0 %v4545_v63 }
 0x561   : > { %3942 = vmatpush1.bf16.msra.mxu1 %v4546_v28 }
 0x562   : > { %3943 = vmatprep.subr.bf16.mxu1 %v4554_v32 }
 0x563   : > { %3860 = vmatpush1.bf16.msra.mxu0 %v4543_v4 }
 0x564   : > { %3861 = vmatprep.subr.bf16.mxu0 %v4551_v31 }
 0x565   : > { %3944 = vmatpush1.bf16.msra.mxu1 %v4552_v29 }
 0x566   : > { %3945 = vmatprep.subr.bf16.mxu1 %v4560_v30 }
 0x567   : > { %3862 = vmatpush1.bf16.msra.mxu0 %v4549_v36 }
 0x568   : > { %3863 = vmatprep.subr.bf16.mxu0 %v4557_v42 }
 0x569   : > { %3946 = vmatpush1.bf16.msra.mxu1 %v4558_v44 }
 0x56a   : > { %3947 = vmatprep.subr.bf16.mxu1 %v4566_v53 }
 0x56b   : > { %3864 = vmatpush1.bf16.msra.mxu0 %v4555_v0 }
 0x56c   : > { %3865 = vmatprep.subr.bf16.mxu0 %v4563_v50 }
 0x56d   : > { %3948 = vmatpush1.bf16.msra.mxu1 %v4564_v51 }
 0x56e   : > { %3949 = vmatprep.subr.bf16.mxu1 %v4572_v52 }
 0x56f   : > { %3866 = vmatpush1.bf16.msra.mxu0 %v4561_v41 }
 0x570   : > { %3867 = vmatprep.subr.bf16.mxu0 %v4569_v19 }
 0x571   : > { %3950 = vmatpush1.bf16.msra.mxu1 %v4570_v27 }
 0x572   : > { %3951 = vmatprep.subr.bf16.mxu1 %v4578_v35 }
 0x573   : > { %3868 = vmatpush1.bf16.msra.mxu0 %v4567_v55 }
 0x574   : > { %3869 = vmatprep.subr.bf16.mxu0 %v4575_v49 }
 0x575   : > { %3952 = vmatpush1.bf16.msra.mxu1 %v4576_v1 }
 0x577   : > { %3870 = vmatpush1.bf16.msra.mxu0 %v4573_v54 }
 0x578   : > { %3954 = vmatmul.mubr.bf16.vlgmr.msra.gmra.mrb[0].mxu1 %v3006_v43 }
 0x57a   : > { %3872 = vmatmul.mubr.bf16.vlgmr.msra.gmra.mrb[0].mxu0 %v3006_v43 }
 0x64b   : > { %v3955_v45 = vpop.f32.mrb[0].mxu1 }
 0x64c   : > { %v4260_v3 = vadd.f32 %v3955_v45, %v3149_v8  ;;  %v3957_v21 = vpop.f32.mrb[1].mxu1 }
 0x64d   : > { %v3873_v9 = vpop.f32.mrb[0].mxu0  ;;  %v4261_v61 = vadd.f32 %v3957_v21, %v3153_v48  ;;  %v3959_v59 = vpop.f32.mrb[2].mxu1 }
 0x64e   : > { %v4258_v46 = vadd.f32 %v3873_v9, %v3141_v2  ;;  %v3875_v15 = vpop.f32.mrb[1].mxu0  ;;  %v3964_v23 = vmax.f32 %v4260_v3, 0.0  ;;  %v3960_v34 = vpop.f32.mrb[3].mxu1 }
 0x64f   : > { %v4259_v12 = vadd.f32 %v3875_v15, %v3145_v47  ;;  %v3877_v62 = vpop.f32.mrb[2].mxu0  ;;  %v3965_v22 = vmax.f32 %v4261_v61, 0.0 }
 0x650   : > { %v3962_v60 = vmax.f32 %v4258_v46, 0.0  ;;  %v3878_v24 = vpop.f32.mrb[3].mxu0  ;;  %3968 = vst [vmem:[#allocation13 + $0x10] sm:$0xff] %v3964_v23 }
 0x651   : > { %v3963_v10 = vmax.f32 %v4259_v12, 0.0  ;;  %3969 = vst [vmem:[#allocation13 + $0x18] sm:$0xff] %v3965_v22 }
 0x652   : > { %3966 = vst [vmem:[#allocation13] sm:$0xff] %v3962_v60 }
 0x653   : > { %3967 = vst [vmem:[#allocation13 + $0x8] sm:$0xff] %v3963_v10 }
 0x654 PF: > { %p4327_p4 = scmp.eq.s32.totalorder %s4927_s27, 6  ;;  %s4860_s24 = smov [#allocation13]  }
 0x655   : > { %s3980_s28 = sshll.u32 %s4860_s24, 4  ;;  %s3981_s28 = int_to_ptr.vmem [resolvable:$true] %s3980_s28 }
 0x656   : > { %s4751_s9 = scalar_lea.vmem %s3981_s28, 512  ;;  %p4758_p12 = scmp.lt.s32.totalorder %s3981_s28, %s3981_s28 }
 0x657   : > { %p4752_p9 = scmp.ne.s32.totalorder %s3981_s28, %s4751_s9  ;;  %p4759_p0 = scmp.lt.s32.totalorder %s4751_s9, %s4751_s9 }
 0x659   : > { %p4753_p3 = pnand %p4752_p9, %p4327_p4  ;;  %p4760_p5 = por %p4759_p0, %p4758_p12 }
 0x65b   : > { %p4754_p11 = pneg %p4753_p3 }
 0x65d   : > { %p4761_p1 = pnand %p4760_p5, %p4754_p11 }
 0x65f   : > { %4764 = shalt.err (!%p4761_p1)
}
 0x660   : > { %s4765_s29 = scalar_lea.hbm %s5897_s6, 512 }
 0x661   : > { %p4766_p13 = scmp.ne.s32.totalorder %s5897_s6, %s4765_s29  ;;  %p4771_p6 = scmp.lt.u32.totalorder %s4765_s29, %s5897_s6 }
 0x663   : > { %p4767_p2 = pnand %p4766_p13, %p4327_p4 }
 0x665   : > { %p4768_p7 = pneg %p4767_p2 }
 0x667   : > { %p4773_p10 = pnand %p4771_p6, %p4768_p7 }
 0x669   : > { %4776 = shalt.err (!%p4773_p10)
}
 0x66a   : > { %4295 = dma.vmem_to_hbm [thread:$0]  (%p4327_p4), %s3981_s28, 512, %s5897_s6, [#allocation4]  }
 0x66b   : > { %4822 = dma.done.wait (%p4327_p4), [#allocation4], 512  }
 0x66c   : > { %4824 = vsyncadd (%p4327_p4), [#allocation4], 4294966784 }
 0x66d PF: > { %s25_s26 = sadd.s32 1, %s4847_s26   ;;  %s5915_s21 = smov %s4831_s22 }
 0x66e   : > { %p22_p8 = scmp.ge.s32.totalorder %s25_s26, 9   ;;  %s5916_s22 = smov %s4835_s23 }
 0x66f   : > { %s5917_s23 = smov %s5059_s7  ;;  %s5918_s24 = smov %s4843_s25 }
 0x670   : > { %s5919_s25 = smov %s5921_s17  ;;  %24 = sbr.rel (!%p22_p8) target bundleno = 11 (0xb), region = 119 }
 0x677   :  { %3993 = vsyncpa [#allocation3], 1 }
 0x678   :  { %3995 = vsyncpa [#allocation3 + $0x1], 1 }
 0x679   :  { %3996 = vsyncpa [#allocation6], 1 }
 0x67a   :  { %3998 = vsyncpa [#allocation6 + $0x1], 1 }
 0x67b   :  { %3999 = vsyncpa [#allocation9], 1 }
 0x67c   :  { %4000 = vsyncpa [#allocation12], 1 }
 0x67d   :  { %4001 = vsyncpa [#allocation4], 1 }
 0x67e   :  { %4003 = vsyncpa [#allocation4 + $0x1], 1 }

</bundles_post_ra>
